<compile_context>
chip_gen: v7x
topology: tpu7x:2x2x1
jax: 0.10.0
libtpu: 0.0.40
codegen_flags: <defaults>
</compile_context>

<pallas_src>
import math

import jax
import jax.numpy as jnp
from jax import lax
from jax.experimental import pallas as pl
from jax.experimental.pallas import tpu as pltpu

# Model hyper-parameters (small, consistent with the module's forward).
D_MODEL = 32
HEADS = 4
D_K = D_MODEL // HEADS
D_FF = 64
N_LAYERS = 2
EPS = 1e-6
NEG_INF = -1e9
SCALE = 1.0 / math.sqrt(D_K)

# Column layout of the packed per-layer weight slab (see _pack_params).
_QKV0, _QKV1 = 0, 3 * D_MODEL                 # fused self-attn Q|K|V (Q pre-scaled)
_WOS0, _WOS1 = _QKV1, _QKV1 + D_MODEL         # self-attn output projection
_WQC0, _WQC1 = _WOS1, _WOS1 + D_MODEL         # cross-attn Q projection (pre-scaled)
_WOC0, _WOC1 = _WQC1, _WQC1 + D_MODEL         # cross-attn output projection
_W10, _W11 = _WOC1, _WOC1 + D_FF              # feed-forward first matmul
SLAB_W = _W11                                 # 256


# ----------------------------- kernel helpers -----------------------------
def _norm(v, alpha, bias):
    # PyTorch tutorial `Norm`: alpha * (x - mean) / (std_unbiased + eps) + bias
    mean = jnp.mean(v, axis=-1, keepdims=True)
    var = jnp.sum((v - mean) ** 2, axis=-1, keepdims=True) * (1.0 / (D_MODEL - 1))
    s = jnp.sqrt(var) + EPS
    # EUP approximate reciprocal + one Newton step: ~f32-exact, no VPU divide.
    r = pl.reciprocal(s, approx=True)
    r = r * (2.0 - s * r)
    return alpha * (v - mean) * r + bias


def _attention(q, k, v, rep_ref, blk_ref, seg_ref, bias_ref, wo, bo):
    """All-head attention: no head loop, no lane slicing, no sublane concat.

    q: (Nq, D) f32 (Q weights pre-scaled by 1/sqrt(d_k)); k, v: (Nk, D) f32;
    rep_ref: (H*Nk, Nk) 0/1 bf16 row-replication matrix (replication on MXU);
    blk_ref: (H*Nk, D) 0/1 f32 head-block column mask;
    seg_ref: (H*Nk, H*Nk) 0/1 bf16 same-head segment matrix;
    bias_ref: (Nq, H*Nk) f32 additive mask; wo: (D, D) bf16; bo: (1, D) bf16.
    The constant matrices are loaded here, at the point of use, so they are
    never kept live across the unrolled layer loop.
    """
    bf16 = jnp.bfloat16
    f32 = jnp.float32
    rep = rep_ref[...]
    blk = blk_ref[...]
    # Head-replicated, block-masked K/V via one MXU matmul each (row block h
    # of k_bd/v_bd only keeps head h's feature dims).
    k_bd = (jnp.dot(rep, k.astype(bf16), preferred_element_type=f32)
            * blk).astype(bf16)                                  # (H*Nk, D)
    v_bd = (jnp.dot(rep, v.astype(bf16), preferred_element_type=f32)
            * blk).astype(bf16)                                  # (H*Nk, D)
    # One wide MXU matmul yields every head's scores: (Nq, H*Nk).
    scores = lax.dot_general(q.astype(bf16), k_bd, (((1,), (1,)), ((), ())),
                             preferred_element_type=f32) + bias_ref[...]
    # A row-global max is a valid per-row shift for every head's softmax.
    m = jnp.max(scores, axis=-1, keepdims=True)
    p = jnp.exp(scores - m)
    # Per-head denominators via one matmul with the constant 0/1 segment matrix.
    denom = jnp.dot(p.astype(bf16), seg_ref[...], preferred_element_type=f32)
    denom = denom + 1e-30            # guard: an underflowed head can't make inf/NaN
    r = pl.reciprocal(denom, approx=True)
    r = r * (2.0 - denom * r)        # one Newton step -> ~f32-exact normalisation
    p = p * r
    # (Nq, H*Nk) @ (H*Nk, D) is exactly concat-of-heads in column-block layout.
    heads = jnp.dot(p.astype(bf16), v_bd, preferred_element_type=f32)
    return jnp.dot(heads.astype(bf16), wo, preferred_element_type=f32) + bo.astype(f32)


# ------------------------------ fused kernel -------------------------------
def decoder_fused_kernel(
    x_ref, eo_ref,
    self_bias_ref, cross_bias_ref,
    rep_s_ref, blk_s_ref, seg_s_ref,
    rep_c_ref, blk_c_ref, seg_c_ref,
    wb_ref, w2b_ref, ckv_ref, norm_ref, fin_ref,
    out_ref,
):
    f32 = jnp.float32
    bf16 = jnp.bfloat16

    x = x_ref[...]                                            # (n_t, D) f32

    # Hoisted off the serial x-dependent chain: the cross-attention K/V
    # projection of the encoder outputs for BOTH layers in one 128-lane matmul.
    kv_all = (jnp.dot(eo_ref[...].astype(bf16), ckv_ref[0:D_MODEL, :],
                      preferred_element_type=f32)
              + ckv_ref[D_MODEL:D_MODEL + 1, :].astype(f32))  # (n_s, L*2D)

    for l in range(N_LAYERS):   # static unroll; all weight slices statically indexed
        # ----- masked multi-head self-attention sublayer -----
        x2 = _norm(x, norm_ref[l, 0:1, :], norm_ref[l, 3:4, :])
        qkv = (jnp.dot(x2.astype(bf16), wb_ref[l, 0:D_MODEL, _QKV0:_QKV1],
                       preferred_element_type=f32)
               + wb_ref[l, D_MODEL:D_MODEL + 1, _QKV0:_QKV1].astype(f32))
        x = x + _attention(
            qkv[:, 0:D_MODEL],
            qkv[:, D_MODEL:2 * D_MODEL],
            qkv[:, 2 * D_MODEL:3 * D_MODEL],
            rep_s_ref, blk_s_ref, seg_s_ref, self_bias_ref,
            wb_ref[l, 0:D_MODEL, _WOS0:_WOS1],
            wb_ref[l, D_MODEL:D_MODEL + 1, _WOS0:_WOS1])

        # ----- multi-head cross-attention sublayer -----
        x2 = _norm(x, norm_ref[l, 1:2, :], norm_ref[l, 4:5, :])
        qc = (jnp.dot(x2.astype(bf16), wb_ref[l, 0:D_MODEL, _WQC0:_WQC1],
                      preferred_element_type=f32)
              + wb_ref[l, D_MODEL:D_MODEL + 1, _WQC0:_WQC1].astype(f32))
        kc = kv_all[:, 2 * D_MODEL * l: 2 * D_MODEL * l + D_MODEL]
        vc = kv_all[:, 2 * D_MODEL * l + D_MODEL: 2 * D_MODEL * (l + 1)]
        x = x + _attention(
            qc, kc, vc,
            rep_c_ref, blk_c_ref, seg_c_ref, cross_bias_ref,
            wb_ref[l, 0:D_MODEL, _WOC0:_WOC1],
            wb_ref[l, D_MODEL:D_MODEL + 1, _WOC0:_WOC1])

        # ----- feed-forward sublayer -----
        x2 = _norm(x, norm_ref[l, 2:3, :], norm_ref[l, 5:6, :])
        h = jnp.maximum(
            jnp.dot(x2.astype(bf16), wb_ref[l, 0:D_MODEL, _W10:_W11],
                    preferred_element_type=f32)
            + wb_ref[l, D_MODEL:D_MODEL + 1, _W10:_W11].astype(f32),
            0.0)
        x = x + (jnp.dot(h.astype(bf16), w2b_ref[l, 0:D_FF, :],
                         preferred_element_type=f32)
                 + w2b_ref[l, D_FF:D_FF + 1, :].astype(f32))
        # TODO(synk): dropout layers are identity here (eval-mode semantics).

    out_ref[...] = _norm(x, fin_ref[0:1, :], fin_ref[1:2, :]).astype(out_ref.dtype)


# ------------------------- wrapper-side constants ---------------------------
def _head_block_mask(n_kv):
    # (H*n_kv, D): row block h keeps only columns [h*D_K, (h+1)*D_K).
    h_idx = jnp.repeat(jnp.arange(HEADS), n_kv)
    d_idx = jnp.arange(D_MODEL)
    return (d_idx[None, :] // D_K == h_idx[:, None]).astype(jnp.float32)


def _replicate_matrix(n_kv):
    # (H*n_kv, n_kv) 0/1: row h*n_kv + j selects source row j (MXU replication).
    return jnp.tile(jnp.eye(n_kv, dtype=jnp.float32), (HEADS, 1)).astype(jnp.bfloat16)


def _segment_matrix(n_kv):
    # (H*n_kv, H*n_kv): 1 where both indices belong to the same head block.
    g = jnp.arange(HEADS * n_kv) // n_kv
    return (g[:, None] == g[None, :]).astype(jnp.bfloat16)


def _attn_bias(mask, batch, s_q, s_k):
    """(B, s_q|1, s_k) 0/1 mask -> (B*s_q, H*B*s_k) additive bias.

    Off-batch blocks get NEG_INF so flattened-batch attention never mixes batch
    elements; the identical bias is tiled once per head (head-major columns).
    """
    m = jnp.broadcast_to(mask, (batch, s_q, s_k))
    bias = jnp.where(m == 0, NEG_INF, 0.0).astype(jnp.float32)
    full = jnp.full((batch, s_q, batch, s_k), NEG_INF, jnp.float32)
    idx = jnp.arange(batch)
    full = full.at[idx, :, idx, :].set(bias)
    flat = full.reshape(batch * s_q, batch * s_k)
    return jnp.tile(flat, (1, HEADS))


def _pack_params(params):
    """Pack the ~26 per-layer weight/bias tensors into 5 slabs.

    wb_slab   (L, D+1, 256) bf16 : rows 0:D weights, row D the matching biases.
              columns = [Wq*s|Wk|Wv (96) | Wo_self (32) | Wq_cross*s (32)
                         | Wo_cross (32) | W1 (64)]
    w2b_slab  (L, D_FF+1, D) bf16 : rows 0:D_FF = W2, row D_FF = b2.
    ckv_slab  (D+1, L*2D)    bf16 : both layers' cross K/V projections + bias row.
    norm_slab (L, 6, D)      f32  : rows 0:3 alpha, rows 3:6 bias (3 sub-layer norms).
    fin_slab  (2, D)         f32  : final Norm alpha / bias.
    1/sqrt(d_k) is folded into the Q weights/biases (no score scaling in-kernel).
    """
    layers = params["layers"]
    bf16 = jnp.bfloat16

    def layer_wb(p):
        w_row = jnp.concatenate(
            [p["self_w"][0] * SCALE, p["self_w"][1], p["self_w"][2],   # fused QKV
             p["self_w"][3],                                           # Wo self
             p["cross_w"][0] * SCALE,                                  # Wq cross
             p["cross_w"][3],                                          # Wo cross
             p["ff_w1"]], axis=1)                                      # W1
        b_row = jnp.concatenate(
            [p["self_b"][0] * SCALE, p["self_b"][1], p["self_b"][2],
             p["self_b"][3],
             p["cross_b"][0] * SCALE,
             p["cross_b"][3],
             p["ff_b1"][0]])
        return jnp.concatenate([w_row, b_row[None, :]], axis=0)        # (D+1, 256)

    wb_slab = jnp.stack([layer_wb(p) for p in layers]).astype(bf16)
    w2b_slab = jnp.stack(
        [jnp.concatenate([p["ff_w2"], p["ff_b2"]], axis=0) for p in layers]).astype(bf16)
    ckv_w = jnp.concatenate(
        [jnp.concatenate([p["cross_w"][1], p["cross_w"][2]], axis=1) for p in layers],
        axis=1)
    ckv_b = jnp.concatenate(
        [jnp.concatenate([p["cross_b"][1], p["cross_b"][2]]) for p in layers])[None, :]
    ckv_slab = jnp.concatenate([ckv_w, ckv_b], axis=0).astype(bf16)    # (D+1, L*2D)
    norm_slab = jnp.stack(
        [jnp.concatenate([p["norm_a"], p["norm_b"]], axis=0) for p in layers])
    fin_slab = jnp.concatenate([params["final_a"], params["final_b"]], axis=0)
    return wb_slab, w2b_slab, ckv_slab, norm_slab, fin_slab


def decoder_forward(trg, e_outputs, src_mask, trg_mask, params):
    batch, s_t = trg.shape
    s_s = e_outputs.shape[1]
    n_t, n_s = batch * s_t, batch * s_s

    # Embedder + PositionalEncoder (plain-JAX glue: gather + scale + add).
    x = params["embed"][trg] * math.sqrt(D_MODEL)
    x = x + params["pe"][:s_t][None, :, :]

    # Constants shared by all heads and both layers (mask handling hoisted out
    # of the kernel).  The additive biases also block cross-batch attention in
    # the flattened (batch*seq, d_model) layout.
    self_bias = _attn_bias(trg_mask, batch, s_t, s_t)       # (n_t, H*n_t)
    cross_bias = _attn_bias(src_mask, batch, s_t, s_s)      # (n_t, H*n_s)
    rep_self, rep_cross = _replicate_matrix(n_t), _replicate_matrix(n_s)
    blk_self, blk_cross = _head_block_mask(n_t), _head_block_mask(n_s)
    seg_self, seg_cross = _segment_matrix(n_t), _segment_matrix(n_s)

    out_flat = pl.pallas_call(
        decoder_fused_kernel,
        out_shape=jax.ShapeDtypeStruct((n_t, D_MODEL), jnp.float32),
        # Grid-less single block: every operand is VMEM resident exactly once
        # (~0.4 MB total), no per-grid-step overhead, no double buffering of
        # constant weights.  (If batch*seq ever grows to ~256+ rows, switch to
        # a 1-D "parallel" row-tile grid so v7x's second TensorCore is used.)
        compiler_params=pltpu.CompilerParams(vmem_limit_bytes=8 * 1024 * 1024),
    )(
        x.reshape(n_t, D_MODEL),
        e_outputs.reshape(n_s, D_MODEL),
        self_bias, cross_bias,
        rep_self, blk_self, seg_self,
        rep_cross, blk_cross, seg_cross,
        *_pack_params(params),
    )
    return out_flat.reshape(batch, s_t, D_MODEL)


# ----------------------------- parameter setup ------------------------------
def positional_encoding(max_len, d_model):
    pos = jnp.arange(max_len, dtype=jnp.float32)[:, None]
    i = jnp.arange(0, d_model, 2, dtype=jnp.float32)
    div = jnp.exp(-jnp.log(10000.0) * i / d_model)
    pe = jnp.zeros((max_len, d_model), jnp.float32)
    pe = pe.at[:, 0::2].set(jnp.sin(pos * div))
    pe = pe.at[:, 1::2].set(jnp.cos(pos * div))
    return pe


def init_layer_params(key):
    k = jax.random.split(key, 8)
    return dict(
        norm_a=jnp.ones((3, D_MODEL), jnp.float32),
        norm_b=jnp.zeros((3, D_MODEL), jnp.float32),
        # [Wq, Wk, Wv, Wo] stored as (in, out); biases (out,)
        self_w=0.05 * jax.random.normal(k[0], (4, D_MODEL, D_MODEL), jnp.float32),
        self_b=0.01 * jax.random.normal(k[1], (4, D_MODEL), jnp.float32),
        cross_w=0.05 * jax.random.normal(k[2], (4, D_MODEL, D_MODEL), jnp.float32),
        cross_b=0.01 * jax.random.normal(k[3], (4, D_MODEL), jnp.float32),
        ff_w1=0.05 * jax.random.normal(k[4], (D_MODEL, D_FF), jnp.float32),
        ff_b1=0.01 * jax.random.normal(k[5], (1, D_FF), jnp.float32),
        ff_w2=0.05 * jax.random.normal(k[6], (D_FF, D_MODEL), jnp.float32),
        ff_b2=0.01 * jax.random.normal(k[7], (1, D_MODEL), jnp.float32),
    )


def init_params(key, vocab_size, max_len):
    k_embed, *k_layers = jax.random.split(key, 1 + N_LAYERS)
    return dict(
        embed=jax.random.normal(k_embed, (vocab_size, D_MODEL), jnp.float32),
        pe=positional_encoding(max_len, D_MODEL),
        layers=[init_layer_params(k) for k in k_layers],
        final_a=jnp.ones((1, D_MODEL), jnp.float32),
        final_b=jnp.zeros((1, D_MODEL), jnp.float32),
    )


# --------------------------- pure-JAX reference -----------------------------
def _ref_norm(x, a, b):
    mean = jnp.mean(x, axis=-1, keepdims=True)
    var = jnp.sum((x - mean) ** 2, axis=-1, keepdims=True) / (D_MODEL - 1)
    return a * (x - mean) / (jnp.sqrt(var) + EPS) + b


def _ref_mha(q_in, kv_in, mask, w, b):
    q = q_in @ w[0] + b[0]
    k = kv_in @ w[1] + b[1]
    v = kv_in @ w[2] + b[2]
    batch, s_q, _ = q.shape
    s_k = k.shape[1]
    q = q.reshape(batch, s_q, HEADS, D_K).transpose(0, 2, 1, 3)
    k = k.reshape(batch, s_k, HEADS, D_K).transpose(0, 2, 1, 3)
    v = v.reshape(batch, s_k, HEADS, D_K).transpose(0, 2, 1, 3)
    s = jnp.einsum("bhqd,bhkd->bhqk", q, k) / math.sqrt(D_K)
    s = jnp.where(mask[:, None, :, :] == 0, NEG_INF, s)
    p = jax.nn.softmax(s, axis=-1)
    o = jnp.einsum("bhqk,bhkd->bhqd", p, v)
    o = o.transpose(0, 2, 1, 3).reshape(batch, s_q, D_MODEL)
    return o @ w[3] + b[3]


def ref_forward(trg, e_outputs, src_mask, trg_mask, params):
    x = params["embed"][trg] * math.sqrt(D_MODEL)
    x = x + params["pe"][: trg.shape[1]][None, :, :]
    for p in params["layers"]:
        x2 = _ref_norm(x, p["norm_a"][0], p["norm_b"][0])
        x = x + _ref_mha(x2, x2, trg_mask, p["self_w"], p["self_b"])
        x2 = _ref_norm(x, p["norm_a"][1], p["norm_b"][1])
        x = x + _ref_mha(x2, e_outputs, src_mask, p["cross_w"], p["cross_b"])
        x2 = _ref_norm(x, p["norm_a"][2], p["norm_b"][2])
        h = jax.nn.relu(x2 @ p["ff_w1"] + p["ff_b1"])
        x = x + h @ p["ff_w2"] + p["ff_b2"]
    return _ref_norm(x, params["final_a"], params["final_b"])


# ----------------------------------- main -----------------------------------
if __name__ == "__main__":
    B, S_T, S_S, VOCAB = 2, 8, 16, 50

    key = jax.random.PRNGKey(0)
    k_params, k_trg, k_eo = jax.random.split(key, 3)

    params = init_params(k_params, VOCAB, max_len=64)

    trg = jax.random.randint(k_trg, (B, S_T), 0, VOCAB)
    e_outputs = jax.random.normal(k_eo, (B, S_S, D_MODEL), jnp.float32)

    # Causal target mask (B, S_t, S_t); source padding mask (B, 1, S_s).
    trg_mask = jnp.tile(jnp.tril(jnp.ones((S_T, S_T), jnp.float32))[None], (B, 1, 1))
    src_mask = jnp.ones((B, 1, S_S), jnp.float32)
    src_mask = src_mask.at[1, 0, S_S - 3:].set(0.0)

    out = decoder_forward(trg, e_outputs, src_mask, trg_mask, params)
    jax.block_until_ready(out)
    assert out.shape == (B, S_T, D_MODEL)

    # Sanity check against a plain-JAX f32 per-head reference.  Tolerance
    # accommodates the bf16 MXU operands (f32 accumulation); the softmax itself
    # is ~f32-exact thanks to the Newton-refined reciprocal.
    ref = ref_forward(trg, e_outputs, src_mask, trg_mask, params)
    assert bool(jnp.allclose(out, ref, atol=2e-2, rtol=2e-2)), \
        float(jnp.max(jnp.abs(out - ref)))

    print("KERNEL_OK")
</pallas_src>

<mosaic_0001>
module attributes {stable_mosaic.version = 11 : i64} {
  func.func @decoder_fused_kernel(%arg0: memref<16x32xf32, #tpu.memory_space<vmem>>, %arg1: memref<32x32xf32, #tpu.memory_space<vmem>>, %arg2: memref<16x64xf32, #tpu.memory_space<vmem>>, %arg3: memref<16x128xf32, #tpu.memory_space<vmem>>, %arg4: memref<64x16xbf16, #tpu.memory_space<vmem>>, %arg5: memref<64x32xf32, #tpu.memory_space<vmem>>, %arg6: memref<64x64xbf16, #tpu.memory_space<vmem>>, %arg7: memref<128x32xbf16, #tpu.memory_space<vmem>>, %arg8: memref<128x32xf32, #tpu.memory_space<vmem>>, %arg9: memref<128x128xbf16, #tpu.memory_space<vmem>>, %arg10: memref<2x33x256xbf16, #tpu.memory_space<vmem>>, %arg11: memref<2x65x32xbf16, #tpu.memory_space<vmem>>, %arg12: memref<33x128xbf16, #tpu.memory_space<vmem>>, %arg13: memref<2x6x32xf32, #tpu.memory_space<vmem>>, %arg14: memref<2x32xf32, #tpu.memory_space<vmem>>, %arg15: memref<16x32xf32, #tpu.memory_space<vmem>>) attributes {dimension_semantics = [], scalar_prefetch = 0 : i64, scratch_operands = 0 : i64, tpu.core_type = #tpu.core_type<tc>} {
    %c0 = arith.constant 0 : index
    %c0_0 = arith.constant 0 : index
    %0 = vector.load %arg0[%c0, %c0_0] : memref<16x32xf32, #tpu.memory_space<vmem>>, vector<16x32xf32>
    %c0_1 = arith.constant 0 : index
    %c0_2 = arith.constant 0 : index
    %1 = vector.load %arg1[%c0_1, %c0_2] : memref<32x32xf32, #tpu.memory_space<vmem>>, vector<32x32xf32>
    %2 = arith.truncf %1 : vector<32x32xf32> to vector<32x32xbf16>
    %c0_3 = arith.constant 0 : index
    %c0_4 = arith.constant 0 : index
    %3 = vector.load %arg12[%c0_3, %c0_4] : memref<33x128xbf16, #tpu.memory_space<vmem>>, vector<32x128xbf16>
    %cst = arith.constant dense<0.000000e+00> : vector<32x128xf32>
    %4 = tpu.matmul %2, %3, %cst {dimension_numbers = #tpu.dot_dimension_numbers<[1], [0], [0], [1], [0, 0, 1, 1], [], []>} : vector<32x32xbf16>, vector<32x128xbf16>, vector<32x128xf32> -> vector<32x128xf32>
    %c32 = arith.constant 32 : index
    %c0_5 = arith.constant 0 : index
    %5 = vector.load %arg12[%c32, %c0_5] : memref<33x128xbf16, #tpu.memory_space<vmem>>, vector<1x128xbf16>
    %6 = arith.extf %5 : vector<1x128xbf16> to vector<1x128xf32>
    %7 = vector.broadcast %6 : vector<1x128xf32> to vector<32x128xf32>
    %8 = arith.addf %4, %7 : vector<32x128xf32>
    %c0_6 = arith.constant 0 : index
    %c0_7 = arith.constant 0 : index
    %c0_8 = arith.constant 0 : index
    %9 = vector.load %arg13[%c0_6, %c0_7, %c0_8] : memref<2x6x32xf32, #tpu.memory_space<vmem>>, vector<1x1x32xf32>
    %10 = vector.shape_cast %9 : vector<1x1x32xf32> to vector<1x32xf32>
    %c0_9 = arith.constant 0 : index
    %c3 = arith.constant 3 : index
    %c0_10 = arith.constant 0 : index
    %11 = vector.load %arg13[%c0_9, %c3, %c0_10] : memref<2x6x32xf32, #tpu.memory_space<vmem>>, vector<1x1x32xf32>
    %12 = vector.shape_cast %11 : vector<1x1x32xf32> to vector<1x32xf32>
    %cst_11 = arith.constant dense<0.000000e+00> : vector<16xf32>
    %13 = vector.multi_reduction <add>, %0, %cst_11 [1] : vector<16x32xf32> to vector<16xf32>
    %14 = vector.shape_cast %13 : vector<16xf32> to vector<16x1xf32>
    %cst_12 = arith.constant 3.200000e+01 : f32
    %15 = vector.broadcast %cst_12 : f32 to vector<16x1xf32>
    %16 = arith.divf %14, %15 : vector<16x1xf32>
    %17 = vector.broadcast %16 : vector<16x1xf32> to vector<16x32xf32>
    %18 = arith.subf %0, %17 : vector<16x32xf32>
    %19 = arith.mulf %18, %18 : vector<16x32xf32>
    %cst_13 = arith.constant dense<0.000000e+00> : vector<16xf32>
    %20 = vector.multi_reduction <add>, %19, %cst_13 [1] : vector<16x32xf32> to vector<16xf32>
    %21 = vector.shape_cast %20 : vector<16xf32> to vector<16x1xf32>
    %cst_14 = arith.constant 0.0322580636 : f32
    %22 = vector.broadcast %cst_14 : f32 to vector<16x1xf32>
    %23 = arith.mulf %21, %22 : vector<16x1xf32>
    %24 = math.sqrt %23 : vector<16x1xf32>
    %cst_15 = arith.constant 9.99999997E-7 : f32
    %25 = vector.broadcast %cst_15 : f32 to vector<16x1xf32>
    %26 = arith.addf %24, %25 : vector<16x1xf32>
    %27 = tpu.reciprocal %26 {approx = true} : vector<16x1xf32> -> vector<16x1xf32>
    %28 = arith.mulf %26, %27 : vector<16x1xf32>
    %cst_16 = arith.constant 2.000000e+00 : f32
    %29 = vector.broadcast %cst_16 : f32 to vector<16x1xf32>
    %30 = arith.subf %29, %28 : vector<16x1xf32>
    %31 = arith.mulf %27, %30 : vector<16x1xf32>
    %32 = vector.broadcast %16 : vector<16x1xf32> to vector<16x32xf32>
    %33 = arith.subf %0, %32 : vector<16x32xf32>
    %34 = vector.broadcast %10 : vector<1x32xf32> to vector<16x32xf32>
    %35 = arith.mulf %34, %33 : vector<16x32xf32>
    %36 = vector.broadcast %31 : vector<16x1xf32> to vector<16x32xf32>
    %37 = arith.mulf %35, %36 : vector<16x32xf32>
    %38 = vector.broadcast %12 : vector<1x32xf32> to vector<16x32xf32>
    %39 = arith.addf %37, %38 : vector<16x32xf32>
    %40 = arith.truncf %39 : vector<16x32xf32> to vector<16x32xbf16>
    %c0_17 = arith.constant 0 : index
    %c0_18 = arith.constant 0 : index
    %c0_19 = arith.constant 0 : index
    %41 = vector.load %arg10[%c0_17, %c0_18, %c0_19] : memref<2x33x256xbf16, #tpu.memory_space<vmem>>, vector<1x32x96xbf16>
    %42 = vector.shape_cast %41 : vector<1x32x96xbf16> to vector<32x96xbf16>
    %cst_20 = arith.constant dense<0.000000e+00> : vector<16x96xf32>
    %43 = tpu.matmul %40, %42, %cst_20 {dimension_numbers = #tpu.dot_dimension_numbers<[1], [0], [0], [1], [0, 0, 1, 1], [], []>} : vector<16x32xbf16>, vector<32x96xbf16>, vector<16x96xf32> -> vector<16x96xf32>
    %c0_21 = arith.constant 0 : index
    %c32_22 = arith.constant 32 : index
    %c0_23 = arith.constant 0 : index
    %44 = vector.load %arg10[%c0_21, %c32_22, %c0_23] : memref<2x33x256xbf16, #tpu.memory_space<vmem>>, vector<1x1x96xbf16>
    %45 = vector.shape_cast %44 : vector<1x1x96xbf16> to vector<1x96xbf16>
    %46 = arith.extf %45 : vector<1x96xbf16> to vector<1x96xf32>
    %47 = vector.broadcast %46 : vector<1x96xf32> to vector<16x96xf32>
    %48 = arith.addf %43, %47 : vector<16x96xf32>
    %49 = vector.extract_strided_slice %48 {offsets = [0, 0], sizes = [16, 32], strides = [1, 1]} : vector<16x96xf32> to vector<16x32xf32>
    %50 = vector.extract_strided_slice %48 {offsets = [0, 32], sizes = [16, 32], strides = [1, 1]} : vector<16x96xf32> to vector<16x32xf32>
    %51 = vector.extract_strided_slice %48 {offsets = [0, 64], sizes = [16, 32], strides = [1, 1]} : vector<16x96xf32> to vector<16x32xf32>
    %c0_24 = arith.constant 0 : index
    %c0_25 = arith.constant 0 : index
    %c96 = arith.constant 96 : index
    %52 = vector.load %arg10[%c0_24, %c0_25, %c96] : memref<2x33x256xbf16, #tpu.memory_space<vmem>>, vector<1x32x32xbf16>
    %53 = vector.shape_cast %52 : vector<1x32x32xbf16> to vector<32x32xbf16>
    %c0_26 = arith.constant 0 : index
    %c32_27 = arith.constant 32 : index
    %c96_28 = arith.constant 96 : index
    %54 = vector.load %arg10[%c0_26, %c32_27, %c96_28] : memref<2x33x256xbf16, #tpu.memory_space<vmem>>, vector<1x1x32xbf16>
    %55 = vector.shape_cast %54 : vector<1x1x32xbf16> to vector<1x32xbf16>
    %c0_29 = arith.constant 0 : index
    %c0_30 = arith.constant 0 : index
    %56 = vector.load %arg4[%c0_29, %c0_30] : memref<64x16xbf16, #tpu.memory_space<vmem>>, vector<64x16xbf16>
    %c0_31 = arith.constant 0 : index
    %c0_32 = arith.constant 0 : index
    %57 = vector.load %arg5[%c0_31, %c0_32] : memref<64x32xf32, #tpu.memory_space<vmem>>, vector<64x32xf32>
    %58 = arith.truncf %50 : vector<16x32xf32> to vector<16x32xbf16>
    %cst_33 = arith.constant dense<0.000000e+00> : vector<64x32xf32>
    %59 = tpu.matmul %56, %58, %cst_33 {dimension_numbers = #tpu.dot_dimension_numbers<[1], [0], [0], [1], [0, 0, 1, 1], [], []>} : vector<64x16xbf16>, vector<16x32xbf16>, vector<64x32xf32> -> vector<64x32xf32>
    %60 = arith.mulf %59, %57 : vector<64x32xf32>
    %61 = arith.truncf %60 : vector<64x32xf32> to vector<64x32xbf16>
    %62 = arith.truncf %51 : vector<16x32xf32> to vector<16x32xbf16>
    %cst_34 = arith.constant dense<0.000000e+00> : vector<64x32xf32>
    %63 = tpu.matmul %56, %62, %cst_34 {dimension_numbers = #tpu.dot_dimension_numbers<[1], [0], [0], [1], [0, 0, 1, 1], [], []>} : vector<64x16xbf16>, vector<16x32xbf16>, vector<64x32xf32> -> vector<64x32xf32>
    %64 = arith.mulf %63, %57 : vector<64x32xf32>
    %65 = arith.truncf %64 : vector<64x32xf32> to vector<64x32xbf16>
    %66 = arith.truncf %49 : vector<16x32xf32> to vector<16x32xbf16>
    %cst_35 = arith.constant dense<0.000000e+00> : vector<16x64xf32>
    %67 = tpu.matmul %66, %61, %cst_35 {dimension_numbers = #tpu.dot_dimension_numbers<[1], [1], [0], [0], [0, 0, 1, 0], [], []>} : vector<16x32xbf16>, vector<64x32xbf16>, vector<16x64xf32> -> vector<16x64xf32>
    %c0_36 = arith.constant 0 : index
    %c0_37 = arith.constant 0 : index
    %68 = vector.load %arg2[%c0_36, %c0_37] : memref<16x64xf32, #tpu.memory_space<vmem>>, vector<16x64xf32>
    %69 = arith.addf %67, %68 : vector<16x64xf32>
    %cst_38 = arith.constant dense<0xFF800000> : vector<16xf32>
    %70 = vector.multi_reduction <maximumf>, %69, %cst_38 [1] : vector<16x64xf32> to vector<16xf32>
    %71 = vector.shape_cast %70 : vector<16xf32> to vector<16x1xf32>
    %72 = vector.broadcast %71 : vector<16x1xf32> to vector<16x64xf32>
    %73 = arith.subf %69, %72 : vector<16x64xf32>
    %74 = math.exp %73 : vector<16x64xf32>
    %75 = arith.truncf %74 : vector<16x64xf32> to vector<16x64xbf16>
    %c0_39 = arith.constant 0 : index
    %c0_40 = arith.constant 0 : index
    %76 = vector.load %arg6[%c0_39, %c0_40] : memref<64x64xbf16, #tpu.memory_space<vmem>>, vector<64x64xbf16>
    %cst_41 = arith.constant dense<0.000000e+00> : vector<16x64xf32>
    %77 = tpu.matmul %75, %76, %cst_41 {dimension_numbers = #tpu.dot_dimension_numbers<[1], [0], [0], [1], [0, 0, 1, 1], [], []>} : vector<16x64xbf16>, vector<64x64xbf16>, vector<16x64xf32> -> vector<16x64xf32>
    %cst_42 = arith.constant 1.000000e-30 : f32
    %78 = vector.broadcast %cst_42 : f32 to vector<16x64xf32>
    %79 = arith.addf %77, %78 : vector<16x64xf32>
    %80 = tpu.reciprocal %79 {approx = true} : vector<16x64xf32> -> vector<16x64xf32>
    %81 = arith.mulf %79, %80 : vector<16x64xf32>
    %cst_43 = arith.constant 2.000000e+00 : f32
    %82 = vector.broadcast %cst_43 : f32 to vector<16x64xf32>
    %83 = arith.subf %82, %81 : vector<16x64xf32>
    %84 = arith.mulf %80, %83 : vector<16x64xf32>
    %85 = arith.mulf %74, %84 : vector<16x64xf32>
    %86 = arith.truncf %85 : vector<16x64xf32> to vector<16x64xbf16>
    %cst_44 = arith.constant dense<0.000000e+00> : vector<16x32xf32>
    %87 = tpu.matmul %86, %65, %cst_44 {dimension_numbers = #tpu.dot_dimension_numbers<[1], [0], [0], [1], [0, 0, 1, 1], [], []>} : vector<16x64xbf16>, vector<64x32xbf16>, vector<16x32xf32> -> vector<16x32xf32>
    %88 = arith.truncf %87 : vector<16x32xf32> to vector<16x32xbf16>
    %cst_45 = arith.constant dense<0.000000e+00> : vector<16x32xf32>
    %89 = tpu.matmul %88, %53, %cst_45 {dimension_numbers = #tpu.dot_dimension_numbers<[1], [0], [0], [1], [0, 0, 1, 1], [], []>} : vector<16x32xbf16>, vector<32x32xbf16>, vector<16x32xf32> -> vector<16x32xf32>
    %90 = arith.extf %55 : vector<1x32xbf16> to vector<1x32xf32>
    %91 = vector.broadcast %90 : vector<1x32xf32> to vector<16x32xf32>
    %92 = arith.addf %89, %91 : vector<16x32xf32>
    %93 = arith.addf %0, %92 : vector<16x32xf32>
    %c0_46 = arith.constant 0 : index
    %c1 = arith.constant 1 : index
    %c0_47 = arith.constant 0 : index
    %94 = vector.load %arg13[%c0_46, %c1, %c0_47] : memref<2x6x32xf32, #tpu.memory_space<vmem>>, vector<1x1x32xf32>
    %95 = vector.shape_cast %94 : vector<1x1x32xf32> to vector<1x32xf32>
    %c0_48 = arith.constant 0 : index
    %c4 = arith.constant 4 : index
    %c0_49 = arith.constant 0 : index
    %96 = vector.load %arg13[%c0_48, %c4, %c0_49] : memref<2x6x32xf32, #tpu.memory_space<vmem>>, vector<1x1x32xf32>
    %97 = vector.shape_cast %96 : vector<1x1x32xf32> to vector<1x32xf32>
    %cst_50 = arith.constant dense<0.000000e+00> : vector<16xf32>
    %98 = vector.multi_reduction <add>, %93, %cst_50 [1] : vector<16x32xf32> to vector<16xf32>
    %99 = vector.shape_cast %98 : vector<16xf32> to vector<16x1xf32>
    %cst_51 = arith.constant 3.200000e+01 : f32
    %100 = vector.broadcast %cst_51 : f32 to vector<16x1xf32>
    %101 = arith.divf %99, %100 : vector<16x1xf32>
    %102 = vector.broadcast %101 : vector<16x1xf32> to vector<16x32xf32>
    %103 = arith.subf %93, %102 : vector<16x32xf32>
    %104 = arith.mulf %103, %103 : vector<16x32xf32>
    %cst_52 = arith.constant dense<0.000000e+00> : vector<16xf32>
    %105 = vector.multi_reduction <add>, %104, %cst_52 [1] : vector<16x32xf32> to vector<16xf32>
    %106 = vector.shape_cast %105 : vector<16xf32> to vector<16x1xf32>
    %cst_53 = arith.constant 0.0322580636 : f32
    %107 = vector.broadcast %cst_53 : f32 to vector<16x1xf32>
    %108 = arith.mulf %106, %107 : vector<16x1xf32>
    %109 = math.sqrt %108 : vector<16x1xf32>
    %cst_54 = arith.constant 9.99999997E-7 : f32
    %110 = vector.broadcast %cst_54 : f32 to vector<16x1xf32>
    %111 = arith.addf %109, %110 : vector<16x1xf32>
    %112 = tpu.reciprocal %111 {approx = true} : vector<16x1xf32> -> vector<16x1xf32>
    %113 = arith.mulf %111, %112 : vector<16x1xf32>
    %cst_55 = arith.constant 2.000000e+00 : f32
    %114 = vector.broadcast %cst_55 : f32 to vector<16x1xf32>
    %115 = arith.subf %114, %113 : vector<16x1xf32>
    %116 = arith.mulf %112, %115 : vector<16x1xf32>
    %117 = vector.broadcast %101 : vector<16x1xf32> to vector<16x32xf32>
    %118 = arith.subf %93, %117 : vector<16x32xf32>
    %119 = vector.broadcast %95 : vector<1x32xf32> to vector<16x32xf32>
    %120 = arith.mulf %119, %118 : vector<16x32xf32>
    %121 = vector.broadcast %116 : vector<16x1xf32> to vector<16x32xf32>
    %122 = arith.mulf %120, %121 : vector<16x32xf32>
    %123 = vector.broadcast %97 : vector<1x32xf32> to vector<16x32xf32>
    %124 = arith.addf %122, %123 : vector<16x32xf32>
    %125 = arith.truncf %124 : vector<16x32xf32> to vector<16x32xbf16>
    %c0_56 = arith.constant 0 : index
    %c0_57 = arith.constant 0 : index
    %c128 = arith.constant 128 : index
    %126 = vector.load %arg10[%c0_56, %c0_57, %c128] : memref<2x33x256xbf16, #tpu.memory_space<vmem>>, vector<1x32x32xbf16>
    %127 = vector.shape_cast %126 : vector<1x32x32xbf16> to vector<32x32xbf16>
    %cst_58 = arith.constant dense<0.000000e+00> : vector<16x32xf32>
    %128 = tpu.matmul %125, %127, %cst_58 {dimension_numbers = #tpu.dot_dimension_numbers<[1], [0], [0], [1], [0, 0, 1, 1], [], []>} : vector<16x32xbf16>, vector<32x32xbf16>, vector<16x32xf32> -> vector<16x32xf32>
    %c0_59 = arith.constant 0 : index
    %c32_60 = arith.constant 32 : index
    %c128_61 = arith.constant 128 : index
    %129 = vector.load %arg10[%c0_59, %c32_60, %c128_61] : memref<2x33x256xbf16, #tpu.memory_space<vmem>>, vector<1x1x32xbf16>
    %130 = vector.shape_cast %129 : vector<1x1x32xbf16> to vector<1x32xbf16>
    %131 = arith.extf %130 : vector<1x32xbf16> to vector<1x32xf32>
    %132 = vector.broadcast %131 : vector<1x32xf32> to vector<16x32xf32>
    %133 = arith.addf %128, %132 : vector<16x32xf32>
    %134 = vector.extract_strided_slice %8 {offsets = [0, 0], sizes = [32, 32], strides = [1, 1]} : vector<32x128xf32> to vector<32x32xf32>
    %135 = vector.extract_strided_slice %8 {offsets = [0, 32], sizes = [32, 32], strides = [1, 1]} : vector<32x128xf32> to vector<32x32xf32>
    %c0_62 = arith.constant 0 : index
    %c0_63 = arith.constant 0 : index
    %c160 = arith.constant 160 : index
    %136 = vector.load %arg10[%c0_62, %c0_63, %c160] : memref<2x33x256xbf16, #tpu.memory_space<vmem>>, vector<1x32x32xbf16>
    %137 = vector.shape_cast %136 : vector<1x32x32xbf16> to vector<32x32xbf16>
    %c0_64 = arith.constant 0 : index
    %c32_65 = arith.constant 32 : index
    %c160_66 = arith.constant 160 : index
    %138 = vector.load %arg10[%c0_64, %c32_65, %c160_66] : memref<2x33x256xbf16, #tpu.memory_space<vmem>>, vector<1x1x32xbf16>
    %139 = vector.shape_cast %138 : vector<1x1x32xbf16> to vector<1x32xbf16>
    %c0_67 = arith.constant 0 : index
    %c0_68 = arith.constant 0 : index
    %140 = vector.load %arg7[%c0_67, %c0_68] : memref<128x32xbf16, #tpu.memory_space<vmem>>, vector<128x32xbf16>
    %c0_69 = arith.constant 0 : index
    %c0_70 = arith.constant 0 : index
    %141 = vector.load %arg8[%c0_69, %c0_70] : memref<128x32xf32, #tpu.memory_space<vmem>>, vector<128x32xf32>
    %142 = arith.truncf %134 : vector<32x32xf32> to vector<32x32xbf16>
    %cst_71 = arith.constant dense<0.000000e+00> : vector<128x32xf32>
    %143 = tpu.matmul %140, %142, %cst_71 {dimension_numbers = #tpu.dot_dimension_numbers<[1], [0], [0], [1], [0, 0, 1, 1], [], []>} : vector<128x32xbf16>, vector<32x32xbf16>, vector<128x32xf32> -> vector<128x32xf32>
    %144 = arith.mulf %143, %141 : vector<128x32xf32>
    %145 = arith.truncf %144 : vector<128x32xf32> to vector<128x32xbf16>
    %146 = arith.truncf %135 : vector<32x32xf32> to vector<32x32xbf16>
    %cst_72 = arith.constant dense<0.000000e+00> : vector<128x32xf32>
    %147 = tpu.matmul %140, %146, %cst_72 {dimension_numbers = #tpu.dot_dimension_numbers<[1], [0], [0], [1], [0, 0, 1, 1], [], []>} : vector<128x32xbf16>, vector<32x32xbf16>, vector<128x32xf32> -> vector<128x32xf32>
    %148 = arith.mulf %147, %141 : vector<128x32xf32>
    %149 = arith.truncf %148 : vector<128x32xf32> to vector<128x32xbf16>
    %150 = arith.truncf %133 : vector<16x32xf32> to vector<16x32xbf16>
    %cst_73 = arith.constant dense<0.000000e+00> : vector<16x128xf32>
    %151 = tpu.matmul %150, %145, %cst_73 {dimension_numbers = #tpu.dot_dimension_numbers<[1], [1], [0], [0], [0, 0, 1, 0], [], []>} : vector<16x32xbf16>, vector<128x32xbf16>, vector<16x128xf32> -> vector<16x128xf32>
    %c0_74 = arith.constant 0 : index
    %c0_75 = arith.constant 0 : index
    %152 = vector.load %arg3[%c0_74, %c0_75] : memref<16x128xf32, #tpu.memory_space<vmem>>, vector<16x128xf32>
    %153 = arith.addf %151, %152 : vector<16x128xf32>
    %cst_76 = arith.constant dense<0xFF800000> : vector<16xf32>
    %154 = vector.multi_reduction <maximumf>, %153, %cst_76 [1] : vector<16x128xf32> to vector<16xf32>
    %155 = vector.shape_cast %154 : vector<16xf32> to vector<16x1xf32>
    %156 = vector.broadcast %155 : vector<16x1xf32> to vector<16x128xf32>
    %157 = arith.subf %153, %156 : vector<16x128xf32>
    %158 = math.exp %157 : vector<16x128xf32>
    %159 = arith.truncf %158 : vector<16x128xf32> to vector<16x128xbf16>
    %c0_77 = arith.constant 0 : index
    %c0_78 = arith.constant 0 : index
    %160 = vector.load %arg9[%c0_77, %c0_78] : memref<128x128xbf16, #tpu.memory_space<vmem>>, vector<128x128xbf16>
    %cst_79 = arith.constant dense<0.000000e+00> : vector<16x128xf32>
    %161 = tpu.matmul %159, %160, %cst_79 {dimension_numbers = #tpu.dot_dimension_numbers<[1], [0], [0], [1], [0, 0, 1, 1], [], []>} : vector<16x128xbf16>, vector<128x128xbf16>, vector<16x128xf32> -> vector<16x128xf32>
    %cst_80 = arith.constant 1.000000e-30 : f32
    %162 = vector.broadcast %cst_80 : f32 to vector<16x128xf32>
    %163 = arith.addf %161, %162 : vector<16x128xf32>
    %164 = tpu.reciprocal %163 {approx = true} : vector<16x128xf32> -> vector<16x128xf32>
    %165 = arith.mulf %163, %164 : vector<16x128xf32>
    %cst_81 = arith.constant 2.000000e+00 : f32
    %166 = vector.broadcast %cst_81 : f32 to vector<16x128xf32>
    %167 = arith.subf %166, %165 : vector<16x128xf32>
    %168 = arith.mulf %164, %167 : vector<16x128xf32>
    %169 = arith.mulf %158, %168 : vector<16x128xf32>
    %170 = arith.truncf %169 : vector<16x128xf32> to vector<16x128xbf16>
    %cst_82 = arith.constant dense<0.000000e+00> : vector<16x32xf32>
    %171 = tpu.matmul %170, %149, %cst_82 {dimension_numbers = #tpu.dot_dimension_numbers<[1], [0], [0], [1], [0, 0, 1, 1], [], []>} : vector<16x128xbf16>, vector<128x32xbf16>, vector<16x32xf32> -> vector<16x32xf32>
    %172 = arith.truncf %171 : vector<16x32xf32> to vector<16x32xbf16>
    %cst_83 = arith.constant dense<0.000000e+00> : vector<16x32xf32>
    %173 = tpu.matmul %172, %137, %cst_83 {dimension_numbers = #tpu.dot_dimension_numbers<[1], [0], [0], [1], [0, 0, 1, 1], [], []>} : vector<16x32xbf16>, vector<32x32xbf16>, vector<16x32xf32> -> vector<16x32xf32>
    %174 = arith.extf %139 : vector<1x32xbf16> to vector<1x32xf32>
    %175 = vector.broadcast %174 : vector<1x32xf32> to vector<16x32xf32>
    %176 = arith.addf %173, %175 : vector<16x32xf32>
    %177 = arith.addf %93, %176 : vector<16x32xf32>
    %c0_84 = arith.constant 0 : index
    %c2 = arith.constant 2 : index
    %c0_85 = arith.constant 0 : index
    %178 = vector.load %arg13[%c0_84, %c2, %c0_85] : memref<2x6x32xf32, #tpu.memory_space<vmem>>, vector<1x1x32xf32>
    %179 = vector.shape_cast %178 : vector<1x1x32xf32> to vector<1x32xf32>
    %c0_86 = arith.constant 0 : index
    %c5 = arith.constant 5 : index
    %c0_87 = arith.constant 0 : index
    %180 = vector.load %arg13[%c0_86, %c5, %c0_87] : memref<2x6x32xf32, #tpu.memory_space<vmem>>, vector<1x1x32xf32>
    %181 = vector.shape_cast %180 : vector<1x1x32xf32> to vector<1x32xf32>
    %cst_88 = arith.constant dense<0.000000e+00> : vector<16xf32>
    %182 = vector.multi_reduction <add>, %177, %cst_88 [1] : vector<16x32xf32> to vector<16xf32>
    %183 = vector.shape_cast %182 : vector<16xf32> to vector<16x1xf32>
    %cst_89 = arith.constant 3.200000e+01 : f32
    %184 = vector.broadcast %cst_89 : f32 to vector<16x1xf32>
    %185 = arith.divf %183, %184 : vector<16x1xf32>
    %186 = vector.broadcast %185 : vector<16x1xf32> to vector<16x32xf32>
    %187 = arith.subf %177, %186 : vector<16x32xf32>
    %188 = arith.mulf %187, %187 : vector<16x32xf32>
    %cst_90 = arith.constant dense<0.000000e+00> : vector<16xf32>
    %189 = vector.multi_reduction <add>, %188, %cst_90 [1] : vector<16x32xf32> to vector<16xf32>
    %190 = vector.shape_cast %189 : vector<16xf32> to vector<16x1xf32>
    %cst_91 = arith.constant 0.0322580636 : f32
    %191 = vector.broadcast %cst_91 : f32 to vector<16x1xf32>
    %192 = arith.mulf %190, %191 : vector<16x1xf32>
    %193 = math.sqrt %192 : vector<16x1xf32>
    %cst_92 = arith.constant 9.99999997E-7 : f32
    %194 = vector.broadcast %cst_92 : f32 to vector<16x1xf32>
    %195 = arith.addf %193, %194 : vector<16x1xf32>
    %196 = tpu.reciprocal %195 {approx = true} : vector<16x1xf32> -> vector<16x1xf32>
    %197 = arith.mulf %195, %196 : vector<16x1xf32>
    %cst_93 = arith.constant 2.000000e+00 : f32
    %198 = vector.broadcast %cst_93 : f32 to vector<16x1xf32>
    %199 = arith.subf %198, %197 : vector<16x1xf32>
    %200 = arith.mulf %196, %199 : vector<16x1xf32>
    %201 = vector.broadcast %185 : vector<16x1xf32> to vector<16x32xf32>
    %202 = arith.subf %177, %201 : vector<16x32xf32>
    %203 = vector.broadcast %179 : vector<1x32xf32> to vector<16x32xf32>
    %204 = arith.mulf %203, %202 : vector<16x32xf32>
    %205 = vector.broadcast %200 : vector<16x1xf32> to vector<16x32xf32>
    %206 = arith.mulf %204, %205 : vector<16x32xf32>
    %207 = vector.broadcast %181 : vector<1x32xf32> to vector<16x32xf32>
    %208 = arith.addf %206, %207 : vector<16x32xf32>
    %209 = arith.truncf %208 : vector<16x32xf32> to vector<16x32xbf16>
    %c0_94 = arith.constant 0 : index
    %c0_95 = arith.constant 0 : index
    %c192 = arith.constant 192 : index
    %210 = vector.load %arg10[%c0_94, %c0_95, %c192] : memref<2x33x256xbf16, #tpu.memory_space<vmem>>, vector<1x32x64xbf16>
    %211 = vector.shape_cast %210 : vector<1x32x64xbf16> to vector<32x64xbf16>
    %cst_96 = arith.constant dense<0.000000e+00> : vector<16x64xf32>
    %212 = tpu.matmul %209, %211, %cst_96 {dimension_numbers = #tpu.dot_dimension_numbers<[1], [0], [0], [1], [0, 0, 1, 1], [], []>} : vector<16x32xbf16>, vector<32x64xbf16>, vector<16x64xf32> -> vector<16x64xf32>
    %c0_97 = arith.constant 0 : index
    %c32_98 = arith.constant 32 : index
    %c192_99 = arith.constant 192 : index
    %213 = vector.load %arg10[%c0_97, %c32_98, %c192_99] : memref<2x33x256xbf16, #tpu.memory_space<vmem>>, vector<1x1x64xbf16>
    %214 = vector.shape_cast %213 : vector<1x1x64xbf16> to vector<1x64xbf16>
    %215 = arith.extf %214 : vector<1x64xbf16> to vector<1x64xf32>
    %216 = vector.broadcast %215 : vector<1x64xf32> to vector<16x64xf32>
    %217 = arith.addf %212, %216 : vector<16x64xf32>
    %cst_100 = arith.constant 0.000000e+00 : f32
    %218 = vector.broadcast %cst_100 : f32 to vector<16x64xf32>
    %219 = arith.maximumf %217, %218 : vector<16x64xf32>
    %220 = arith.truncf %219 : vector<16x64xf32> to vector<16x64xbf16>
    %c0_101 = arith.constant 0 : index
    %c0_102 = arith.constant 0 : index
    %c0_103 = arith.constant 0 : index
    %221 = vector.load %arg11[%c0_101, %c0_102, %c0_103] : memref<2x65x32xbf16, #tpu.memory_space<vmem>>, vector<1x64x32xbf16>
    %222 = vector.shape_cast %221 : vector<1x64x32xbf16> to vector<64x32xbf16>
    %cst_104 = arith.constant dense<0.000000e+00> : vector<16x32xf32>
    %223 = tpu.matmul %220, %222, %cst_104 {dimension_numbers = #tpu.dot_dimension_numbers<[1], [0], [0], [1], [0, 0, 1, 1], [], []>} : vector<16x64xbf16>, vector<64x32xbf16>, vector<16x32xf32> -> vector<16x32xf32>
    %c0_105 = arith.constant 0 : index
    %c64 = arith.constant 64 : index
    %c0_106 = arith.constant 0 : index
    %224 = vector.load %arg11[%c0_105, %c64, %c0_106] : memref<2x65x32xbf16, #tpu.memory_space<vmem>>, vector<1x1x32xbf16>
    %225 = vector.shape_cast %224 : vector<1x1x32xbf16> to vector<1x32xbf16>
    %226 = arith.extf %225 : vector<1x32xbf16> to vector<1x32xf32>
    %227 = vector.broadcast %226 : vector<1x32xf32> to vector<16x32xf32>
    %228 = arith.addf %223, %227 : vector<16x32xf32>
    %229 = arith.addf %177, %228 : vector<16x32xf32>
    %c1_107 = arith.constant 1 : index
    %c0_108 = arith.constant 0 : index
    %c0_109 = arith.constant 0 : index
    %230 = vector.load %arg13[%c1_107, %c0_108, %c0_109] : memref<2x6x32xf32, #tpu.memory_space<vmem>>, vector<1x1x32xf32>
    %231 = vector.shape_cast %230 : vector<1x1x32xf32> to vector<1x32xf32>
    %c1_110 = arith.constant 1 : index
    %c3_111 = arith.constant 3 : index
    %c0_112 = arith.constant 0 : index
    %232 = vector.load %arg13[%c1_110, %c3_111, %c0_112] : memref<2x6x32xf32, #tpu.memory_space<vmem>>, vector<1x1x32xf32>
    %233 = vector.shape_cast %232 : vector<1x1x32xf32> to vector<1x32xf32>
    %cst_113 = arith.constant dense<0.000000e+00> : vector<16xf32>
    %234 = vector.multi_reduction <add>, %229, %cst_113 [1] : vector<16x32xf32> to vector<16xf32>
    %235 = vector.shape_cast %234 : vector<16xf32> to vector<16x1xf32>
    %cst_114 = arith.constant 3.200000e+01 : f32
    %236 = vector.broadcast %cst_114 : f32 to vector<16x1xf32>
    %237 = arith.divf %235, %236 : vector<16x1xf32>
    %238 = vector.broadcast %237 : vector<16x1xf32> to vector<16x32xf32>
    %239 = arith.subf %229, %238 : vector<16x32xf32>
    %240 = arith.mulf %239, %239 : vector<16x32xf32>
    %cst_115 = arith.constant dense<0.000000e+00> : vector<16xf32>
    %241 = vector.multi_reduction <add>, %240, %cst_115 [1] : vector<16x32xf32> to vector<16xf32>
    %242 = vector.shape_cast %241 : vector<16xf32> to vector<16x1xf32>
    %cst_116 = arith.constant 0.0322580636 : f32
    %243 = vector.broadcast %cst_116 : f32 to vector<16x1xf32>
    %244 = arith.mulf %242, %243 : vector<16x1xf32>
    %245 = math.sqrt %244 : vector<16x1xf32>
    %cst_117 = arith.constant 9.99999997E-7 : f32
    %246 = vector.broadcast %cst_117 : f32 to vector<16x1xf32>
    %247 = arith.addf %245, %246 : vector<16x1xf32>
    %248 = tpu.reciprocal %247 {approx = true} : vector<16x1xf32> -> vector<16x1xf32>
    %249 = arith.mulf %247, %248 : vector<16x1xf32>
    %cst_118 = arith.constant 2.000000e+00 : f32
    %250 = vector.broadcast %cst_118 : f32 to vector<16x1xf32>
    %251 = arith.subf %250, %249 : vector<16x1xf32>
    %252 = arith.mulf %248, %251 : vector<16x1xf32>
    %253 = vector.broadcast %237 : vector<16x1xf32> to vector<16x32xf32>
    %254 = arith.subf %229, %253 : vector<16x32xf32>
    %255 = vector.broadcast %231 : vector<1x32xf32> to vector<16x32xf32>
    %256 = arith.mulf %255, %254 : vector<16x32xf32>
    %257 = vector.broadcast %252 : vector<16x1xf32> to vector<16x32xf32>
    %258 = arith.mulf %256, %257 : vector<16x32xf32>
    %259 = vector.broadcast %233 : vector<1x32xf32> to vector<16x32xf32>
    %260 = arith.addf %258, %259 : vector<16x32xf32>
    %261 = arith.truncf %260 : vector<16x32xf32> to vector<16x32xbf16>
    %c1_119 = arith.constant 1 : index
    %c0_120 = arith.constant 0 : index
    %c0_121 = arith.constant 0 : index
    %262 = vector.load %arg10[%c1_119, %c0_120, %c0_121] : memref<2x33x256xbf16, #tpu.memory_space<vmem>>, vector<1x32x96xbf16>
    %263 = vector.shape_cast %262 : vector<1x32x96xbf16> to vector<32x96xbf16>
    %cst_122 = arith.constant dense<0.000000e+00> : vector<16x96xf32>
    %264 = tpu.matmul %261, %263, %cst_122 {dimension_numbers = #tpu.dot_dimension_numbers<[1], [0], [0], [1], [0, 0, 1, 1], [], []>} : vector<16x32xbf16>, vector<32x96xbf16>, vector<16x96xf32> -> vector<16x96xf32>
    %c1_123 = arith.constant 1 : index
    %c32_124 = arith.constant 32 : index
    %c0_125 = arith.constant 0 : index
    %265 = vector.load %arg10[%c1_123, %c32_124, %c0_125] : memref<2x33x256xbf16, #tpu.memory_space<vmem>>, vector<1x1x96xbf16>
    %266 = vector.shape_cast %265 : vector<1x1x96xbf16> to vector<1x96xbf16>
    %267 = arith.extf %266 : vector<1x96xbf16> to vector<1x96xf32>
    %268 = vector.broadcast %267 : vector<1x96xf32> to vector<16x96xf32>
    %269 = arith.addf %264, %268 : vector<16x96xf32>
    %270 = vector.extract_strided_slice %269 {offsets = [0, 0], sizes = [16, 32], strides = [1, 1]} : vector<16x96xf32> to vector<16x32xf32>
    %271 = vector.extract_strided_slice %269 {offsets = [0, 32], sizes = [16, 32], strides = [1, 1]} : vector<16x96xf32> to vector<16x32xf32>
    %272 = vector.extract_strided_slice %269 {offsets = [0, 64], sizes = [16, 32], strides = [1, 1]} : vector<16x96xf32> to vector<16x32xf32>
    %c1_126 = arith.constant 1 : index
    %c0_127 = arith.constant 0 : index
    %c96_128 = arith.constant 96 : index
    %273 = vector.load %arg10[%c1_126, %c0_127, %c96_128] : memref<2x33x256xbf16, #tpu.memory_space<vmem>>, vector<1x32x32xbf16>
    %274 = vector.shape_cast %273 : vector<1x32x32xbf16> to vector<32x32xbf16>
    %c1_129 = arith.constant 1 : index
    %c32_130 = arith.constant 32 : index
    %c96_131 = arith.constant 96 : index
    %275 = vector.load %arg10[%c1_129, %c32_130, %c96_131] : memref<2x33x256xbf16, #tpu.memory_space<vmem>>, vector<1x1x32xbf16>
    %276 = vector.shape_cast %275 : vector<1x1x32xbf16> to vector<1x32xbf16>
    %c0_132 = arith.constant 0 : index
    %c0_133 = arith.constant 0 : index
    %277 = vector.load %arg4[%c0_132, %c0_133] : memref<64x16xbf16, #tpu.memory_space<vmem>>, vector<64x16xbf16>
    %c0_134 = arith.constant 0 : index
    %c0_135 = arith.constant 0 : index
    %278 = vector.load %arg5[%c0_134, %c0_135] : memref<64x32xf32, #tpu.memory_space<vmem>>, vector<64x32xf32>
    %279 = arith.truncf %271 : vector<16x32xf32> to vector<16x32xbf16>
    %cst_136 = arith.constant dense<0.000000e+00> : vector<64x32xf32>
    %280 = tpu.matmul %277, %279, %cst_136 {dimension_numbers = #tpu.dot_dimension_numbers<[1], [0], [0], [1], [0, 0, 1, 1], [], []>} : vector<64x16xbf16>, vector<16x32xbf16>, vector<64x32xf32> -> vector<64x32xf32>
    %281 = arith.mulf %280, %278 : vector<64x32xf32>
    %282 = arith.truncf %281 : vector<64x32xf32> to vector<64x32xbf16>
    %283 = arith.truncf %272 : vector<16x32xf32> to vector<16x32xbf16>
    %cst_137 = arith.constant dense<0.000000e+00> : vector<64x32xf32>
    %284 = tpu.matmul %277, %283, %cst_137 {dimension_numbers = #tpu.dot_dimension_numbers<[1], [0], [0], [1], [0, 0, 1, 1], [], []>} : vector<64x16xbf16>, vector<16x32xbf16>, vector<64x32xf32> -> vector<64x32xf32>
    %285 = arith.mulf %284, %278 : vector<64x32xf32>
    %286 = arith.truncf %285 : vector<64x32xf32> to vector<64x32xbf16>
    %287 = arith.truncf %270 : vector<16x32xf32> to vector<16x32xbf16>
    %cst_138 = arith.constant dense<0.000000e+00> : vector<16x64xf32>
    %288 = tpu.matmul %287, %282, %cst_138 {dimension_numbers = #tpu.dot_dimension_numbers<[1], [1], [0], [0], [0, 0, 1, 0], [], []>} : vector<16x32xbf16>, vector<64x32xbf16>, vector<16x64xf32> -> vector<16x64xf32>
    %c0_139 = arith.constant 0 : index
    %c0_140 = arith.constant 0 : index
    %289 = vector.load %arg2[%c0_139, %c0_140] : memref<16x64xf32, #tpu.memory_space<vmem>>, vector<16x64xf32>
    %290 = arith.addf %288, %289 : vector<16x64xf32>
    %cst_141 = arith.constant dense<0xFF800000> : vector<16xf32>
    %291 = vector.multi_reduction <maximumf>, %290, %cst_141 [1] : vector<16x64xf32> to vector<16xf32>
    %292 = vector.shape_cast %291 : vector<16xf32> to vector<16x1xf32>
    %293 = vector.broadcast %292 : vector<16x1xf32> to vector<16x64xf32>
    %294 = arith.subf %290, %293 : vector<16x64xf32>
    %295 = math.exp %294 : vector<16x64xf32>
    %296 = arith.truncf %295 : vector<16x64xf32> to vector<16x64xbf16>
    %c0_142 = arith.constant 0 : index
    %c0_143 = arith.constant 0 : index
    %297 = vector.load %arg6[%c0_142, %c0_143] : memref<64x64xbf16, #tpu.memory_space<vmem>>, vector<64x64xbf16>
    %cst_144 = arith.constant dense<0.000000e+00> : vector<16x64xf32>
    %298 = tpu.matmul %296, %297, %cst_144 {dimension_numbers = #tpu.dot_dimension_numbers<[1], [0], [0], [1], [0, 0, 1, 1], [], []>} : vector<16x64xbf16>, vector<64x64xbf16>, vector<16x64xf32> -> vector<16x64xf32>
    %cst_145 = arith.constant 1.000000e-30 : f32
    %299 = vector.broadcast %cst_145 : f32 to vector<16x64xf32>
    %300 = arith.addf %298, %299 : vector<16x64xf32>
    %301 = tpu.reciprocal %300 {approx = true} : vector<16x64xf32> -> vector<16x64xf32>
    %302 = arith.mulf %300, %301 : vector<16x64xf32>
    %cst_146 = arith.constant 2.000000e+00 : f32
    %303 = vector.broadcast %cst_146 : f32 to vector<16x64xf32>
    %304 = arith.subf %303, %302 : vector<16x64xf32>
    %305 = arith.mulf %301, %304 : vector<16x64xf32>
    %306 = arith.mulf %295, %305 : vector<16x64xf32>
    %307 = arith.truncf %306 : vector<16x64xf32> to vector<16x64xbf16>
    %cst_147 = arith.constant dense<0.000000e+00> : vector<16x32xf32>
    %308 = tpu.matmul %307, %286, %cst_147 {dimension_numbers = #tpu.dot_dimension_numbers<[1], [0], [0], [1], [0, 0, 1, 1], [], []>} : vector<16x64xbf16>, vector<64x32xbf16>, vector<16x32xf32> -> vector<16x32xf32>
    %309 = arith.truncf %308 : vector<16x32xf32> to vector<16x32xbf16>
    %cst_148 = arith.constant dense<0.000000e+00> : vector<16x32xf32>
    %310 = tpu.matmul %309, %274, %cst_148 {dimension_numbers = #tpu.dot_dimension_numbers<[1], [0], [0], [1], [0, 0, 1, 1], [], []>} : vector<16x32xbf16>, vector<32x32xbf16>, vector<16x32xf32> -> vector<16x32xf32>
    %311 = arith.extf %276 : vector<1x32xbf16> to vector<1x32xf32>
    %312 = vector.broadcast %311 : vector<1x32xf32> to vector<16x32xf32>
    %313 = arith.addf %310, %312 : vector<16x32xf32>
    %314 = arith.addf %229, %313 : vector<16x32xf32>
    %c1_149 = arith.constant 1 : index
    %c1_150 = arith.constant 1 : index
    %c0_151 = arith.constant 0 : index
    %315 = vector.load %arg13[%c1_149, %c1_150, %c0_151] : memref<2x6x32xf32, #tpu.memory_space<vmem>>, vector<1x1x32xf32>
    %316 = vector.shape_cast %315 : vector<1x1x32xf32> to vector<1x32xf32>
    %c1_152 = arith.constant 1 : index
    %c4_153 = arith.constant 4 : index
    %c0_154 = arith.constant 0 : index
    %317 = vector.load %arg13[%c1_152, %c4_153, %c0_154] : memref<2x6x32xf32, #tpu.memory_space<vmem>>, vector<1x1x32xf32>
    %318 = vector.shape_cast %317 : vector<1x1x32xf32> to vector<1x32xf32>
    %cst_155 = arith.constant dense<0.000000e+00> : vector<16xf32>
    %319 = vector.multi_reduction <add>, %314, %cst_155 [1] : vector<16x32xf32> to vector<16xf32>
    %320 = vector.shape_cast %319 : vector<16xf32> to vector<16x1xf32>
    %cst_156 = arith.constant 3.200000e+01 : f32
    %321 = vector.broadcast %cst_156 : f32 to vector<16x1xf32>
    %322 = arith.divf %320, %321 : vector<16x1xf32>
    %323 = vector.broadcast %322 : vector<16x1xf32> to vector<16x32xf32>
    %324 = arith.subf %314, %323 : vector<16x32xf32>
    %325 = arith.mulf %324, %324 : vector<16x32xf32>
    %cst_157 = arith.constant dense<0.000000e+00> : vector<16xf32>
    %326 = vector.multi_reduction <add>, %325, %cst_157 [1] : vector<16x32xf32> to vector<16xf32>
    %327 = vector.shape_cast %326 : vector<16xf32> to vector<16x1xf32>
    %cst_158 = arith.constant 0.0322580636 : f32
    %328 = vector.broadcast %cst_158 : f32 to vector<16x1xf32>
    %329 = arith.mulf %327, %328 : vector<16x1xf32>
    %330 = math.sqrt %329 : vector<16x1xf32>
    %cst_159 = arith.constant 9.99999997E-7 : f32
    %331 = vector.broadcast %cst_159 : f32 to vector<16x1xf32>
    %332 = arith.addf %330, %331 : vector<16x1xf32>
    %333 = tpu.reciprocal %332 {approx = true} : vector<16x1xf32> -> vector<16x1xf32>
    %334 = arith.mulf %332, %333 : vector<16x1xf32>
    %cst_160 = arith.constant 2.000000e+00 : f32
    %335 = vector.broadcast %cst_160 : f32 to vector<16x1xf32>
    %336 = arith.subf %335, %334 : vector<16x1xf32>
    %337 = arith.mulf %333, %336 : vector<16x1xf32>
    %338 = vector.broadcast %322 : vector<16x1xf32> to vector<16x32xf32>
    %339 = arith.subf %314, %338 : vector<16x32xf32>
    %340 = vector.broadcast %316 : vector<1x32xf32> to vector<16x32xf32>
    %341 = arith.mulf %340, %339 : vector<16x32xf32>
    %342 = vector.broadcast %337 : vector<16x1xf32> to vector<16x32xf32>
    %343 = arith.mulf %341, %342 : vector<16x32xf32>
    %344 = vector.broadcast %318 : vector<1x32xf32> to vector<16x32xf32>
    %345 = arith.addf %343, %344 : vector<16x32xf32>
    %346 = arith.truncf %345 : vector<16x32xf32> to vector<16x32xbf16>
    %c1_161 = arith.constant 1 : index
    %c0_162 = arith.constant 0 : index
    %c128_163 = arith.constant 128 : index
    %347 = vector.load %arg10[%c1_161, %c0_162, %c128_163] : memref<2x33x256xbf16, #tpu.memory_space<vmem>>, vector<1x32x32xbf16>
    %348 = vector.shape_cast %347 : vector<1x32x32xbf16> to vector<32x32xbf16>
    %cst_164 = arith.constant dense<0.000000e+00> : vector<16x32xf32>
    %349 = tpu.matmul %346, %348, %cst_164 {dimension_numbers = #tpu.dot_dimension_numbers<[1], [0], [0], [1], [0, 0, 1, 1], [], []>} : vector<16x32xbf16>, vector<32x32xbf16>, vector<16x32xf32> -> vector<16x32xf32>
    %c1_165 = arith.constant 1 : index
    %c32_166 = arith.constant 32 : index
    %c128_167 = arith.constant 128 : index
    %350 = vector.load %arg10[%c1_165, %c32_166, %c128_167] : memref<2x33x256xbf16, #tpu.memory_space<vmem>>, vector<1x1x32xbf16>
    %351 = vector.shape_cast %350 : vector<1x1x32xbf16> to vector<1x32xbf16>
    %352 = arith.extf %351 : vector<1x32xbf16> to vector<1x32xf32>
    %353 = vector.broadcast %352 : vector<1x32xf32> to vector<16x32xf32>
    %354 = arith.addf %349, %353 : vector<16x32xf32>
    %355 = vector.extract_strided_slice %8 {offsets = [0, 64], sizes = [32, 32], strides = [1, 1]} : vector<32x128xf32> to vector<32x32xf32>
    %356 = vector.extract_strided_slice %8 {offsets = [0, 96], sizes = [32, 32], strides = [1, 1]} : vector<32x128xf32> to vector<32x32xf32>
    %c1_168 = arith.constant 1 : index
    %c0_169 = arith.constant 0 : index
    %c160_170 = arith.constant 160 : index
    %357 = vector.load %arg10[%c1_168, %c0_169, %c160_170] : memref<2x33x256xbf16, #tpu.memory_space<vmem>>, vector<1x32x32xbf16>
    %358 = vector.shape_cast %357 : vector<1x32x32xbf16> to vector<32x32xbf16>
    %c1_171 = arith.constant 1 : index
    %c32_172 = arith.constant 32 : index
    %c160_173 = arith.constant 160 : index
    %359 = vector.load %arg10[%c1_171, %c32_172, %c160_173] : memref<2x33x256xbf16, #tpu.memory_space<vmem>>, vector<1x1x32xbf16>
    %360 = vector.shape_cast %359 : vector<1x1x32xbf16> to vector<1x32xbf16>
    %c0_174 = arith.constant 0 : index
    %c0_175 = arith.constant 0 : index
    %361 = vector.load %arg7[%c0_174, %c0_175] : memref<128x32xbf16, #tpu.memory_space<vmem>>, vector<128x32xbf16>
    %c0_176 = arith.constant 0 : index
    %c0_177 = arith.constant 0 : index
    %362 = vector.load %arg8[%c0_176, %c0_177] : memref<128x32xf32, #tpu.memory_space<vmem>>, vector<128x32xf32>
    %363 = arith.truncf %355 : vector<32x32xf32> to vector<32x32xbf16>
    %cst_178 = arith.constant dense<0.000000e+00> : vector<128x32xf32>
    %364 = tpu.matmul %361, %363, %cst_178 {dimension_numbers = #tpu.dot_dimension_numbers<[1], [0], [0], [1], [0, 0, 1, 1], [], []>} : vector<128x32xbf16>, vector<32x32xbf16>, vector<128x32xf32> -> vector<128x32xf32>
    %365 = arith.mulf %364, %362 : vector<128x32xf32>
    %366 = arith.truncf %365 : vector<128x32xf32> to vector<128x32xbf16>
    %367 = arith.truncf %356 : vector<32x32xf32> to vector<32x32xbf16>
    %cst_179 = arith.constant dense<0.000000e+00> : vector<128x32xf32>
    %368 = tpu.matmul %361, %367, %cst_179 {dimension_numbers = #tpu.dot_dimension_numbers<[1], [0], [0], [1], [0, 0, 1, 1], [], []>} : vector<128x32xbf16>, vector<32x32xbf16>, vector<128x32xf32> -> vector<128x32xf32>
    %369 = arith.mulf %368, %362 : vector<128x32xf32>
    %370 = arith.truncf %369 : vector<128x32xf32> to vector<128x32xbf16>
    %371 = arith.truncf %354 : vector<16x32xf32> to vector<16x32xbf16>
    %cst_180 = arith.constant dense<0.000000e+00> : vector<16x128xf32>
    %372 = tpu.matmul %371, %366, %cst_180 {dimension_numbers = #tpu.dot_dimension_numbers<[1], [1], [0], [0], [0, 0, 1, 0], [], []>} : vector<16x32xbf16>, vector<128x32xbf16>, vector<16x128xf32> -> vector<16x128xf32>
    %c0_181 = arith.constant 0 : index
    %c0_182 = arith.constant 0 : index
    %373 = vector.load %arg3[%c0_181, %c0_182] : memref<16x128xf32, #tpu.memory_space<vmem>>, vector<16x128xf32>
    %374 = arith.addf %372, %373 : vector<16x128xf32>
    %cst_183 = arith.constant dense<0xFF800000> : vector<16xf32>
    %375 = vector.multi_reduction <maximumf>, %374, %cst_183 [1] : vector<16x128xf32> to vector<16xf32>
    %376 = vector.shape_cast %375 : vector<16xf32> to vector<16x1xf32>
    %377 = vector.broadcast %376 : vector<16x1xf32> to vector<16x128xf32>
    %378 = arith.subf %374, %377 : vector<16x128xf32>
    %379 = math.exp %378 : vector<16x128xf32>
    %380 = arith.truncf %379 : vector<16x128xf32> to vector<16x128xbf16>
    %c0_184 = arith.constant 0 : index
    %c0_185 = arith.constant 0 : index
    %381 = vector.load %arg9[%c0_184, %c0_185] : memref<128x128xbf16, #tpu.memory_space<vmem>>, vector<128x128xbf16>
    %cst_186 = arith.constant dense<0.000000e+00> : vector<16x128xf32>
    %382 = tpu.matmul %380, %381, %cst_186 {dimension_numbers = #tpu.dot_dimension_numbers<[1], [0], [0], [1], [0, 0, 1, 1], [], []>} : vector<16x128xbf16>, vector<128x128xbf16>, vector<16x128xf32> -> vector<16x128xf32>
    %cst_187 = arith.constant 1.000000e-30 : f32
    %383 = vector.broadcast %cst_187 : f32 to vector<16x128xf32>
    %384 = arith.addf %382, %383 : vector<16x128xf32>
    %385 = tpu.reciprocal %384 {approx = true} : vector<16x128xf32> -> vector<16x128xf32>
    %386 = arith.mulf %384, %385 : vector<16x128xf32>
    %cst_188 = arith.constant 2.000000e+00 : f32
    %387 = vector.broadcast %cst_188 : f32 to vector<16x128xf32>
    %388 = arith.subf %387, %386 : vector<16x128xf32>
    %389 = arith.mulf %385, %388 : vector<16x128xf32>
    %390 = arith.mulf %379, %389 : vector<16x128xf32>
    %391 = arith.truncf %390 : vector<16x128xf32> to vector<16x128xbf16>
    %cst_189 = arith.constant dense<0.000000e+00> : vector<16x32xf32>
    %392 = tpu.matmul %391, %370, %cst_189 {dimension_numbers = #tpu.dot_dimension_numbers<[1], [0], [0], [1], [0, 0, 1, 1], [], []>} : vector<16x128xbf16>, vector<128x32xbf16>, vector<16x32xf32> -> vector<16x32xf32>
    %393 = arith.truncf %392 : vector<16x32xf32> to vector<16x32xbf16>
    %cst_190 = arith.constant dense<0.000000e+00> : vector<16x32xf32>
    %394 = tpu.matmul %393, %358, %cst_190 {dimension_numbers = #tpu.dot_dimension_numbers<[1], [0], [0], [1], [0, 0, 1, 1], [], []>} : vector<16x32xbf16>, vector<32x32xbf16>, vector<16x32xf32> -> vector<16x32xf32>
    %395 = arith.extf %360 : vector<1x32xbf16> to vector<1x32xf32>
    %396 = vector.broadcast %395 : vector<1x32xf32> to vector<16x32xf32>
    %397 = arith.addf %394, %396 : vector<16x32xf32>
    %398 = arith.addf %314, %397 : vector<16x32xf32>
    %c1_191 = arith.constant 1 : index
    %c2_192 = arith.constant 2 : index
    %c0_193 = arith.constant 0 : index
    %399 = vector.load %arg13[%c1_191, %c2_192, %c0_193] : memref<2x6x32xf32, #tpu.memory_space<vmem>>, vector<1x1x32xf32>
    %400 = vector.shape_cast %399 : vector<1x1x32xf32> to vector<1x32xf32>
    %c1_194 = arith.constant 1 : index
    %c5_195 = arith.constant 5 : index
    %c0_196 = arith.constant 0 : index
    %401 = vector.load %arg13[%c1_194, %c5_195, %c0_196] : memref<2x6x32xf32, #tpu.memory_space<vmem>>, vector<1x1x32xf32>
    %402 = vector.shape_cast %401 : vector<1x1x32xf32> to vector<1x32xf32>
    %cst_197 = arith.constant dense<0.000000e+00> : vector<16xf32>
    %403 = vector.multi_reduction <add>, %398, %cst_197 [1] : vector<16x32xf32> to vector<16xf32>
    %404 = vector.shape_cast %403 : vector<16xf32> to vector<16x1xf32>
    %cst_198 = arith.constant 3.200000e+01 : f32
    %405 = vector.broadcast %cst_198 : f32 to vector<16x1xf32>
    %406 = arith.divf %404, %405 : vector<16x1xf32>
    %407 = vector.broadcast %406 : vector<16x1xf32> to vector<16x32xf32>
    %408 = arith.subf %398, %407 : vector<16x32xf32>
    %409 = arith.mulf %408, %408 : vector<16x32xf32>
    %cst_199 = arith.constant dense<0.000000e+00> : vector<16xf32>
    %410 = vector.multi_reduction <add>, %409, %cst_199 [1] : vector<16x32xf32> to vector<16xf32>
    %411 = vector.shape_cast %410 : vector<16xf32> to vector<16x1xf32>
    %cst_200 = arith.constant 0.0322580636 : f32
    %412 = vector.broadcast %cst_200 : f32 to vector<16x1xf32>
    %413 = arith.mulf %411, %412 : vector<16x1xf32>
    %414 = math.sqrt %413 : vector<16x1xf32>
    %cst_201 = arith.constant 9.99999997E-7 : f32
    %415 = vector.broadcast %cst_201 : f32 to vector<16x1xf32>
    %416 = arith.addf %414, %415 : vector<16x1xf32>
    %417 = tpu.reciprocal %416 {approx = true} : vector<16x1xf32> -> vector<16x1xf32>
    %418 = arith.mulf %416, %417 : vector<16x1xf32>
    %cst_202 = arith.constant 2.000000e+00 : f32
    %419 = vector.broadcast %cst_202 : f32 to vector<16x1xf32>
    %420 = arith.subf %419, %418 : vector<16x1xf32>
    %421 = arith.mulf %417, %420 : vector<16x1xf32>
    %422 = vector.broadcast %406 : vector<16x1xf32> to vector<16x32xf32>
    %423 = arith.subf %398, %422 : vector<16x32xf32>
    %424 = vector.broadcast %400 : vector<1x32xf32> to vector<16x32xf32>
    %425 = arith.mulf %424, %423 : vector<16x32xf32>
    %426 = vector.broadcast %421 : vector<16x1xf32> to vector<16x32xf32>
    %427 = arith.mulf %425, %426 : vector<16x32xf32>
    %428 = vector.broadcast %402 : vector<1x32xf32> to vector<16x32xf32>
    %429 = arith.addf %427, %428 : vector<16x32xf32>
    %430 = arith.truncf %429 : vector<16x32xf32> to vector<16x32xbf16>
    %c1_203 = arith.constant 1 : index
    %c0_204 = arith.constant 0 : index
    %c192_205 = arith.constant 192 : index
    %431 = vector.load %arg10[%c1_203, %c0_204, %c192_205] : memref<2x33x256xbf16, #tpu.memory_space<vmem>>, vector<1x32x64xbf16>
    %432 = vector.shape_cast %431 : vector<1x32x64xbf16> to vector<32x64xbf16>
    %cst_206 = arith.constant dense<0.000000e+00> : vector<16x64xf32>
    %433 = tpu.matmul %430, %432, %cst_206 {dimension_numbers = #tpu.dot_dimension_numbers<[1], [0], [0], [1], [0, 0, 1, 1], [], []>} : vector<16x32xbf16>, vector<32x64xbf16>, vector<16x64xf32> -> vector<16x64xf32>
    %c1_207 = arith.constant 1 : index
    %c32_208 = arith.constant 32 : index
    %c192_209 = arith.constant 192 : index
    %434 = vector.load %arg10[%c1_207, %c32_208, %c192_209] : memref<2x33x256xbf16, #tpu.memory_space<vmem>>, vector<1x1x64xbf16>
    %435 = vector.shape_cast %434 : vector<1x1x64xbf16> to vector<1x64xbf16>
    %436 = arith.extf %435 : vector<1x64xbf16> to vector<1x64xf32>
    %437 = vector.broadcast %436 : vector<1x64xf32> to vector<16x64xf32>
    %438 = arith.addf %433, %437 : vector<16x64xf32>
    %cst_210 = arith.constant 0.000000e+00 : f32
    %439 = vector.broadcast %cst_210 : f32 to vector<16x64xf32>
    %440 = arith.maximumf %438, %439 : vector<16x64xf32>
    %441 = arith.truncf %440 : vector<16x64xf32> to vector<16x64xbf16>
    %c1_211 = arith.constant 1 : index
    %c0_212 = arith.constant 0 : index
    %c0_213 = arith.constant 0 : index
    %442 = vector.load %arg11[%c1_211, %c0_212, %c0_213] : memref<2x65x32xbf16, #tpu.memory_space<vmem>>, vector<1x64x32xbf16>
    %443 = vector.shape_cast %442 : vector<1x64x32xbf16> to vector<64x32xbf16>
    %cst_214 = arith.constant dense<0.000000e+00> : vector<16x32xf32>
    %444 = tpu.matmul %441, %443, %cst_214 {dimension_numbers = #tpu.dot_dimension_numbers<[1], [0], [0], [1], [0, 0, 1, 1], [], []>} : vector<16x64xbf16>, vector<64x32xbf16>, vector<16x32xf32> -> vector<16x32xf32>
    %c1_215 = arith.constant 1 : index
    %c64_216 = arith.constant 64 : index
    %c0_217 = arith.constant 0 : index
    %445 = vector.load %arg11[%c1_215, %c64_216, %c0_217] : memref<2x65x32xbf16, #tpu.memory_space<vmem>>, vector<1x1x32xbf16>
    %446 = vector.shape_cast %445 : vector<1x1x32xbf16> to vector<1x32xbf16>
    %447 = arith.extf %446 : vector<1x32xbf16> to vector<1x32xf32>
    %448 = vector.broadcast %447 : vector<1x32xf32> to vector<16x32xf32>
    %449 = arith.addf %444, %448 : vector<16x32xf32>
    %450 = arith.addf %398, %449 : vector<16x32xf32>
    %c0_218 = arith.constant 0 : index
    %c0_219 = arith.constant 0 : index
    %451 = vector.load %arg14[%c0_218, %c0_219] : memref<2x32xf32, #tpu.memory_space<vmem>>, vector<1x32xf32>
    %c1_220 = arith.constant 1 : index
    %c0_221 = arith.constant 0 : index
    %452 = vector.load %arg14[%c1_220, %c0_221] : memref<2x32xf32, #tpu.memory_space<vmem>>, vector<1x32xf32>
    %cst_222 = arith.constant dense<0.000000e+00> : vector<16xf32>
    %453 = vector.multi_reduction <add>, %450, %cst_222 [1] : vector<16x32xf32> to vector<16xf32>
    %454 = vector.shape_cast %453 : vector<16xf32> to vector<16x1xf32>
    %cst_223 = arith.constant 3.200000e+01 : f32
    %455 = vector.broadcast %cst_223 : f32 to vector<16x1xf32>
    %456 = arith.divf %454, %455 : vector<16x1xf32>
    %457 = vector.broadcast %456 : vector<16x1xf32> to vector<16x32xf32>
    %458 = arith.subf %450, %457 : vector<16x32xf32>
    %459 = arith.mulf %458, %458 : vector<16x32xf32>
    %cst_224 = arith.constant dense<0.000000e+00> : vector<16xf32>
    %460 = vector.multi_reduction <add>, %459, %cst_224 [1] : vector<16x32xf32> to vector<16xf32>
    %461 = vector.shape_cast %460 : vector<16xf32> to vector<16x1xf32>
    %cst_225 = arith.constant 0.0322580636 : f32
    %462 = vector.broadcast %cst_225 : f32 to vector<16x1xf32>
    %463 = arith.mulf %461, %462 : vector<16x1xf32>
    %464 = math.sqrt %463 : vector<16x1xf32>
    %cst_226 = arith.constant 9.99999997E-7 : f32
    %465 = vector.broadcast %cst_226 : f32 to vector<16x1xf32>
    %466 = arith.addf %464, %465 : vector<16x1xf32>
    %467 = tpu.reciprocal %466 {approx = true} : vector<16x1xf32> -> vector<16x1xf32>
    %468 = arith.mulf %466, %467 : vector<16x1xf32>
    %cst_227 = arith.constant 2.000000e+00 : f32
    %469 = vector.broadcast %cst_227 : f32 to vector<16x1xf32>
    %470 = arith.subf %469, %468 : vector<16x1xf32>
    %471 = arith.mulf %467, %470 : vector<16x1xf32>
    %472 = vector.broadcast %456 : vector<16x1xf32> to vector<16x32xf32>
    %473 = arith.subf %450, %472 : vector<16x32xf32>
    %474 = vector.broadcast %451 : vector<1x32xf32> to vector<16x32xf32>
    %475 = arith.mulf %474, %473 : vector<16x32xf32>
    %476 = vector.broadcast %471 : vector<16x1xf32> to vector<16x32xf32>
    %477 = arith.mulf %475, %476 : vector<16x32xf32>
    %478 = vector.broadcast %452 : vector<1x32xf32> to vector<16x32xf32>
    %479 = arith.addf %477, %478 : vector<16x32xf32>
    %c0_228 = arith.constant 0 : index
    %c0_229 = arith.constant 0 : index
    %480 = vector.load %arg15[%c0_228, %c0_229] : memref<16x32xf32, #tpu.memory_space<vmem>>, vector<16x32xf32>
    tpu.vector_store %arg15[%c0_228, %c0_229], %479 {strides = array<i32>} : memref<16x32xf32, #tpu.memory_space<vmem>>, vector<16x32xf32>,
    return
  }
}

</mosaic_0001>

<bundles_post_ra>
// kernel: tpu_custom_call.1
= control target key start
LH: loop header
LB: loop body
LE: loop exit
PB: predicated region body
PF: predicated region fallthrough
CT: control target
= control target key end

     0   :  { %vm82_vm0 = vcmask 261120   ;;  %s5398_s0 = inlined_call_operand.vmem [shape: f32[16,32], index: 0, kind: input, shape index: {}]   ;;  %s5399_s1 = inlined_call_operand.vmem [shape: f32[32,32], index: 1, kind: input, shape index: {}]   ;;  %s5400_s2 = inlined_call_operand.vmem [shape: f32[16,64], index: 2, kind: input, shape index: {}]   ;;  %s5401_s3 = inlined_call_operand.vmem [shape: f32[16,128], index: 3, kind: input, shape index: {}]   ;;  %s5402_s4 = inlined_call_operand.vmem [shape: bf16[64,16], index: 4, kind: input, shape index: {}]   ;;  %s5403_s5 = inlined_call_operand.vmem [shape: f32[64,32], index: 5, kind: input, shape index: {}]   ;;  %s5404_s6 = inlined_call_operand.vmem [shape: bf16[64,64], index: 6, kind: input, shape index: {}]   ;;  %s5405_s7 = inlined_call_operand.vmem [shape: bf16[128,32], index: 7, kind: input, shape index: {}]   ;;  %s5406_s8 = inlined_call_operand.vmem [shape: f32[128,32], index: 8, kind: input, shape index: {}]   ;;  %s5407_s9 = inlined_call_operand.vmem [shape: bf16[128,128], index: 9, kind: input, shape index: {}]   ;;  %s5408_s10 = inlined_call_operand.vmem [shape: bf16[2,33,256], index: 10, kind: input, shape index: {}]   ;;  %s5409_s11 = inlined_call_operand.vmem [shape: bf16[2,65,32], index: 11, kind: input, shape index: {}]   ;;  %s5410_s12 = inlined_call_operand.vmem [shape: bf16[33,128], index: 12, kind: input, shape index: {}]   ;;  %s5411_s13 = inlined_call_operand.vmem [shape: f32[2,6,32], index: 13, kind: input, shape index: {}]   ;;  %s5412_s14 = inlined_call_operand.vmem [shape: f32[2,32], index: 14, kind: input, shape index: {}]   ;;  %s5413_s15 = inlined_call_operand.hbm [shape: f32[16,32], index: 15, kind: output, shape index: {}]  }
   0x1   :  { %v4184_v0 = vld [vmem:[%s5398_s0] sm:$0xff]  ;;  %v4189_v1 = vld [vmem:[%s5398_s0 + $0x8] sm:$0xff] }
   0x2   :  { %v140_v2 = vsel %vm82_vm0, %v4184_v0, 0.0  ;;  %v143_v3 = vsel %vm82_vm0, %v4189_v1, 0.0 }
   0x3   :  { %141 = vadd.xlane.f32.xlu0 %v140_v2 }
   0x7   :  { %144 = vadd.xlane.f32.xlu0 %v143_v3 }
   0x8   :  { %20 = vsyncpa [#allocation3], 0  ;;  %v4202_v14 = vld [vmem:[%s5408_s10] ss:$8 sps:$4 sm:$0xff]   ;;  %v4093_v15 = vmov 0.0   ;;  %vm4094_vm1 = vmmov 0   ;;  %v66_v58 = vlaneseq }
   0x9   :  { %3463 = vmatprep.subr.bf16.mxu1 %v4093_v15  ;;  %3467 = vmatprep.mubr.msk.bf16.mxu1 %vm4094_vm1, %v4093_v15  ;;  %v4211_v16 = vld [vmem:[%s5408_s10 + $0x10] ss:$8 sps:$4 sm:$0xff]   ;;  %v3120_v37 = vld [vmem:[%s5411_s13] ss:$0 sm:$0xff]  ;;  %v3121_v45 = vld [vmem:[%s5411_s13 + $0x3] ss:$0 sm:$0xff] }
   0xa   :  { %3464 = vmatpush3.bf16.msra.mxu1 %v4202_v14  ;;  %v3889_v50 = vld [vmem:[%s5410_s12] sm:$0xff]   ;;  %v3890_v51 = vld [vmem:[%s5410_s12 + $0x8] sm:$0xff]   ;;  %v56_v55 = vld [vmem:[%s5399_s1 + $0x10] sm:$0xff]  ;;  %v67_v59 = vshrl.u32 %v66_v58, 7  ;;  %vm307_vm6 = vcmask 130048   ;;  %s4096_s20 = smov 32  }
   0xb   :  { %3465 = vmatprep.subr.bf16.mxu1 %v4093_v15  ;;  %v54_v52 = vld [vmem:[%s5399_s1] sm:$0xff]  ;;  %v55_v53 = vld [vmem:[%s5399_s1 + $0x8] sm:$0xff]  ;;  %3455 = vmatprep.subr.bf16.mxu0 %v3889_v50  ;;  %v57_v56 = vld [vmem:[%s5399_s1 + $0x18] sm:$0xff]  ;;  %s4095_s1 = smov 96   ;;  %vm535_vm7 = vcmask 523264   ;;  %s4097_s24 = smov 64  }
   0xc   :  { %v58_v54 = vpack.c.bf16 %v55_v53, %v54_v52  ;;  %3456 = vmatpush3.bf16.msra.mxu0 %v3889_v50  ;;  %v59_v57 = vpack.c.bf16 %v57_v56, %v56_v55  ;;  %v204_v60 = vld [vmem:[%s5408_s10 + $0x20] sm:$0x1]  ;;  %v4245_v61 = vsub.s32 0, %v67_v59  ;;  %s4098_s18 = smov [#allocation2]  }
   0xd   :  { %3457 = vmatprep.subr.bf16.mxu0 %v3890_v51  ;;  %v205_v62 = vunpack.c.l.bf16 %v204_v60  ;;  %v3891_v63 = vld [vmem:[%s5402_s4] sm:$0xff]   ;;  %s3105_s19 = sshll.u32 %s4098_s18, 4  ;;  %s3106_s19 = int_to_ptr.vmem [resolvable:$true] %s3105_s19 }
   0xe   :  { %3466 = vmatpush3.bf16.msra.mxu1 %v4211_v16  ;;  %3459 = vmatprep.mubr.msk.bf16.mxu0 %vm82_vm0, %v58_v54  ;;  %s4069_s21 = scalar_lea.vmem %s3106_s19, 256  ;;  %p4074_p1 = scmp.lt.s32.totalorder %s3106_s19, %s3106_s19 }
   0xf   :  { %v4253_v2 = vrot.slane %v205_v62, %v4245_v61  ;;  %p4070_p0 = scmp.ne.s32.totalorder %s3106_s19, %s4069_s21  ;;  %p4075_p2 = scmp.lt.s32.totalorder %s4069_s21, %s4069_s21 }
  0x10   :  { %3458 = vmatpush3.bf16.msra.mxu0 %v3890_v51  ;;  %v4337_v51 = vld [vmem:[%s5403_s5 + $0x28] sm:$0xff] }
  0x11   :  { %p4076_p3 = por %p4075_p2, %p4074_p1 }
  0x13   :  { %3460 = vmatmul.mubr.msk.bf16.vlgmr.msra.gmra.mrb[0].mxu0 %vm82_vm0, %v59_v57  ;;  %p4077_p4 = pnand %p4076_p3, %p4070_p0 }
  0x14   :  { %3473 = vmatprep.mubr.msk.bf16.mxu0 %vm307_vm6, %v3891_v63 }
  0x90   :  { %v142_v4 = vpop.xlane.xlu0 %141 }
  0x91   :  { %v147_v5 = vmul.f32 0.03125, %v142_v4 }
  0x93   :  { %v149_v6 = vsub.f32 %v4184_v0, %v147_v5 }
  0x94   :  { %v145_v7 = vpop.xlane.xlu0 %144 }
  0x95   :  { %v148_v8 = vmul.f32 0.03125, %v145_v7  ;;  %v151_v9 = vmul.f32 %v149_v6, %v149_v6  ;;  %v189_v40 = vmul.f32 %v3120_v37, %v149_v6 }
  0x97   :  { %v150_v10 = vsub.f32 %v4189_v1, %v148_v8  ;;  %v153_v11 = vsel %vm82_vm0, %v151_v9, 0.0 }
  0x98   :  { %154 = vadd.xlane.f32.xlu1 %v153_v11 }
  0x99   :  { %v152_v12 = vmul.f32 %v150_v10, %v150_v10  ;;  %v190_v42 = vmul.f32 %v3120_v37, %v150_v10  ;;  %v64_v10 = vld [vmem:[%s5410_s12 + $0x10] sm:$0x1] }
  0x9a   :  { %v65_v11 = vunpack.c.l.bf16 %v64_v10 }
  0x9b   :  { %v156_v13 = vsel %vm82_vm0, %v152_v12, 0.0 }
  0x9c   :  { %157 = vadd.xlane.f32.xlu1 %v156_v13  ;;  %v69_v12 = vrot.slane %v65_v11, %v4245_v61 }
  0xe6   :  { %v3461_v13 = vpop.f32.mrb[0].mxu0 }
 0x125   :  { %v155_v17 = vpop.xlane.xlu1 %154 }
 0x126   :  { %v159_v18 = vmul.f32 0.032258064, %v155_v17  ;;  %v132_v17 = vadd.f32 %v3461_v13, %v69_v12 }
 0x128   :  { %3929 = vrsqrt.f32 %v159_v18  ;;  %vm163_vm2 = vcmp.eq.f32.partialorder %v159_v18, inf  ;;  %v166_v23 = vand.u32 2147483648, %v159_v18  ;;  %vm165_vm3 = vcmp.eq.f32.partialorder %v159_v18, 0.0 }
 0x129   :  { %v158_v19 = vpop.xlane.xlu1 %157 }
 0x12a   :  { %v160_v20 = vmul.f32 0.032258064, %v158_v19 }
 0x12c   :  { %3931 = vrsqrt.f32 %v160_v20  ;;  %vm170_vm4 = vcmp.eq.f32.partialorder %v160_v20, inf  ;;  %v173_v29 = vand.u32 2147483648, %v160_v20  ;;  %vm172_vm5 = vcmp.eq.f32.partialorder %v160_v20, 0.0 }
 0x132   :  { %v3930_v21 = vpop.eup %3929 }
 0x133   :  { %v162_v22 = vmul.f32 %v3930_v21, %v159_v18 }
 0x135   :  { %v164_v24 = vsel %vm163_vm2, %v159_v18, %v162_v22  ;;  %v123_v18 = vpop.f32.mrb[1].mxu0 }
 0x136   :  { %v3932_v25 = vpop.eup %3931  ;;  %v167_v26 = vsel %vm165_vm3, %v166_v23, %v164_v24  ;;  %v124_v19 = vadd.f32 %v123_v18, %v69_v12 }
 0x137   :  { %v169_v27 = vmul.f32 %v3932_v25, %v160_v20  ;;  %v175_v28 = vadd.f32 1e-06, %v167_v26 }
 0x139   :  { %v171_v30 = vsel %vm170_vm4, %v160_v20, %v169_v27  ;;  %3933 = vrcp.f32 %v175_v28  ;;  %v3462_v20 = vpop.f32.mrb[2].mxu0  ;;  %v4272_v27 = vld [vmem:[%s5402_s4 + $0x8] sm:$0xff]  }
 0x13a   :  { %v174_v31 = vsel %vm172_vm5, %v173_v29, %v171_v30  ;;  %v135_v21 = vadd.f32 %v3462_v20, %v69_v12  ;;  %v126_v22 = vpop.f32.mrb[3].mxu0  ;;  %v4287_v29 = vld [vmem:[%s5402_s4 + $0x18] sm:$0xff]   ;;  %v4296_v30 = vld [vmem:[%s5403_s5 + $0x10] sm:$0xff] }
 0x13b   :  { %v176_v32 = vadd.f32 1e-06, %v174_v31  ;;  %v127_v23 = vadd.f32 %v126_v22, %v69_v12 }
 0x13c   :  { %v4265_v24 = vpack.c.bf16 %v135_v21, %v132_v17  ;;  %v3895_v21 = vld [vmem:[%s5404_s6] sm:$0xff]  }
 0x13d   :  { %3935 = vrcp.f32 %v176_v32  ;;  %v4267_v25 = vpack.c.bf16 %v127_v23, %v124_v19  ;;  %v3897_v23 = vld [vmem:[%s5404_s6 + $0x10] sm:$0xff]  }
 0x143   :  { %v3934_v33 = vpop.eup %3933 }
 0x144   :  { %v179_v34 = vmul.f32 %v3934_v33, %v175_v28  ;;  %v4277_v28 = vld [vmem:[%s5402_s4 + $0x10] sm:$0xff]  }
 0x146   :  { %v181_v35 = vsub.f32 2.0, %v179_v34 }
 0x147   :  { %v3936_v36 = vpop.eup %3935 }
 0x148   :  { %v180_v38 = vmul.f32 %v3936_v36, %v176_v32  ;;  %v183_v39 = vmul.f32 %v3934_v33, %v181_v35  ;;  %v4301_v32 = vld [vmem:[%s5403_s5 + $0x18] sm:$0xff]  ;;  %v4306_v33 = vld [vmem:[%s5403_s5] sm:$0xff]  ;;  %v4311_v35 = vld [vmem:[%s5403_s5 + $0x8] sm:$0xff] }
 0x14a   :  { %v182_v41 = vsub.f32 2.0, %v180_v38  ;;  %v191_v44 = vmul.f32 %v189_v40, %v183_v39 }
 0x14c   :  { %v184_v43 = vmul.f32 %v3936_v36, %v182_v41  ;;  %v197_v47 = vadd.f32 %v3121_v45, %v191_v44  ;;  %v4320_v44 = vld [vmem:[%s5403_s5 + $0x30] sm:$0xff] }
 0x14e   :  { %v192_v46 = vmul.f32 %v190_v42, %v184_v43 }
 0x150   :  { %v198_v48 = vadd.f32 %v3121_v45, %v192_v46  ;;  %v4325_v45 = vld [vmem:[%s5403_s5 + $0x20] sm:$0xff] }
 0x152   :  { %v199_v49 = vpack.c.bf16 %v198_v48, %v197_v47  ;;  %v4331_v48 = vld [vmem:[%s5403_s5 + $0x38] sm:$0xff] }
 0x154   :  { %3468 = vmatmul.mubr.msk.bf16.vlgmr.msra.gmra.mrb[0].mxu1 %vm82_vm0, %v199_v49 }
 0x155   :  { %3483 = vmatprep.mubr.msk.bf16.mxu1 %vm307_vm6, %v3891_v63  ;;  %v477_v63 = vld [vmem:[%s5400_s2] sm:$0xff] }
 0x227   :  { %v259_v3 = vpop.f32.mrb[0].mxu1 }
 0x228   :  { %v3469_v4 = vpop.f32.mrb[1].mxu1  ;;  %v260_v6 = vadd.f32 %v259_v3, %v4253_v2 }
 0x229   :  { %v262_v5 = vpop.f32.mrb[2].mxu1  ;;  %v478_v4 = vld [vmem:[%s5400_s2 + $0x8] sm:$0xff] }
 0x22a   :  { %v263_v7 = vadd.f32 %v262_v5, %v4253_v2  ;;  %v3470_v8 = vpop.f32.mrb[3].mxu1 }
 0x22c   :  { %v4257_v9 = vpack.c.bf16 %v263_v7, %v260_v6 }
 0x22e   :  { %304 = vrot.lane.b32.xlu0 %v4257_v9, %s4095_s1 }
 0x232   :  { %681 = vrot.lane.b32.xlu0 %v4202_v14, %s4096_s20 }
 0x236   :  { %688 = vrot.lane.b32.xlu0 %v4253_v2, %s4096_s20 }
 0x2a0   :  { %v305_v26 = vpop.permute.xlu0 %304 }
 0x2a1   :  { %3471 = vmatprep.subr.bf16.mxu0 %v305_v26 }
 0x2a2   :  { %3472 = vmatpush3.bf16.msra.mxu0 %v305_v26  ;;  %v3898_v26 = vld [vmem:[%s5404_s6 + $0x18] sm:$0xff]  }
 0x2a3   :  { %3491 = vmatprep.subr.bf16.mxu0 %v4093_v15 }
 0x2a4   :  { %v682_v11 = vpop.permute.xlu0 %681 }
 0x2a5   :  { %3474 = vmatmul.mubr.msk.bf16.vlgmr.msra.gmra.mrb[4].mxu0 %vm307_vm6, %v4272_v27 }
 0x2a6   :  { %3477 = vmatprep.mubr.msk.bf16.mxu0 %vm307_vm6, %v4277_v28 }
 0x2ad   :  { %3478 = vmatmul.mubr.msk.bf16.gmra.mrb[8].mxu0 %vm307_vm6, %v4287_v29 }
 0x2ae   :  { %3499 = vmatprep.mubr.msk.bf16.mxu0 %vm4094_vm1, %v4093_v15 }
 0x378   :  { %v3475_v31 = vpop.f32.mrb[4].mxu0 }
 0x379   :  { %v354_v34 = vpop.f32.mrb[5].mxu0  ;;  %v387_v37 = vmul.f32 %v3475_v31, %v4296_v30 }
 0x37a   :  { %v3476_v36 = vpop.f32.mrb[6].mxu0  ;;  %v385_v40 = vmul.f32 %v354_v34, %v4306_v33 }
 0x37b   :  { %v388_v38 = vmul.f32 %v3476_v36, %v4301_v32  ;;  %v357_v39 = vpop.f32.mrb[7].mxu0 }
 0x37c   :  { %v386_v41 = vmul.f32 %v357_v39, %v4311_v35 }
 0x37d   :  { %v394_v42 = vpack.c.bf16 %v388_v38, %v387_v37 }
 0x37e   :  { %v393_v43 = vpack.c.bf16 %v386_v41, %v385_v40 }
 0x37f   :  { %v486_v59 = vsel %vm82_vm0, %v394_v42, 0 }
 0x380   :  { %v483_v46 = vsel %vm82_vm0, %v393_v43, 0  ;;  %v3479_v47 = vpop.f32.mrb[8].mxu0 }
 0x381   :  { %3492 = vmatpush3.bf16.xpose.msra.mxu0 %v483_v46  ;;  %v391_v49 = vmul.f32 %v3479_v47, %v4320_v44  ;;  %v370_v50 = vpop.f32.mrb[9].mxu0 }
 0x382   :  { %v389_v52 = vmul.f32 %v370_v50, %v4325_v45  ;;  %v3480_v53 = vpop.f32.mrb[10].mxu0  ;;  %3493 = vmatprep.subr.bf16.mxu0 %v4093_v15 }
 0x383   :  { %v392_v54 = vmul.f32 %v3480_v53, %v4331_v48  ;;  %v373_v55 = vpop.f32.mrb[11].mxu0 }
 0x384   :  { %v390_v56 = vmul.f32 %v373_v55, %v4337_v51 }
 0x385   :  { %v396_v57 = vpack.c.bf16 %v392_v54, %v391_v49 }
 0x386   :  { %v395_v58 = vpack.c.bf16 %v390_v56, %v389_v52 }
 0x387   :  { %v492_v62 = vsel %vm82_vm0, %v396_v57, 0 }
 0x388   :  { %v489_v60 = vsel %vm82_vm0, %v395_v58, 0 }
 0x389   :  { %3494 = vmatpush3.bf16.xpose.msra.mxu0 %v486_v59 }
 0x38a   :  { %3495 = vmatprep.subr.bf16.mxu0 %v4093_v15 }
 0x391   :  { %3496 = vmatpush3.bf16.xpose.msra.mxu0 %v489_v60 }
 0x392   :  { %3497 = vmatprep.subr.bf16.mxu0 %v4093_v15 }
 0x399   :  { %3498 = vmatpush3.bf16.xpose.msra.mxu0 %v492_v62 }
 0x39a   :  { %3527 = vmatprep.subr.bf16.mxu0 %v4093_v15 }
 0x3a0   :  { %3500 = vmatmul.mubr.msk.bf16.vlgmr.msra.gmra.mrb[12].mxu0 %vm82_vm0, %v4257_v9 }
 0x3a1   :  { %3531 = vmatprep.mubr.msk.bf16.mxu0 %vm4094_vm1, %v4093_v15  ;;  %3528 = vmatpush3.bf16.msra.mxu0 %v682_v11  ;;  %v4422_v11 = vld [vmem:[%s5408_s10 + $0x4] ss:$8 sps:$4 sm:$0xff]  }
 0x3a2   :  { %3529 = vmatprep.subr.bf16.mxu0 %v4093_v15 }
 0x473   :  { %v528_v3 = vpop.f32.mrb[12].mxu0 }
 0x474   :  { %v529_v5 = vadd.f32 %v528_v3, %v477_v63  ;;  %v3501_v6 = vpop.f32.mrb[13].mxu0 }
 0x475   :  { %v531_v7 = vpop.f32.mrb[14].mxu0 }
 0x476   :  { %v532_v8 = vadd.f32 %v531_v7, %v478_v4  ;;  %v3502_v10 = vpop.f32.mrb[15].mxu0  ;;  %v536_v14 = vsel %vm535_vm7, %v529_v5, -inf }
 0x477   :  { %537 = vmax.xlane.f32.xlu1 %v536_v14 }
 0x478   :  { %v539_v2 = vsel %vm535_vm7, %v532_v8, -inf }
 0x47b   :  { %540 = vmax.xlane.f32.xlu1 %v539_v2 }
 0x48c   :  { %397 = vrot.lane.b32.xlu1 %v4257_v9, %s4097_s24 }
 0x490   :  { %683 = vrot.lane.b32.xlu1 %v4211_v16, %s4096_s20  ;;  %v3896_v16 = vld [vmem:[%s5404_s6 + $0x8] sm:$0xff]  }
 0x504   :  { %v538_v12 = vpop.xlane.xlu1 %537 }
 0x505   :  { %v542_v18 = vsub.f32 %v529_v5, %v538_v12  ;;  %v689_v12 = vpop.permute.xlu0 %688 }
 0x507   :  { %v544_v9 = vmul.f32 1.442695, %v542_v18 }
 0x508   :  { %v541_v13 = vpop.xlane.xlu1 %540 }
 0x509   :  { %v543_v17 = vsub.f32 %v532_v8, %v541_v13 }
 0x50b   :  { %v546_v20 = vmul.f32 1.442695, %v543_v17 }
 0x50c   :  { %v398_v19 = vpop.permute.xlu1 %397 }
 0x50d   :  { %3481 = vmatprep.subr.bf16.mxu1 %v398_v19  ;;  %3937 = vpow2.f32 %v546_v20 }
 0x50e   :  { %3482 = vmatpush3.bf16.msra.mxu1 %v398_v19  ;;  %3939 = vpow2.f32 %v544_v9 }
 0x50f   :  { %3503 = vmatprep.subr.bf16.mxu1 %v4093_v15 }
 0x510   :  { %v684_v22 = vpop.permute.xlu1 %683 }
 0x511   :  { %3484 = vmatmul.mubr.msk.bf16.vlgmr.msra.gmra.mrb[4].mxu1 %vm307_vm6, %v4272_v27  ;;  %3530 = vmatpush3.bf16.msra.mxu0 %v684_v22 }
 0x512   :  { %3504 = vmatpush3.bf16.msra.mxu1 %v3895_v21  ;;  %3543 = vmatprep.subr.bf16.mxu0 %v4267_v25 }
 0x513   :  { %3505 = vmatprep.subr.bf16.mxu1 %v4093_v15  ;;  %3487 = vmatprep.mubr.msk.bf16.mxu1 %vm307_vm6, %v4277_v28 }
 0x516   :  { %3506 = vmatpush3.bf16.msra.mxu1 %v3896_v16 }
 0x517   :  { %3507 = vmatprep.subr.bf16.mxu1 %v4093_v15  ;;  %v3938_v27 = vpop.eup %3937 }
 0x518   :  { %v3940_v28 = vpop.eup %3939 }
 0x519   :  { %3488 = vmatmul.mubr.msk.bf16.gmra.mrb[8].mxu1 %vm307_vm6, %v4287_v29  ;;  %v548_v31 = vpack.c.bf16 %v3938_v27, %v3940_v28 }
 0x51a   :  { %3508 = vmatpush3.bf16.msra.mxu1 %v3897_v23  ;;  %3511 = vmatprep.mubr.msk.bf16.mxu1 %vm4094_vm1, %v4093_v15 }
 0x51b   :  { %3509 = vmatprep.subr.bf16.mxu1 %v4093_v15 }
 0x51e   :  { %3510 = vmatpush3.bf16.msra.mxu1 %v3898_v26  ;;  %v4439_v26 = vld [vmem:[%s5408_s10 + $0x14] ss:$8 sps:$4 sm:$0xff]  }
 0x51f   :  { %3515 = vmatprep.subr.bf16.mxu1 %v4093_v15 }
 0x521   :  { %3512 = vmatmul.mubr.msk.bf16.vlgmr.msra.gmra.mrb[12].mxu1 %vm535_vm7, %v548_v31 }
 0x522   :  { %3523 = vmatprep.mubr.msk.bf16.mxu1 %vm4094_vm1, %v4093_v15 }
 0x5e4   :  { %v3485_v29 = vpop.f32.mrb[4].mxu1 }
 0x5e5   :  { %v434_v34 = vpop.f32.mrb[5].mxu1  ;;  %v467_v37 = vmul.f32 %v3485_v29, %v4296_v30 }
 0x5e6   :  { %v3486_v36 = vpop.f32.mrb[6].mxu1  ;;  %v465_v40 = vmul.f32 %v434_v34, %v4306_v33 }
 0x5e7   :  { %v468_v38 = vmul.f32 %v3486_v36, %v4301_v32  ;;  %v437_v39 = vpop.f32.mrb[7].mxu1 }
 0x5e8   :  { %v466_v41 = vmul.f32 %v437_v39, %v4311_v35 }
 0x5e9   :  { %v474_v42 = vpack.c.bf16 %v468_v38, %v467_v37 }
 0x5ea   :  { %v473_v43 = vpack.c.bf16 %v466_v41, %v465_v40 }
 0x5ec   :  { %v3489_v46 = vpop.f32.mrb[8].mxu1  ;;  %3516 = vmatpush3.bf16.msra.mxu1 %v473_v43 }
 0x5ed   :  { %v450_v47 = vpop.f32.mrb[9].mxu1  ;;  %3517 = vmatprep.subr.bf16.mxu1 %v4093_v15  ;;  %v471_v50 = vmul.f32 %v3489_v46, %v4320_v44  ;;  %v4490_v46 = vld [vmem:[%s5405_s7 + $0x20] sm:$0xff]  }
 0x5ee   :  { %v3490_v49 = vpop.f32.mrb[10].mxu1  ;;  %v469_v32 = vmul.f32 %v450_v47, %v4325_v45  ;;  %v4495_v47 = vld [vmem:[%s5405_s7 + $0x28] sm:$0xff]  }
 0x5ef   :  { %v472_v52 = vmul.f32 %v3490_v49, %v4331_v48  ;;  %v453_v30 = vpop.f32.mrb[11].mxu1  ;;  %v4506_v49 = vld [vmem:[%s5405_s7 + $0x30] sm:$0xff]  }
 0x5f0   :  { %v470_v53 = vmul.f32 %v453_v30, %v4337_v51  ;;  %3518 = vmatpush3.bf16.msra.mxu1 %v474_v42  ;;  %v4527_v30 = vld [vmem:[%s5406_s8] sm:$0xff] }
 0x5f1   :  { %v476_v33 = vpack.c.bf16 %v472_v52, %v471_v50  ;;  %3519 = vmatprep.subr.bf16.mxu1 %v4093_v15  ;;  %v4511_v50 = vld [vmem:[%s5405_s7 + $0x38] sm:$0xff]   ;;  %v4522_v52 = vld [vmem:[%s5406_s8 + $0x10] sm:$0xff] }
 0x5f2   :  { %v475_v35 = vpack.c.bf16 %v470_v53, %v469_v32  ;;  %v4532_v53 = vld [vmem:[%s5406_s8 + $0x18] sm:$0xff] }
 0x5f4   :  { %v618_v54 = vpop.f32.mrb[12].mxu1  ;;  %3520 = vmatpush3.bf16.msra.mxu1 %v475_v35 }
 0x5f5   :  { %v619_v55 = vadd.f32 1e-30, %v618_v54  ;;  %v3513_v56 = vpop.f32.mrb[13].mxu1  ;;  %3521 = vmatprep.subr.bf16.mxu1 %v4093_v15  ;;  %v4538_v54 = vld [vmem:[%s5406_s8 + $0x8] sm:$0xff] }
 0x5f6   :  { %v621_v57 = vpop.f32.mrb[14].mxu1 }
 0x5f7   :  { %3941 = vrcp.f32 %v619_v55  ;;  %v622_v44 = vadd.f32 1e-30, %v621_v57  ;;  %v3514_v48 = vpop.f32.mrb[15].mxu1 }
 0x5f8   :  { %3522 = vmatpush3.bf16.msra.mxu1 %v476_v33 }
 0x5f9   :  { %3943 = vrcp.f32 %v622_v44  ;;  %3535 = vmatprep.subr.bf16.mxu1 %v4093_v15 }
 0x601   :  { %v3942_v45 = vpop.eup %3941 }
 0x602   :  { %v627_v51 = vmul.f32 %v3942_v45, %v619_v55 }
 0x603   :  { %v3944_v58 = vpop.eup %3943 }
 0x604   :  { %v629_v59 = vsub.f32 2.0, %v627_v51  ;;  %v628_v60 = vmul.f32 %v3944_v58, %v622_v44 }
 0x606   :  { %v631_v62 = vmul.f32 %v3942_v45, %v629_v59  ;;  %v630_v63 = vsub.f32 2.0, %v628_v60  ;;  %v4551_v59 = vld [vmem:[%s5406_s8 + $0x20] sm:$0xff] }
 0x608   :  { %v632_v3 = vmul.f32 %v3944_v58, %v630_v63  ;;  %v633_v4 = vmul.f32 %v3940_v28, %v631_v62  ;;  %v4468_v28 = vld [vmem:[%s5405_s7 + $0x18] sm:$0xff]   ;;  %v4546_v58 = vld [vmem:[%s5406_s8 + $0x30] sm:$0xff] }
 0x609   :  { %v4557_v63 = vld [vmem:[%s5406_s8 + $0x38] sm:$0xff] }
 0x60a   :  { %v634_v5 = vmul.f32 %v3938_v27, %v632_v3  ;;  %v4457_v27 = vld [vmem:[%s5405_s7 + $0x10] sm:$0xff]  }
 0x60c   :  { %v635_v6 = vpack.c.bf16 %v634_v5, %v633_v4  ;;  %v4563_v5 = vld [vmem:[%s5406_s8 + $0x28] sm:$0xff] }
 0x60e   :  { %3524 = vmatmul.mubr.msk.bf16.vlgmr.msra.gmra.mrb[16].mxu1 %vm535_vm7, %v635_v6 }
 0x60f   :  { %3539 = vmatprep.mubr.msk.bf16.mxu1 %vm4094_vm1, %v4093_v15  ;;  %3536 = vmatpush3.bf16.msra.mxu1 %v4422_v11 }
 0x610   :  { %3537 = vmatprep.subr.bf16.mxu1 %v4093_v15 }
 0x613   :  { %3538 = vmatpush3.bf16.msra.mxu1 %v4439_v26 }
 0x6e1   :  { %v673_v7 = vpop.f32.mrb[16].mxu1 }
 0x6e2   :  { %v3525_v8 = vpop.f32.mrb[17].mxu1 }
 0x6e3   :  { %v676_v10 = vpop.f32.mrb[18].mxu1 }
 0x6e4   :  { %v680_v14 = vpack.c.bf16 %v676_v10, %v673_v7  ;;  %v3526_v2 = vpop.f32.mrb[19].mxu1 }
 0x6e6   :  { %3532 = vmatmul.mubr.msk.bf16.vlgmr.msra.gmra.mrb[16].mxu0 %vm82_vm0, %v680_v14 }
 0x6e7   :  { %3544 = vmatpush3.bf16.msra.mxu0 %v4267_v25 }
 0x6e8   :  { %3545 = vmatprep.subr.bf16.mxu0 %v4265_v24 }
 0x6eb   :  { %3546 = vmatpush3.bf16.msra.mxu0 %v4265_v24 }
 0x6ec   :  { %3583 = vmatprep.subr.bf16.mxu0 %v4093_v15 }
 0x7b9   :  { %v728_v13 = vpop.f32.mrb[16].mxu0 }
 0x7ba   :  { %v729_v17 = vadd.f32 %v728_v13, %v689_v12  ;;  %v3533_v18 = vpop.f32.mrb[17].mxu0 }
 0x7bb   :  { %v731_v19 = vpop.f32.mrb[18].mxu0 }
 0x7bc   :  { %v4427_v20 = vadd.f32 %v729_v17, %v4184_v0  ;;  %v732_v21 = vadd.f32 %v731_v19, %v689_v12  ;;  %v3534_v9 = vpop.f32.mrb[19].mxu0  ;;  %v4447_v0 = vld [vmem:[%s5405_s7] sm:$0xff]  }
 0x7bd   :  { %3547 = vmatprep.mubr.msk.bf16.mxu0 %vm82_vm0, %v4447_v0 }
 0x7be   :  { %v4430_v22 = vadd.f32 %v732_v21, %v4189_v1  ;;  %v739_v16 = vsel %vm82_vm0, %v4427_v20, 0.0  ;;  %v4452_v1 = vld [vmem:[%s5405_s7 + $0x8] sm:$0xff]  }
 0x7bf   :  { %740 = vadd.xlane.f32.xlu1 %v739_v16  ;;  %3548 = vmatmul.mubr.msk.bf16.vlgmr.msra.gmra.mrb[20].mxu0 %vm82_vm0, %v4452_v1 }
 0x7c0   :  { %v742_v23 = vsel %vm82_vm0, %v4430_v22, 0.0  ;;  %3551 = vmatprep.mubr.msk.bf16.mxu0 %vm82_vm0, %v4457_v27 }
 0x7c1   :  { %743 = vadd.xlane.f32.xlu0 %v742_v23 }
 0x7c7   :  { %3552 = vmatmul.mubr.msk.bf16.gmra.mrb[24].mxu0 %vm82_vm0, %v4468_v28 }
 0x7c8   :  { %3555 = vmatprep.mubr.msk.bf16.mxu0 %vm82_vm0, %v4490_v46 }
 0x7cf   :  { %3556 = vmatmul.mubr.msk.bf16.gmra.mrb[28].mxu0 %vm82_vm0, %v4495_v47 }
 0x7d0   :  { %1085 = vrot.lane.b32.xlu1 %v4267_v25, %s4095_s1  ;;  %3559 = vmatprep.mubr.msk.bf16.mxu0 %vm82_vm0, %v4506_v49 }
 0x7d7   :  { %3560 = vmatmul.mubr.msk.bf16.gmra.mrb[32].mxu0 %vm82_vm0, %v4511_v50 }
 0x7d8   :  { %3599 = vmatprep.mubr.msk.bf16.mxu0 %vm4094_vm1, %v4093_v15 }
 0x84c   :  { %v741_v31 = vpop.xlane.xlu1 %740 }
 0x84d   :  { %v745_v29 = vmul.f32 0.03125, %v741_v31 }
 0x84e   :  { %v744_v34 = vpop.xlane.xlu0 %743 }
 0x84f   :  { %v4473_v36 = vsub.f32 %v4427_v20, %v745_v29  ;;  %v746_v37 = vmul.f32 0.03125, %v744_v34 }
 0x850   :  { %v4475_v38 = vpop.permute.xlu1 %1085 }
 0x851   :  { %v4478_v39 = vsub.f32 %v4430_v22, %v746_v37  ;;  %3563 = vmatprep.subr.bf16.mxu1 %v4475_v38  ;;  %v749_v40 = vmul.f32 %v4473_v36, %v4473_v36 }
 0x853   :  { %v751_v41 = vsel %vm82_vm0, %v749_v40, 0.0  ;;  %v750_v42 = vmul.f32 %v4478_v39, %v4478_v39 }
 0x854   :  { %752 = vadd.xlane.f32.xlu0 %v751_v41 }
 0x855   :  { %v754_v43 = vsel %vm82_vm0, %v750_v42, 0.0 }
 0x858   :  { %755 = vadd.xlane.f32.xlu0 %v754_v43 }
 0x86e   :  { %1087 = vrot.lane.b32.xlu0 %v4265_v24, %s4095_s1 }
 0x892   :  { %v3549_v32 = vpop.f32.mrb[20].mxu0 }
 0x893   :  { %v1061_v33 = vmul.f32 %v3549_v32, %v4522_v52  ;;  %v996_v35 = vpop.f32.mrb[21].mxu0 }
 0x894   :  { %v1059_v55 = vmul.f32 %v996_v35, %v4527_v30  ;;  %v3550_v56 = vpop.f32.mrb[22].mxu0 }
 0x895   :  { %v1062_v57 = vmul.f32 %v3550_v56, %v4532_v53  ;;  %v999_v44 = vpop.f32.mrb[23].mxu0 }
 0x896   :  { %v1060_v48 = vmul.f32 %v999_v44, %v4538_v54 }
 0x897   :  { %v1076_v45 = vpack.c.bf16 %v1062_v57, %v1061_v33 }
 0x898   :  { %v1075_v51 = vpack.c.bf16 %v1060_v48, %v1059_v55  ;;  %v3145_v48 = vld [vmem:[%s5411_s13 + $0x1] ss:$0 sm:$0xff] }
 0x899   :  { %v1222_v12 = vsel %vm82_vm0, %v1076_v45, 0 }
 0x89a   :  { %v1219_v60 = vsel %vm82_vm0, %v1075_v51, 0  ;;  %v3553_v62 = vpop.f32.mrb[24].mxu0 }
 0x89b   :  { %3584 = vmatpush3.bf16.xpose.msra.mxu0 %v1219_v60  ;;  %v1065_v3 = vmul.f32 %v3553_v62, %v4546_v58  ;;  %v1012_v4 = vpop.f32.mrb[25].mxu0  ;;  %v787_v60 = vmul.f32 %v3145_v48, %v4473_v36 }
 0x89c   :  { %3585 = vmatprep.subr.bf16.mxu0 %v4093_v15  ;;  %v1063_v6 = vmul.f32 %v1012_v4, %v4551_v59  ;;  %v3554_v7 = vpop.f32.mrb[26].mxu0 }
 0x89d   :  { %v1066_v8 = vmul.f32 %v3554_v7, %v4557_v63  ;;  %v1015_v10 = vpop.f32.mrb[27].mxu0  ;;  %v3146_v7 = vld [vmem:[%s5411_s13 + $0x4] ss:$0 sm:$0xff] }
 0x89e   :  { %v1064_v14 = vmul.f32 %v1015_v10, %v4563_v5 }
 0x89f   :  { %v1078_v2 = vpack.c.bf16 %v1066_v8, %v1065_v3  ;;  %v788_v3 = vmul.f32 %v3145_v48, %v4478_v39  ;;  %v4623_v39 = vld [vmem:[%s5406_s8 + $0x48] sm:$0xff] }
 0x8a0   :  { %v1077_v13 = vpack.c.bf16 %v1064_v14, %v1063_v6 }
 0x8a1   :  { %v1228_v21 = vsel %vm82_vm0, %v1078_v2, 0 }
 0x8a2   :  { %v1225_v17 = vsel %vm82_vm0, %v1077_v13, 0 }
 0x8a3   :  { %3586 = vmatpush3.bf16.xpose.msra.mxu0 %v1222_v12 }
 0x8a4   :  { %3587 = vmatprep.subr.bf16.mxu0 %v4093_v15 }
 0x8ab   :  { %3588 = vmatpush3.bf16.xpose.msra.mxu0 %v1225_v17 }
 0x8ac   :  { %3589 = vmatprep.subr.bf16.mxu0 %v4093_v15 }
 0x8b3   :  { %3590 = vmatpush3.bf16.xpose.msra.mxu0 %v1228_v21  ;;  %v4633_v21 = vld [vmem:[%s5406_s8 + $0x70] sm:$0xff] }
 0x8b4   :  { %3591 = vmatprep.subr.bf16.mxu0 %v4093_v15 }
 0x8e1   :  { %v753_v18 = vpop.xlane.xlu0 %752 }
 0x8e2   :  { %v757_v19 = vmul.f32 0.032258064, %v753_v18 }
 0x8e4   :  { %3945 = vrsqrt.f32 %v757_v19  ;;  %vm761_vm8 = vcmp.eq.f32.partialorder %v757_v19, inf  ;;  %v764_v29 = vand.u32 2147483648, %v757_v19  ;;  %vm763_vm9 = vcmp.eq.f32.partialorder %v757_v19, 0.0 }
 0x8e5   :  { %v756_v9 = vpop.xlane.xlu0 %755 }
 0x8e6   :  { %v758_v16 = vmul.f32 0.032258064, %v756_v9 }
 0x8e8   :  { %3947 = vrsqrt.f32 %v758_v16  ;;  %vm768_vm10 = vcmp.eq.f32.partialorder %v758_v16, inf  ;;  %v771_v43 = vand.u32 2147483648, %v758_v16  ;;  %vm770_vm11 = vcmp.eq.f32.partialorder %v758_v16, 0.0 }
 0x8e9   :  { %v1088_v12 = vpop.permute.xlu0 %1087 }
 0x8ee   :  { %v3946_v23 = vpop.eup %3945 }
 0x8ef   :  { %v760_v31 = vmul.f32 %v3946_v23, %v757_v19 }
 0x8f1   :  { %v762_v34 = vsel %vm761_vm8, %v757_v19, %v760_v31  ;;  %v4644_v31 = vld [vmem:[%s5406_s8 + $0x78] sm:$0xff] }
 0x8f2   :  { %v3948_v37 = vpop.eup %3947  ;;  %v765_v40 = vsel %vm763_vm9, %v764_v29, %v762_v34 }
 0x8f3   :  { %v773_v41 = vadd.f32 1e-06, %v765_v40  ;;  %v767_v42 = vmul.f32 %v3948_v37, %v758_v16  ;;  %v4650_v37 = vld [vmem:[%s5406_s8 + $0x68] sm:$0xff] }
 0x8f5   :  { %3949 = vrcp.f32 %v773_v41  ;;  %v769_v32 = vsel %vm768_vm10, %v758_v16, %v767_v42  ;;  %v4639_v16 = vld [vmem:[%s5406_s8 + $0x60] sm:$0xff] }
 0x8f6   :  { %v772_v33 = vsel %vm770_vm11, %v771_v43, %v769_v32 }
 0x8f7   :  { %v774_v35 = vadd.f32 1e-06, %v772_v33 }
 0x8f9   :  { %3951 = vrcp.f32 %v774_v35 }
 0x8ff   :  { %v3950_v55 = vpop.eup %3949 }
 0x900   :  { %v777_v56 = vmul.f32 %v3950_v55, %v773_v41 }
 0x902   :  { %v779_v57 = vsub.f32 2.0, %v777_v56 }
 0x903   :  { %v3952_v44 = vpop.eup %3951 }
 0x904   :  { %v778_v45 = vmul.f32 %v3952_v44, %v774_v35  ;;  %v781_v51 = vmul.f32 %v3950_v55, %v779_v57  ;;  %v802_v57 = vld [vmem:[%s5408_s10 + $0x24] sm:$0x1] }
 0x906   :  { %v780_v62 = vsub.f32 2.0, %v778_v45  ;;  %v789_v6 = vmul.f32 %v787_v60, %v781_v51 }
 0x908   :  { %v782_v4 = vmul.f32 %v3952_v44, %v780_v62  ;;  %v795_v10 = vadd.f32 %v3146_v7, %v789_v6  ;;  %v803_v44 = vunpack.c.l.bf16 %v802_v57 }
 0x90a   :  { %v790_v8 = vmul.f32 %v788_v3, %v782_v4  ;;  %v4664_v48 = vrot.slane %v803_v44, %v4245_v61 }
 0x90c   :  { %v796_v14 = vadd.f32 %v3146_v7, %v790_v8  ;;  %v3909_v7 = vld [vmem:[%s5407_s9] sm:$0xff]   ;;  %v3910_v8 = vld [vmem:[%s5407_s9 + $0x8] sm:$0xff]  }
 0x90e   :  { %v797_v2 = vpack.c.bf16 %v796_v14, %v795_v10  ;;  %v3911_v10 = vld [vmem:[%s5407_s9 + $0x10] sm:$0xff]   ;;  %v1213_v14 = vld [vmem:[%s5401_s3] sm:$0xff] }
 0x910   :  { %3540 = vmatmul.mubr.msk.bf16.vlgmr.msra.gmra.mrb[20].mxu1 %vm82_vm0, %v797_v2 }
 0x911   :  { %3564 = vmatpush3.bf16.msra.mxu1 %v4475_v38  ;;  %3567 = vmatprep.mubr.msk.bf16.mxu1 %vm82_vm0, %v4447_v0  ;;  %v4607_v0 = vld [vmem:[%s5406_s8 + $0x50] sm:$0xff] }
 0x912   :  { %3565 = vmatprep.subr.bf16.mxu1 %v1088_v12 }
 0x915   :  { %3566 = vmatpush3.bf16.msra.mxu1 %v1088_v12  ;;  %v1214_v12 = vld [vmem:[%s5401_s3 + $0x8] sm:$0xff] }
 0x916   :  { %3603 = vmatprep.subr.bf16.mxu1 %v4093_v15 }
 0x918   :  { %3568 = vmatmul.mubr.msk.bf16.vlgmr.msra.gmra.mrb[24].mxu1 %vm82_vm0, %v4452_v1  ;;  %v4612_v1 = vld [vmem:[%s5406_s8 + $0x40] sm:$0xff] }
 0x919   :  { %3571 = vmatprep.mubr.msk.bf16.mxu1 %vm82_vm0, %v4457_v27  ;;  %v3557_v27 = vpop.f32.mrb[28].mxu0  ;;  %3604 = vmatpush3.bf16.msra.mxu1 %v3909_v7 }
 0x91a   :  { %v1069_v36 = vmul.f32 %v3557_v27, %v4607_v0  ;;  %v1028_v38 = vpop.f32.mrb[29].mxu0  ;;  %3605 = vmatprep.subr.bf16.mxu1 %v4093_v15 }
 0x91d   :  { %3606 = vmatpush3.bf16.msra.mxu1 %v3910_v8 }
 0x91e   :  { %3607 = vmatprep.subr.bf16.mxu1 %v4093_v15 }
 0x920   :  { %3572 = vmatmul.mubr.msk.bf16.gmra.mrb[28].mxu1 %vm82_vm0, %v4468_v28  ;;  %v4617_v28 = vld [vmem:[%s5406_s8 + $0x58] sm:$0xff] }
 0x921   :  { %3575 = vmatprep.mubr.msk.bf16.mxu1 %vm82_vm0, %v4490_v46  ;;  %v1067_v46 = vmul.f32 %v1028_v38, %v4612_v1  ;;  %3608 = vmatpush3.bf16.msra.mxu1 %v3911_v10 }
 0x922   :  { %3609 = vmatprep.subr.bf16.mxu1 %v4093_v15 }
 0x928   :  { %3576 = vmatmul.mubr.msk.bf16.gmra.mrb[32].mxu1 %vm82_vm0, %v4495_v47  ;;  %v3558_v47 = vpop.f32.mrb[30].mxu0 }
 0x929   :  { %3579 = vmatprep.mubr.msk.bf16.mxu1 %vm82_vm0, %v4506_v49  ;;  %v1070_v49 = vmul.f32 %v3558_v47, %v4617_v28 }
 0x92b   :  { %v1080_v17 = vpack.c.bf16 %v1070_v49, %v1069_v36  ;;  %v3912_v49 = vld [vmem:[%s5407_s9 + $0x18] sm:$0xff]  }
 0x92c   :  { %3610 = vmatpush3.bf16.msra.mxu1 %v3912_v49 }
 0x92d   :  { %v1234_v9 = vsel %vm82_vm0, %v1080_v17, 0  ;;  %3611 = vmatprep.subr.bf16.mxu1 %v4093_v15  ;;  %v3915_v17 = vld [vmem:[%s5407_s9 + $0x30] sm:$0xff]  }
 0x930   :  { %3580 = vmatmul.mubr.msk.bf16.gmra.mrb[36].mxu1 %vm82_vm0, %v4511_v50  ;;  %v1031_v50 = vpop.f32.mrb[31].mxu0 }
 0x931   :  { %3619 = vmatprep.mubr.msk.bf16.mxu1 %vm4094_vm1, %v4093_v15  ;;  %v1068_v13 = vmul.f32 %v1031_v50, %v4623_v39  ;;  %v3561_v23 = vpop.f32.mrb[32].mxu0  ;;  %v3913_v50 = vld [vmem:[%s5407_s9 + $0x20] sm:$0xff]  }
 0x932   :  { %v1073_v29 = vmul.f32 %v3561_v23, %v4633_v21  ;;  %v1044_v34 = vpop.f32.mrb[33].mxu0  ;;  %3612 = vmatpush3.bf16.msra.mxu1 %v3913_v50 }
 0x933   :  { %v1079_v18 = vpack.c.bf16 %v1068_v13, %v1067_v46  ;;  %v1071_v40 = vmul.f32 %v1044_v34, %v4639_v16  ;;  %v3562_v41 = vpop.f32.mrb[34].mxu0  ;;  %3613 = vmatprep.subr.bf16.mxu1 %v4093_v15  ;;  %v3914_v13 = vld [vmem:[%s5407_s9 + $0x28] sm:$0xff]  }
 0x934   :  { %v1074_v42 = vmul.f32 %v3562_v41, %v4644_v31  ;;  %v1047_v43 = vpop.f32.mrb[35].mxu0 }
 0x935   :  { %v1231_v19 = vsel %vm82_vm0, %v1079_v18, 0  ;;  %v1072_v32 = vmul.f32 %v1047_v43, %v4650_v37  ;;  %v3916_v18 = vld [vmem:[%s5407_s9 + $0x38] sm:$0xff]  }
 0x936   :  { %3592 = vmatpush3.bf16.xpose.msra.mxu0 %v1231_v19  ;;  %v1082_v33 = vpack.c.bf16 %v1074_v42, %v1073_v29  ;;  %3614 = vmatpush3.bf16.msra.mxu1 %v3914_v13 }
 0x937   :  { %3593 = vmatprep.subr.bf16.mxu0 %v4093_v15  ;;  %v1081_v35 = vpack.c.bf16 %v1072_v32, %v1071_v40  ;;  %3615 = vmatprep.subr.bf16.mxu1 %v4093_v15 }
 0x938   :  { %v1240_v56 = vsel %vm82_vm0, %v1082_v33, 0 }
 0x939   :  { %v1237_v55 = vsel %vm82_vm0, %v1081_v35, 0 }
 0x93a   :  { %3616 = vmatpush3.bf16.msra.mxu1 %v3915_v17 }
 0x93b   :  { %3617 = vmatprep.subr.bf16.mxu1 %v4093_v15 }
 0x93e   :  { %3594 = vmatpush3.bf16.xpose.msra.mxu0 %v1234_v9  ;;  %3618 = vmatpush3.bf16.msra.mxu1 %v3916_v18 }
 0x93f   :  { %3595 = vmatprep.subr.bf16.mxu0 %v4093_v15  ;;  %3623 = vmatprep.subr.bf16.mxu1 %v4093_v15 }
 0x946   :  { %3596 = vmatpush3.bf16.xpose.msra.mxu0 %v1237_v55 }
 0x947   :  { %3597 = vmatprep.subr.bf16.mxu0 %v4093_v15 }
 0x94e   :  { %3598 = vmatpush3.bf16.xpose.msra.mxu0 %v1240_v56 }
 0x94f   :  { %3643 = vmatprep.subr.bf16.mxu0 %v4093_v15 }
 0x9e3   :  { %v857_v45 = vpop.f32.mrb[20].mxu1 }
 0x9e4   :  { %v3541_v51 = vpop.f32.mrb[21].mxu1  ;;  %v858_v62 = vadd.f32 %v857_v45, %v4664_v48 }
 0x9e5   :  { %v860_v60 = vpop.f32.mrb[22].mxu1 }
 0x9e6   :  { %v861_v3 = vadd.f32 %v860_v60, %v4664_v48  ;;  %v3542_v4 = vpop.f32.mrb[23].mxu1 }
 0x9e8   :  { %v1212_v6 = vpack.c.bf16 %v861_v3, %v858_v62 }
 0x9ea   :  { %3600 = vmatmul.mubr.msk.bf16.vlgmr.msra.gmra.mrb[36].mxu0 %vm82_vm0, %v1212_v6 }
 0x9eb   :  { %3647 = vmatprep.mubr.msk.bf16.mxu0 %vm4094_vm1, %v4093_v15  ;;  %v3569_v19 = vpop.f32.mrb[24].mxu1 }
 0x9ec   :  { %v1190_v9 = vmul.f32 %v3569_v19, %v4522_v52  ;;  %v1125_v23 = vpop.f32.mrb[25].mxu1 }
 0x9ed   :  { %v1188_v29 = vmul.f32 %v1125_v23, %v4527_v30  ;;  %v3570_v34 = vpop.f32.mrb[26].mxu1 }
 0x9ee   :  { %v1191_v40 = vmul.f32 %v3570_v34, %v4532_v53  ;;  %v1128_v41 = vpop.f32.mrb[27].mxu1 }
 0x9ef   :  { %v1189_v42 = vmul.f32 %v1128_v41, %v4538_v54 }
 0x9f0   :  { %v1205_v32 = vpack.c.bf16 %v1191_v40, %v1190_v9 }
 0x9f1   :  { %v1204_v55 = vpack.c.bf16 %v1189_v42, %v1188_v29 }
 0x9f3   :  { %v3573_v43 = vpop.f32.mrb[28].mxu1 }
 0x9f4   :  { %v1194_v33 = vmul.f32 %v3573_v43, %v4546_v58  ;;  %v1141_v35 = vpop.f32.mrb[29].mxu1 }
 0x9f5   :  { %v1192_v56 = vmul.f32 %v1141_v35, %v4551_v59  ;;  %v3574_v57 = vpop.f32.mrb[30].mxu1 }
 0x9f6   :  { %v1195_v52 = vmul.f32 %v3574_v57, %v4557_v63  ;;  %v1144_v44 = vpop.f32.mrb[31].mxu1 }
 0x9f7   :  { %v1193_v30 = vmul.f32 %v1144_v44, %v4563_v5 }
 0x9f8   :  { %v1207_v51 = vpack.c.bf16 %v1195_v52, %v1194_v33 }
 0x9f9   :  { %v1206_v54 = vpack.c.bf16 %v1193_v30, %v1192_v56 }
 0x9fb   :  { %v3577_v45 = vpop.f32.mrb[32].mxu1 }
 0x9fc   :  { %v1198_v53 = vmul.f32 %v3577_v45, %v4607_v0  ;;  %v1157_v60 = vpop.f32.mrb[33].mxu1 }
 0x9fd   :  { %v1196_v62 = vmul.f32 %v1157_v60, %v4612_v1  ;;  %v3578_v3 = vpop.f32.mrb[34].mxu1 }
 0x9fe   :  { %v1199_v58 = vmul.f32 %v3578_v3, %v4617_v28  ;;  %v1160_v4 = vpop.f32.mrb[35].mxu1 }
 0x9ff   :  { %v1197_v59 = vmul.f32 %v1160_v4, %v4623_v39 }
 0xa00   :  { %v1209_v6 = vpack.c.bf16 %v1199_v58, %v1198_v53 }
 0xa01   :  { %v1208_v7 = vpack.c.bf16 %v1197_v59, %v1196_v62 }
 0xa03   :  { %v3581_v63 = vpop.f32.mrb[36].mxu1 }
 0xa04   :  { %v1202_v8 = vmul.f32 %v3581_v63, %v4633_v21  ;;  %v1173_v5 = vpop.f32.mrb[37].mxu1 }
 0xa05   :  { %v1200_v10 = vmul.f32 %v1173_v5, %v4639_v16 }
 0xabd   :  { %v1276_v2 = vpop.f32.mrb[36].mxu0 }
 0xabe   :  { %v4689_v27 = vadd.f32 %v1276_v2, %v1213_v14  ;;  %v3601_v36 = vpop.f32.mrb[37].mxu0  ;;  %v3582_v14 = vpop.f32.mrb[38].mxu1 }
 0xabf   :  { %v1279_v38 = vpop.f32.mrb[38].mxu0  ;;  %v1203_v0 = vmul.f32 %v3582_v14, %v4644_v31  ;;  %v1176_v2 = vpop.f32.mrb[39].mxu1 }
 0xac0   :  { %v4691_v46 = vadd.f32 %v1279_v38, %v1214_v12  ;;  %1283 = vmax.xlane.f32.xlu1 %v4689_v27  ;;  %v3602_v47 = vpop.f32.mrb[39].mxu0  ;;  %v1201_v1 = vmul.f32 %v1176_v2, %v4650_v37 }
 0xac1   :  { %v1211_v12 = vpack.c.bf16 %v1203_v0, %v1202_v8 }
 0xac2   :  { %1285 = vmax.xlane.f32.xlu0 %v4691_v46  ;;  %v1210_v36 = vpack.c.bf16 %v1201_v1, %v1200_v10  ;;  %v3917_v1 = vld [vmem:[%s5409_s11] sm:$0xff]  }
 0xad1   :  { %1452 = vrot.lane.b32.xlu1 %v4422_v11, %s4095_s1 }
 0xad5   :  { %1459 = vrot.lane.b32.xlu1 %v4664_v48, %s4095_s1 }
 0xad8   :  { %1454 = vrot.lane.b32.xlu0 %v4439_v26, %s4095_s1 }
 0xb4d   :  { %v1284_v28 = vpop.xlane.xlu1 %1283 }
 0xb4e   :  { %v1287_v38 = vsub.f32 %v4689_v27, %v1284_v28 }
 0xb4f   :  { %v1286_v39 = vpop.xlane.xlu0 %1285 }
 0xb50   :  { %v1289_v47 = vmul.f32 1.442695, %v1287_v38  ;;  %v1288_v49 = vsub.f32 %v4691_v46, %v1286_v39 }
 0xb51   :  { %v1453_v31 = vpop.permute.xlu1 %1452 }
 0xb52   :  { %v1291_v50 = vmul.f32 1.442695, %v1288_v49  ;;  %3953 = vpow2.f32 %v1289_v47  ;;  %3644 = vmatpush3.bf16.msra.mxu0 %v1453_v31 }
 0xb53   :  { %3645 = vmatprep.subr.bf16.mxu0 %v4093_v15 }
 0xb54   :  { %3955 = vpow2.f32 %v1291_v50 }
 0xb55   :  { %v1460_v45 = vpop.permute.xlu1 %1459 }
 0xb5c   :  { %v3954_v21 = vpop.eup %3953 }
 0xb5e   :  { %v3956_v16 = vpop.eup %3955 }
 0xb5f   :  { %v1293_v13 = vpack.c.bf16 %v3956_v16, %v3954_v21 }
 0xb61   :  { %3620 = vmatmul.mubr.bf16.vlgmr.msra.gmra.mrb[40].mxu1 %v1293_v13 }
 0xb62   :  { %3624 = vmatpush3.bf16.msra.mxu1 %v1204_v55  ;;  %3639 = vmatprep.mubr.msk.bf16.mxu1 %vm4094_vm1, %v4093_v15  ;;  %v1455_v55 = vpop.permute.xlu0 %1454 }
 0xb63   :  { %3625 = vmatprep.subr.bf16.mxu1 %v4093_v15  ;;  %3646 = vmatpush3.bf16.msra.mxu0 %v1455_v55 }
 0xb64   :  { %3659 = vmatprep.subr.bf16.mxu0 %v4093_v15 }
 0xb66   :  { %3626 = vmatpush3.bf16.msra.mxu1 %v1205_v32 }
 0xb67   :  { %3627 = vmatprep.subr.bf16.mxu1 %v4093_v15 }
 0xb6a   :  { %3628 = vmatpush3.bf16.msra.mxu1 %v1206_v54 }
 0xb6b   :  { %3629 = vmatprep.subr.bf16.mxu1 %v4093_v15 }
 0xb6e   :  { %3630 = vmatpush3.bf16.msra.mxu1 %v1207_v51 }
 0xb6f   :  { %3631 = vmatprep.subr.bf16.mxu1 %v4093_v15 }
 0xb72   :  { %3632 = vmatpush3.bf16.msra.mxu1 %v1208_v7 }
 0xb73   :  { %3633 = vmatprep.subr.bf16.mxu1 %v4093_v15 }
 0xb76   :  { %3634 = vmatpush3.bf16.msra.mxu1 %v1209_v6 }
 0xb77   :  { %3635 = vmatprep.subr.bf16.mxu1 %v4093_v15 }
 0xb7a   :  { %3636 = vmatpush3.bf16.msra.mxu1 %v1210_v36 }
 0xb7b   :  { %3637 = vmatprep.subr.bf16.mxu1 %v4093_v15 }
 0xb7e   :  { %3638 = vmatpush3.bf16.msra.mxu1 %v1211_v12  ;;  %v3918_v12 = vld [vmem:[%s5409_s11 + $0x8] sm:$0xff]  }
 0xb7f   :  { %3651 = vmatprep.subr.bf16.mxu1 %v4093_v15 }
 0xc34   :  { %v1392_v37 = vpop.f32.mrb[40].mxu1 }
 0xc35   :  { %v1393_v27 = vadd.f32 1e-30, %v1392_v37  ;;  %v3621_v46 = vpop.f32.mrb[41].mxu1 }
 0xc36   :  { %v1395_v17 = vpop.f32.mrb[42].mxu1 }
 0xc37   :  { %3957 = vrcp.f32 %v1393_v27  ;;  %v1396_v18 = vadd.f32 1e-30, %v1395_v17  ;;  %v3622_v19 = vpop.f32.mrb[43].mxu1 }
 0xc39   :  { %3959 = vrcp.f32 %v1396_v18 }
 0xc41   :  { %v3958_v9 = vpop.eup %3957 }
 0xc42   :  { %v1401_v23 = vmul.f32 %v3958_v9, %v1393_v27 }
 0xc43   :  { %v3960_v29 = vpop.eup %3959 }
 0xc44   :  { %v1403_v34 = vsub.f32 2.0, %v1401_v23  ;;  %v1402_v40 = vmul.f32 %v3960_v29, %v1396_v18  ;;  %v3184_v23 = vld [vmem:[%s5411_s13 + $0x2] ss:$0 sm:$0xff] }
 0xc46   :  { %v1405_v41 = vmul.f32 %v3958_v9, %v1403_v34  ;;  %v1404_v42 = vsub.f32 2.0, %v1402_v40 }
 0xc48   :  { %v1406_v43 = vmul.f32 %v3960_v29, %v1404_v42  ;;  %v1407_v32 = vmul.f32 %v3954_v21, %v1405_v41 }
 0xc4a   :  { %v1408_v33 = vmul.f32 %v3956_v16, %v1406_v43 }
 0xc4c   :  { %v1409_v35 = vpack.c.bf16 %v1408_v33, %v1407_v32 }
 0xc4e   :  { %3640 = vmatmul.mubr.bf16.vlgmr.msra.gmra.mrb[44].mxu1 %v1409_v35  ;;  %v3185_v35 = vld [vmem:[%s5411_s13 + $0x5] ss:$0 sm:$0xff] }
 0xc4f   :  { %3655 = vmatprep.mubr.msk.bf16.mxu1 %vm4094_vm1, %v4093_v15 }
 0xd21   :  { %v1444_v56 = vpop.f32.mrb[44].mxu1 }
 0xd22   :  { %v3641_v57 = vpop.f32.mrb[45].mxu1 }
 0xd23   :  { %v1447_v52 = vpop.f32.mrb[46].mxu1 }
 0xd24   :  { %v1451_v44 = vpack.c.bf16 %v1447_v52, %v1444_v56  ;;  %v3642_v30 = vpop.f32.mrb[47].mxu1 }
 0xd25   :  { %v3920_v30 = vld [vmem:[%s5409_s11 + $0x18] sm:$0xff]  }
 0xd26   :  { %3648 = vmatmul.mubr.msk.bf16.vlgmr.msra.gmra.mrb[40].mxu0 %vm82_vm0, %v1451_v44  ;;  %v3919_v44 = vld [vmem:[%s5409_s11 + $0x10] sm:$0xff]  }
 0xd27   :  { %3667 = vmatprep.mubr.msk.bf16.mxu0 %vm4094_vm1, %v4093_v15  ;;  %3660 = vmatpush3.bf16.msra.mxu0 %v3917_v1 }
 0xd28   :  { %3661 = vmatprep.subr.bf16.mxu0 %v4093_v15 }
 0xd2b   :  { %3662 = vmatpush3.bf16.msra.mxu0 %v3918_v12 }
 0xd2c   :  { %3663 = vmatprep.subr.bf16.mxu0 %v4093_v15 }
 0xd2f   :  { %3664 = vmatpush3.bf16.msra.mxu0 %v3919_v44 }
 0xd30   :  { %3665 = vmatprep.subr.bf16.mxu0 %v4093_v15 }
 0xd33   :  { %3666 = vmatpush3.bf16.msra.mxu0 %v3920_v30 }
 0xdf9   :  { %v1499_v51 = vpop.f32.mrb[40].mxu0 }
 0xdfa   :  { %v1500_v53 = vadd.f32 %v1499_v51, %v1460_v45  ;;  %v3649_v60 = vpop.f32.mrb[41].mxu0 }
 0xdfb   :  { %v1502_v54 = vpop.f32.mrb[42].mxu0 }
 0xdfc   :  { %v4757_v62 = vadd.f32 %v1500_v53, %v4427_v20  ;;  %v1503_v3 = vadd.f32 %v1502_v54, %v1460_v45  ;;  %v3650_v58 = vpop.f32.mrb[43].mxu0 }
 0xdfe   :  { %v4760_v4 = vadd.f32 %v1503_v3, %v4430_v22  ;;  %v1510_v59 = vsel %vm82_vm0, %v4757_v62, 0.0 }
 0xdff   :  { %1511 = vadd.xlane.f32.xlu1 %v1510_v59 }
 0xe00   :  { %v1513_v6 = vsel %vm82_vm0, %v4760_v4, 0.0 }
 0xe01   :  { %1514 = vadd.xlane.f32.xlu0 %v1513_v6 }
 0xe8c   :  { %v1512_v7 = vpop.xlane.xlu1 %1511 }
 0xe8d   :  { %v1516_v63 = vmul.f32 0.03125, %v1512_v7 }
 0xe8e   :  { %v1515_v8 = vpop.xlane.xlu0 %1514 }
 0xe8f   :  { %v1518_v5 = vsub.f32 %v4757_v62, %v1516_v63  ;;  %v1517_v20 = vmul.f32 0.03125, %v1515_v8  ;;  %v4806_v63 = vld [vmem:[%s5402_s4] sm:$0xff]  }
 0xe90   :  { %v1633_v8 = vld [vmem:[%s5409_s11 + $0x20] sm:$0x1] }
 0xe91   :  { %v1519_v10 = vsub.f32 %v4760_v4, %v1517_v20  ;;  %v1520_v14 = vmul.f32 %v1518_v5, %v1518_v5  ;;  %v1558_v41 = vmul.f32 %v3184_v23, %v1518_v5  ;;  %v1634_v5 = vunpack.c.l.bf16 %v1633_v8 }
 0xe93   :  { %v1522_v22 = vsel %vm82_vm0, %v1520_v14, 0.0  ;;  %v1521_v0 = vmul.f32 %v1519_v10, %v1519_v10  ;;  %v1559_v43 = vmul.f32 %v3184_v23, %v1519_v10  ;;  %v1638_v20 = vrot.slane %v1634_v5, %v4245_v61 }
 0xe94   :  { %1523 = vadd.xlane.f32.xlu0 %v1522_v22 }
 0xe95   :  { %v1525_v2 = vsel %vm82_vm0, %v1521_v0, 0.0 }
 0xe96   :  { %1526 = vadd.xlane.f32.xlu1 %v1525_v2 }
 0xea7   :  { %1571 = vrot.lane.b32.xlu1 %v4439_v26, %s4097_s24 }
 0xeaa   :  { %1569 = vrot.lane.b32.xlu0 %v4422_v11, %s4097_s24 }
 0xeab   :  { %1575 = vrot.lane.b32.xlu1 %v4664_v48, %s4097_s24 }
 0xf21   :  { %v1524_v26 = vpop.xlane.xlu0 %1523 }
 0xf22   :  { %v1528_v36 = vmul.f32 0.032258064, %v1524_v26 }
 0xf23   :  { %v1527_v11 = vpop.xlane.xlu1 %1526 }
 0xf24   :  { %3961 = vrsqrt.f32 %v1528_v36  ;;  %v1529_v28 = vmul.f32 0.032258064, %v1527_v11  ;;  %vm1532_vm12 = vcmp.eq.f32.partialorder %v1528_v36, inf  ;;  %v1535_v49 = vand.u32 2147483648, %v1528_v36 }
 0xf25   :  { %v1570_v48 = vpop.permute.xlu0 %1569  ;;  %vm1534_vm13 = vcmp.eq.f32.partialorder %v1528_v36, 0.0 }
 0xf26   :  { %3652 = vmatpush3.bf16.msra.mxu1 %v1570_v48  ;;  %3963 = vrsqrt.f32 %v1529_v28  ;;  %vm1539_vm14 = vcmp.eq.f32.partialorder %v1529_v28, inf  ;;  %v1542_v37 = vand.u32 2147483648, %v1529_v28  ;;  %vm1541_vm15 = vcmp.eq.f32.partialorder %v1529_v28, 0.0 }
 0xf27   :  { %v1572_v38 = vpop.permute.xlu1 %1571  ;;  %3653 = vmatprep.subr.bf16.mxu1 %v4093_v15 }
 0xf2a   :  { %3654 = vmatpush3.bf16.msra.mxu1 %v1572_v38 }
 0xf2b   :  { %3671 = vmatprep.subr.bf16.mxu1 %v4093_v15  ;;  %v1576_v45 = vpop.permute.xlu1 %1575 }
 0xf2e   :  { %v3962_v39 = vpop.eup %3961 }
 0xf2f   :  { %v1531_v47 = vmul.f32 %v3962_v39, %v1528_v36 }
 0xf30   :  { %v3964_v50 = vpop.eup %3963 }
 0xf31   :  { %v1533_v21 = vsel %vm1532_vm12, %v1528_v36, %v1531_v47  ;;  %v1538_v13 = vmul.f32 %v3964_v50, %v1529_v28 }
 0xf32   :  { %v1536_v16 = vsel %vm1534_vm13, %v1535_v49, %v1533_v21 }
 0xf33   :  { %v1544_v31 = vadd.f32 1e-06, %v1536_v16  ;;  %v1540_v27 = vsel %vm1539_vm14, %v1529_v28, %v1538_v13  ;;  %v3921_v16 = vld [vmem:[%s5408_s10 + $0x28] ss:$8 sps:$4 sm:$0xff]   ;;  %v3922_v13 = vld [vmem:[%s5408_s10 + $0x38] ss:$8 sps:$4 sm:$0xff]  }
 0xf34   :  { %v1543_v46 = vsel %vm1541_vm15, %v1542_v37, %v1540_v27 }
 0xf35   :  { %3965 = vrcp.f32 %v1544_v31  ;;  %v1545_v17 = vadd.f32 1e-06, %v1543_v46 }
 0xf37   :  { %3967 = vrcp.f32 %v1545_v17 }
 0xf3f   :  { %v3966_v18 = vpop.eup %3965 }
 0xf40   :  { %v1548_v19 = vmul.f32 %v3966_v18, %v1544_v31 }
 0xf41   :  { %v3968_v9 = vpop.eup %3967 }
 0xf42   :  { %v1550_v29 = vsub.f32 2.0, %v1548_v19  ;;  %v1549_v34 = vmul.f32 %v3968_v9, %v1545_v17 }
 0xf44   :  { %v1552_v40 = vmul.f32 %v3966_v18, %v1550_v29  ;;  %v1551_v42 = vsub.f32 2.0, %v1549_v34 }
 0xf46   :  { %v1553_v32 = vmul.f32 %v3968_v9, %v1551_v42  ;;  %v1560_v33 = vmul.f32 %v1558_v41, %v1552_v40 }
 0xf48   :  { %v1561_v55 = vmul.f32 %v1559_v43, %v1553_v32  ;;  %v1566_v56 = vadd.f32 %v3185_v35, %v1560_v33 }
 0xf4a   :  { %v1567_v57 = vadd.f32 %v3185_v35, %v1561_v55 }
 0xf4c   :  { %v1568_v52 = vpack.c.bf16 %v1567_v57, %v1566_v56  ;;  %v3194_v57 = vld [vmem:[%s5411_s13 + $0x8] ss:$0 sm:$0xff] }
 0xf4e   :  { %3656 = vmatmul.mubr.msk.bf16.vlgmr.msra.gmra.mrb[48].mxu1 %vm82_vm0, %v1568_v52 }
 0xf4f   :  { %3675 = vmatprep.mubr.msk.bf16.mxu1 %vm4094_vm1, %v4093_v15  ;;  %3672 = vmatpush3.bf16.msra.mxu1 %v3921_v16 }
 0xf50   :  { %3673 = vmatprep.subr.bf16.mxu1 %v4093_v15 }
 0xf53   :  { %3674 = vmatpush3.bf16.msra.mxu1 %v3922_v13 }
0x1021   :  { %v1615_v51 = vpop.f32.mrb[48].mxu1 }
0x1022   :  { %v1616_v53 = vadd.f32 %v1615_v51, %v1576_v45  ;;  %v3657_v60 = vpop.f32.mrb[49].mxu1 }
0x1023   :  { %v1618_v54 = vpop.f32.mrb[50].mxu1 }
0x1024   :  { %v1619_v3 = vadd.f32 %v1618_v54, %v1576_v45  ;;  %v3658_v58 = vpop.f32.mrb[51].mxu1  ;;  %v1622_v59 = vmax.f32 %v1616_v53, 0.0  ;;  %v3195_v54 = vld [vmem:[%s5411_s13 + $0xb] ss:$0 sm:$0xff] }
0x1026   :  { %v1623_v6 = vmax.f32 %v1619_v3, 0.0 }
0x1028   :  { %v1624_v7 = vpack.c.bf16 %v1623_v6, %v1622_v59 }
0x102a   :  { %3668 = vmatmul.mubr.msk.bf16.vlgmr.msra.gmra.mrb[44].mxu0 %vm535_vm7, %v1624_v7  ;;  %v3200_v7 = vld [vmem:[%s5408_s10 + $0x48] sm:$0x1] }
0x102b   :  { %3691 = vmatprep.mubr.msk.bf16.mxu0 %vm307_vm6, %v4806_v63  ;;  %v1777_v8 = vunpack.c.l.bf16 %v3200_v7 }
0x102d   :  { %v1781_v5 = vrot.slane %v1777_v8, %v4245_v61 }
0x10fd   :  { %v1700_v10 = vpop.f32.mrb[44].mxu0 }
0x10fe   :  { %v1701_v14 = vadd.f32 %v1700_v10, %v1638_v20  ;;  %v3669_v22 = vpop.f32.mrb[45].mxu0 }
0x10ff   :  { %v1703_v0 = vpop.f32.mrb[46].mxu0 }
0x1100   :  { %v4815_v2 = vadd.f32 %v1701_v14, %v4757_v62  ;;  %v1704_v1 = vadd.f32 %v1703_v0, %v1638_v20  ;;  %v3670_v12 = vpop.f32.mrb[47].mxu0 }
0x1102   :  { %v4818_v26 = vadd.f32 %v1704_v1, %v4760_v4  ;;  %v1712_v36 = vsel %vm82_vm0, %v4815_v2, 0.0 }
0x1103   :  { %1713 = vadd.xlane.f32.xlu1 %v1712_v36  ;;  %v4859_v36 = vld [vmem:[%s5402_s4 + $0x8] sm:$0xff]  }
0x1104   :  { %v1715_v11 = vsel %vm82_vm0, %v4818_v26, 0.0 }
0x1105   :  { %1716 = vadd.xlane.f32.xlu0 %v1715_v11  ;;  %v4866_v11 = vld [vmem:[%s5402_s4 + $0x10] sm:$0xff]  }
0x1190   :  { %v1714_v28 = vpop.xlane.xlu1 %1713 }
0x1191   :  { %v1718_v48 = vmul.f32 0.03125, %v1714_v28  ;;  %v4873_v28 = vld [vmem:[%s5402_s4 + $0x18] sm:$0xff]  }
0x1192   :  { %v1717_v38 = vpop.xlane.xlu0 %1716 }
0x1193   :  { %v1720_v39 = vsub.f32 %v4815_v2, %v1718_v48  ;;  %v1719_v62 = vmul.f32 0.03125, %v1717_v38 }
0x1195   :  { %v1721_v47 = vsub.f32 %v4818_v26, %v1719_v62  ;;  %v1722_v49 = vmul.f32 %v1720_v39, %v1720_v39  ;;  %v1760_v30 = vmul.f32 %v3194_v57, %v1720_v39  ;;  %v4882_v62 = vld [vmem:[%s5403_s5 + $0x10] sm:$0xff] }
0x1197   :  { %v1724_v4 = vsel %vm82_vm0, %v1722_v49, 0.0  ;;  %v1723_v50 = vmul.f32 %v1721_v47, %v1721_v47  ;;  %v1761_v51 = vmul.f32 %v3194_v57, %v1721_v47  ;;  %v4888_v49 = vld [vmem:[%s5403_s5 + $0x18] sm:$0xff] }
0x1198   :  { %1725 = vadd.xlane.f32.xlu0 %v1724_v4 }
0x1199   :  { %v1727_v21 = vsel %vm82_vm0, %v1723_v50, 0.0 }
0x119c   :  { %1728 = vadd.xlane.f32.xlu0 %v1727_v21  ;;  %v4894_v21 = vld [vmem:[%s5403_s5] sm:$0xff] }
0x1225   :  { %v1726_v31 = vpop.xlane.xlu0 %1725 }
0x1226   :  { %v1730_v37 = vmul.f32 0.032258064, %v1726_v31 }
0x1228   :  { %3969 = vrsqrt.f32 %v1730_v37  ;;  %vm1734_vm2 = vcmp.eq.f32.partialorder %v1730_v37, inf  ;;  %v1737_v19 = vand.u32 2147483648, %v1730_v37  ;;  %vm1736_vm3 = vcmp.eq.f32.partialorder %v1730_v37, 0.0 }
0x1229   :  { %v1729_v27 = vpop.xlane.xlu0 %1728 }
0x122a   :  { %v1731_v46 = vmul.f32 0.032258064, %v1729_v27 }
0x122c   :  { %3971 = vrsqrt.f32 %v1731_v46  ;;  %vm1741_vm4 = vcmp.eq.f32.partialorder %v1731_v46, inf  ;;  %v1744_v41 = vand.u32 2147483648, %v1731_v46  ;;  %vm1743_vm5 = vcmp.eq.f32.partialorder %v1731_v46, 0.0 }
0x1232   :  { %v3970_v17 = vpop.eup %3969 }
0x1233   :  { %v1733_v18 = vmul.f32 %v3970_v17, %v1730_v37 }
0x1235   :  { %v1735_v9 = vsel %vm1734_vm2, %v1730_v37, %v1733_v18  ;;  %v4907_v18 = vld [vmem:[%s5403_s5 + $0x30] sm:$0xff] }
0x1236   :  { %v3972_v23 = vpop.eup %3971  ;;  %v1738_v29 = vsel %vm1736_vm3, %v1737_v19, %v1735_v9 }
0x1237   :  { %v1746_v34 = vadd.f32 1e-06, %v1738_v29  ;;  %v1740_v40 = vmul.f32 %v3972_v23, %v1731_v46  ;;  %v4913_v23 = vld [vmem:[%s5403_s5 + $0x20] sm:$0xff] }
0x1239   :  { %3973 = vrcp.f32 %v1746_v34  ;;  %v1742_v42 = vsel %vm1741_vm4, %v1731_v46, %v1740_v40  ;;  %v4920_v40 = vld [vmem:[%s5403_s5 + $0x38] sm:$0xff] }
0x123a   :  { %v1745_v43 = vsel %vm1743_vm5, %v1744_v41, %v1742_v42 }
0x123b   :  { %v1747_v32 = vadd.f32 1e-06, %v1745_v43  ;;  %v4926_v43 = vld [vmem:[%s5403_s5 + $0x28] sm:$0xff] }
0x123d   :  { %3975 = vrcp.f32 %v1747_v32 }
0x1243   :  { %v3974_v33 = vpop.eup %3973 }
0x1244   :  { %v1750_v35 = vmul.f32 %v3974_v33, %v1746_v34 }
0x1246   :  { %v1752_v55 = vsub.f32 2.0, %v1750_v35 }
0x1247   :  { %v3976_v56 = vpop.eup %3975 }
0x1248   :  { %v1751_v52 = vmul.f32 %v3976_v56, %v1747_v32  ;;  %v1754_v44 = vmul.f32 %v3974_v33, %v1752_v55 }
0x124a   :  { %v1753_v45 = vsub.f32 2.0, %v1751_v52  ;;  %v1762_v60 = vmul.f32 %v1760_v30, %v1754_v44  ;;  %v4029_v44 = vld [vmem:[%s5400_s2] sm:$0xff] }
0x124c   :  { %v1755_v53 = vmul.f32 %v3976_v56, %v1753_v45  ;;  %v1768_v58 = vadd.f32 %v3195_v54, %v1762_v60 }
0x124e   :  { %v1763_v3 = vmul.f32 %v1761_v51, %v1755_v53  ;;  %v4030_v53 = vld [vmem:[%s5400_s2 + $0x8] sm:$0xff] }
0x1250   :  { %v1769_v59 = vadd.f32 %v3195_v54, %v1763_v3 }
0x1252   :  { %v1770_v6 = vpack.c.bf16 %v1769_v59, %v1768_v58 }
0x1254   :  { %3676 = vmatmul.mubr.msk.bf16.vlgmr.msra.gmra.mrb[52].mxu1 %vm82_vm0, %v1770_v6 }
0x1255   :  { %3681 = vmatprep.mubr.msk.bf16.mxu1 %vm307_vm6, %v4806_v63 }
0x1327   :  { %v1831_v20 = vpop.f32.mrb[52].mxu1 }
0x1328   :  { %v3677_v10 = vpop.f32.mrb[53].mxu1  ;;  %v1832_v22 = vadd.f32 %v1831_v20, %v1781_v5 }
0x1329   :  { %v1834_v14 = vpop.f32.mrb[54].mxu1 }
0x132a   :  { %v1835_v0 = vadd.f32 %v1834_v14, %v1781_v5  ;;  %v3678_v1 = vpop.f32.mrb[55].mxu1  ;;  %v4031_v14 = vld [vmem:[%s5404_s6] sm:$0xff]  }
0x132c   :  { %v4848_v12 = vpack.c.bf16 %v1835_v0, %v1832_v22  ;;  %v4032_v22 = vld [vmem:[%s5404_s6 + $0x8] sm:$0xff]   ;;  %v4033_v0 = vld [vmem:[%s5404_s6 + $0x10] sm:$0xff]  }
0x132e   :  { %1840 = vrot.lane.b32.xlu1 %v4848_v12, %s4095_s1 }
0x1332   :  { %2169 = vrot.lane.b32.xlu1 %v3921_v16, %s4096_s20 }
0x1336   :  { %2171 = vrot.lane.b32.xlu1 %v3922_v13, %s4096_s20  ;;  %v4900_v13 = vld [vmem:[%s5403_s5 + $0x8] sm:$0xff] }
0x133a   :  { %2176 = vrot.lane.b32.xlu1 %v1781_v5, %s4096_s20 }
0x13a0   :  { %v1841_v63 = vpop.permute.xlu1 %1840 }
0x13a1   :  { %3679 = vmatprep.subr.bf16.mxu1 %v1841_v63 }
0x13a2   :  { %3680 = vmatpush3.bf16.msra.mxu1 %v1841_v63  ;;  %v4034_v63 = vld [vmem:[%s5404_s6 + $0x18] sm:$0xff]  }
0x13a3   :  { %3699 = vmatprep.subr.bf16.mxu1 %v4093_v15 }
0x13a5   :  { %3682 = vmatmul.mubr.msk.bf16.vlgmr.msra.gmra.mrb[56].mxu1 %vm307_vm6, %v4859_v36 }
0x13a6   :  { %3685 = vmatprep.mubr.msk.bf16.mxu1 %vm307_vm6, %v4866_v11 }
0x13ad   :  { %3686 = vmatmul.mubr.msk.bf16.gmra.mrb[60].mxu1 %vm307_vm6, %v4873_v28 }
0x13ae   :  { %3707 = vmatprep.mubr.msk.bf16.mxu1 %vm4094_vm1, %v4093_v15 }
0x1478   :  { %v3683_v48 = vpop.f32.mrb[56].mxu1 }
0x1479   :  { %v1877_v38 = vpop.f32.mrb[57].mxu1  ;;  %v1910_v47 = vmul.f32 %v4882_v62, %v3683_v48 }
0x147a   :  { %v3684_v39 = vpop.f32.mrb[58].mxu1  ;;  %v1908_v16 = vmul.f32 %v4894_v21, %v1877_v38 }
0x147b   :  { %v1911_v4 = vmul.f32 %v4888_v49, %v3684_v39  ;;  %v1880_v50 = vpop.f32.mrb[59].mxu1 }
0x147c   :  { %v1909_v31 = vmul.f32 %v4900_v13, %v1880_v50 }
0x147d   :  { %v1917_v37 = vpack.c.bf16 %v1911_v4, %v1910_v47 }
0x147e   :  { %v1916_v27 = vpack.c.bf16 %v1909_v31, %v1908_v16 }
0x147f   :  { %v2007_v55 = vsel %vm82_vm0, %v1917_v37, 0 }
0x1480   :  { %v2004_v46 = vsel %vm82_vm0, %v1916_v27, 0  ;;  %v3687_v17 = vpop.f32.mrb[60].mxu1 }
0x1481   :  { %3700 = vmatpush3.bf16.xpose.msra.mxu1 %v2004_v46  ;;  %v1914_v19 = vmul.f32 %v4907_v18, %v3687_v17  ;;  %v1893_v9 = vpop.f32.mrb[61].mxu1 }
0x1482   :  { %v1912_v29 = vmul.f32 %v4913_v23, %v1893_v9  ;;  %v3688_v34 = vpop.f32.mrb[62].mxu1  ;;  %3701 = vmatprep.subr.bf16.mxu1 %v4093_v15 }
0x1483   :  { %v1915_v41 = vmul.f32 %v4920_v40, %v3688_v34  ;;  %v1896_v42 = vpop.f32.mrb[63].mxu1 }
0x1484   :  { %v1913_v32 = vmul.f32 %v4926_v43, %v1896_v42 }
0x1485   :  { %v1919_v33 = vpack.c.bf16 %v1915_v41, %v1914_v19 }
0x1486   :  { %v1918_v35 = vpack.c.bf16 %v1913_v32, %v1912_v29 }
0x1487   :  { %v2013_v57 = vsel %vm82_vm0, %v1919_v33, 0 }
0x1488   :  { %v2010_v56 = vsel %vm82_vm0, %v1918_v35, 0 }
0x1489   :  { %3702 = vmatpush3.bf16.xpose.msra.mxu1 %v2007_v55 }
0x148a   :  { %3703 = vmatprep.subr.bf16.mxu1 %v4093_v15 }
0x1491   :  { %3704 = vmatpush3.bf16.xpose.msra.mxu1 %v2010_v56 }
0x1492   :  { %3705 = vmatprep.subr.bf16.mxu1 %v4093_v15 }
0x1499   :  { %3706 = vmatpush3.bf16.xpose.msra.mxu1 %v2013_v57 }
0x149a   :  { %3735 = vmatprep.subr.bf16.mxu1 %v4093_v15 }
0x14a0   :  { %3708 = vmatmul.mubr.msk.bf16.vlgmr.msra.gmra.mrb[64].mxu1 %vm82_vm0, %v4848_v12 }
0x14a1   :  { %3739 = vmatprep.mubr.msk.bf16.mxu1 %vm4094_vm1, %v4093_v15 }
0x1573   :  { %v2049_v52 = vpop.f32.mrb[64].mxu1 }
0x1574   :  { %v2050_v30 = vadd.f32 %v4029_v44, %v2049_v52  ;;  %v3709_v45 = vpop.f32.mrb[65].mxu1 }
0x1575   :  { %v2052_v51 = vpop.f32.mrb[66].mxu1 }
0x1576   :  { %v2053_v60 = vadd.f32 %v4030_v53, %v2052_v51  ;;  %v3710_v54 = vpop.f32.mrb[67].mxu1  ;;  %v2056_v3 = vsel %vm535_vm7, %v2050_v30, -inf }
0x1577   :  { %2057 = vmax.xlane.f32.xlu0 %v2056_v3 }
0x1578   :  { %v2059_v58 = vsel %vm535_vm7, %v2053_v60, -inf }
0x157b   :  { %2060 = vmax.xlane.f32.xlu0 %v2059_v58 }
0x1591   :  { %1920 = vrot.lane.b32.xlu0 %v4848_v12, %s4097_s24 }
0x1604   :  { %v2058_v59 = vpop.xlane.xlu0 %2057 }
0x1605   :  { %v2062_v8 = vsub.f32 %v2050_v30, %v2058_v59  ;;  %v4997_v59 = vld [vmem:[%s5405_s7] sm:$0xff]  }
0x1607   :  { %v2064_v10 = vmul.f32 1.442695, %v2062_v8 }
0x1608   :  { %v2061_v6 = vpop.xlane.xlu0 %2060 }
0x1609   :  { %v2063_v7 = vsub.f32 %v2053_v60, %v2061_v6 }
0x160b   :  { %v2066_v20 = vmul.f32 1.442695, %v2063_v7 }
0x160c   :  { %v1921_v5 = vpop.permute.xlu0 %1920 }
0x160d   :  { %3689 = vmatprep.subr.bf16.mxu0 %v1921_v5  ;;  %3977 = vpow2.f32 %v2066_v20 }
0x160e   :  { %3690 = vmatpush3.bf16.msra.mxu0 %v1921_v5  ;;  %3979 = vpow2.f32 %v2064_v10 }
0x160f   :  { %3711 = vmatprep.subr.bf16.mxu0 %v4093_v15 }
0x1611   :  { %3692 = vmatmul.mubr.msk.bf16.vlgmr.msra.gmra.mrb[48].mxu0 %vm307_vm6, %v4859_v36 }
0x1612   :  { %3712 = vmatpush3.bf16.msra.mxu0 %v4031_v14  ;;  %3695 = vmatprep.mubr.msk.bf16.mxu0 %vm307_vm6, %v4866_v11  ;;  %v2170_v11 = vpop.permute.xlu1 %2169 }
0x1613   :  { %3713 = vmatprep.subr.bf16.mxu0 %v4093_v15  ;;  %3736 = vmatpush3.bf16.msra.mxu1 %v2170_v11 }
0x1614   :  { %3737 = vmatprep.subr.bf16.mxu1 %v4093_v15 }
0x1616   :  { %3714 = vmatpush3.bf16.msra.mxu0 %v4032_v22  ;;  %v2172_v51 = vpop.permute.xlu1 %2171 }
0x1617   :  { %3715 = vmatprep.subr.bf16.mxu0 %v4093_v15  ;;  %v3978_v1 = vpop.eup %3977  ;;  %3738 = vmatpush3.bf16.msra.mxu1 %v2172_v51 }
0x1618   :  { %v3980_v12 = vpop.eup %3979 }
0x1619   :  { %3696 = vmatmul.mubr.msk.bf16.gmra.mrb[52].mxu0 %vm307_vm6, %v4873_v28  ;;  %v2068_v36 = vpack.c.bf16 %v3978_v1, %v3980_v12 }
0x161a   :  { %3716 = vmatpush3.bf16.msra.mxu0 %v4033_v0  ;;  %3719 = vmatprep.mubr.msk.bf16.mxu0 %vm4094_vm1, %v4093_v15  ;;  %v2177_v6 = vpop.permute.xlu1 %2176 }
0x161b   :  { %3717 = vmatprep.subr.bf16.mxu0 %v4093_v15 }
0x161e   :  { %3718 = vmatpush3.bf16.msra.mxu0 %v4034_v63 }
0x161f   :  { %3723 = vmatprep.subr.bf16.mxu0 %v4093_v15 }
0x1621   :  { %3720 = vmatmul.mubr.msk.bf16.vlgmr.msra.gmra.mrb[56].mxu0 %vm535_vm7, %v2068_v36 }
0x1622   :  { %3731 = vmatprep.mubr.msk.bf16.mxu0 %vm4094_vm1, %v4093_v15 }
0x16e4   :  { %v3693_v28 = vpop.f32.mrb[48].mxu0 }
0x16e5   :  { %v1957_v48 = vpop.f32.mrb[49].mxu0  ;;  %v1990_v39 = vmul.f32 %v4882_v62, %v3693_v28 }
0x16e6   :  { %v3694_v38 = vpop.f32.mrb[50].mxu0  ;;  %v1988_v50 = vmul.f32 %v4894_v21, %v1957_v48 }
0x16e7   :  { %v1991_v47 = vmul.f32 %v4888_v49, %v3694_v38  ;;  %v1960_v4 = vpop.f32.mrb[51].mxu0 }
0x16e8   :  { %v1989_v16 = vmul.f32 %v4900_v13, %v1960_v4 }
0x16e9   :  { %v1997_v31 = vpack.c.bf16 %v1991_v47, %v1990_v39 }
0x16ea   :  { %v1996_v37 = vpack.c.bf16 %v1989_v16, %v1988_v50  ;;  %v5031_v16 = vld [vmem:[%s5405_s7 + $0x8] sm:$0xff]  }
0x16ec   :  { %v3697_v27 = vpop.f32.mrb[52].mxu0  ;;  %3724 = vmatpush3.bf16.msra.mxu0 %v1996_v37  ;;  %v5045_v37 = vld [vmem:[%s5408_s10 + $0x2c] ss:$8 sps:$4 sm:$0xff]  }
0x16ed   :  { %v1973_v46 = vpop.f32.mrb[53].mxu0  ;;  %3725 = vmatprep.subr.bf16.mxu0 %v4093_v15  ;;  %v1994_v19 = vmul.f32 %v4907_v18, %v3697_v27  ;;  %v5050_v27 = vld [vmem:[%s5405_s7 + $0x18] sm:$0xff]  }
0x16ee   :  { %v3698_v17 = vpop.f32.mrb[54].mxu0  ;;  %v1992_v49 = vmul.f32 %v4913_v23, %v1973_v46  ;;  %v5059_v46 = vld [vmem:[%s5405_s7 + $0x20] sm:$0xff]  }
0x16ef   :  { %v1995_v9 = vmul.f32 %v4920_v40, %v3698_v17  ;;  %v1976_v62 = vpop.f32.mrb[55].mxu0  ;;  %v5068_v17 = vld [vmem:[%s5408_s10 + $0x3c] ss:$8 sps:$4 sm:$0xff]  }
0x16f0   :  { %v1993_v29 = vmul.f32 %v4926_v43, %v1976_v62  ;;  %3726 = vmatpush3.bf16.msra.mxu0 %v1997_v31  ;;  %v5038_v31 = vld [vmem:[%s5405_s7 + $0x10] sm:$0xff]  }
0x16f1   :  { %v1999_v21 = vpack.c.bf16 %v1995_v9, %v1994_v19  ;;  %3727 = vmatprep.subr.bf16.mxu0 %v4093_v15  ;;  %v5074_v19 = vld [vmem:[%s5405_s7 + $0x28] sm:$0xff]   ;;  %v5090_v9 = vld [vmem:[%s5405_s7 + $0x38] sm:$0xff]  }
0x16f2   :  { %v1998_v13 = vpack.c.bf16 %v1993_v29, %v1992_v49 }
0x16f4   :  { %v2106_v34 = vpop.f32.mrb[56].mxu0  ;;  %3728 = vmatpush3.bf16.msra.mxu0 %v1998_v13 }
0x16f5   :  { %v2107_v41 = vadd.f32 1e-30, %v2106_v34  ;;  %v3721_v42 = vpop.f32.mrb[57].mxu0  ;;  %3729 = vmatprep.subr.bf16.mxu0 %v4093_v15 }
0x16f6   :  { %v2109_v32 = vpop.f32.mrb[58].mxu0 }
0x16f7   :  { %3981 = vrcp.f32 %v2107_v41  ;;  %v2110_v18 = vadd.f32 1e-30, %v2109_v32  ;;  %v3722_v40 = vpop.f32.mrb[59].mxu0 }
0x16f8   :  { %3730 = vmatpush3.bf16.msra.mxu0 %v1999_v21 }
0x16f9   :  { %3983 = vrcp.f32 %v2110_v18  ;;  %3743 = vmatprep.subr.bf16.mxu0 %v4093_v15 }
0x1701   :  { %v3982_v23 = vpop.eup %3981 }
0x1702   :  { %v2115_v43 = vmul.f32 %v3982_v23, %v2107_v41 }
0x1703   :  { %v3984_v33 = vpop.eup %3983 }
0x1704   :  { %v2117_v35 = vsub.f32 2.0, %v2115_v43  ;;  %v2116_v55 = vmul.f32 %v3984_v33, %v2110_v18 }
0x1706   :  { %v2119_v56 = vmul.f32 %v3982_v23, %v2117_v35  ;;  %v2118_v57 = vsub.f32 2.0, %v2116_v55 }
0x1708   :  { %v2120_v52 = vmul.f32 %v3984_v33, %v2118_v57  ;;  %v2121_v44 = vmul.f32 %v3980_v12, %v2119_v56 }
0x170a   :  { %v2122_v30 = vmul.f32 %v3978_v1, %v2120_v52 }
0x170c   :  { %v2123_v45 = vpack.c.bf16 %v2122_v30, %v2121_v44  ;;  %v3218_v44 = vld [vmem:[%s5411_s13 + $0x9] ss:$0 sm:$0xff] }
0x170e   :  { %3732 = vmatmul.mubr.msk.bf16.vlgmr.msra.gmra.mrb[60].mxu0 %vm535_vm7, %v2123_v45 }
0x170f   :  { %3747 = vmatprep.mubr.msk.bf16.mxu0 %vm4094_vm1, %v4093_v15  ;;  %3744 = vmatpush3.bf16.msra.mxu0 %v5045_v37 }
0x1710   :  { %3745 = vmatprep.subr.bf16.mxu0 %v4093_v15 }
0x1713   :  { %3746 = vmatpush3.bf16.msra.mxu0 %v5068_v17 }
0x17e1   :  { %v2161_v53 = vpop.f32.mrb[60].mxu0 }
0x17e2   :  { %v3733_v60 = vpop.f32.mrb[61].mxu0 }
0x17e3   :  { %v2164_v54 = vpop.f32.mrb[62].mxu0 }
0x17e4   :  { %v2168_v3 = vpack.c.bf16 %v2164_v54, %v2161_v53  ;;  %v3734_v58 = vpop.f32.mrb[63].mxu0 }
0x17e6   :  { %3740 = vmatmul.mubr.msk.bf16.vlgmr.msra.gmra.mrb[68].mxu1 %vm82_vm0, %v2168_v3 }
0x17e7   :  { %3755 = vmatprep.mubr.msk.bf16.mxu1 %vm82_vm0, %v4997_v59 }
0x18b9   :  { %v2216_v7 = vpop.f32.mrb[68].mxu1 }
0x18ba   :  { %v2217_v8 = vadd.f32 %v2216_v7, %v2177_v6  ;;  %v3741_v5 = vpop.f32.mrb[69].mxu1 }
0x18bb   :  { %v2219_v20 = vpop.f32.mrb[70].mxu1 }
0x18bc   :  { %v5002_v10 = vadd.f32 %v2217_v8, %v4815_v2  ;;  %v2220_v14 = vadd.f32 %v2219_v20, %v2177_v6  ;;  %v3742_v22 = vpop.f32.mrb[71].mxu1  ;;  %v3219_v6 = vld [vmem:[%s5411_s13 + $0xc] ss:$0 sm:$0xff] }
0x18bd   :  { %v4043_v22 = vld [vmem:[%s5407_s9] sm:$0xff]  }
0x18be   :  { %v5005_v0 = vadd.f32 %v2220_v14, %v4818_v26  ;;  %v2227_v1 = vsel %vm82_vm0, %v5002_v10, 0.0 }
0x18bf   :  { %2228 = vadd.xlane.f32.xlu1 %v2227_v1  ;;  %v4045_v1 = vld [vmem:[%s5407_s9 + $0x10] sm:$0xff]  }
0x18c0   :  { %v2230_v12 = vsel %vm82_vm0, %v5005_v0, 0.0 }
0x18c1   :  { %2231 = vadd.xlane.f32.xlu0 %v2230_v12  ;;  %v4046_v12 = vld [vmem:[%s5407_s9 + $0x18] sm:$0xff]  }
0x18d0   :  { %2354 = vrot.lane.b32.xlu1 %v4265_v24, %s4097_s24 }
0x18d7   :  { %2352 = vrot.lane.b32.xlu0 %v4267_v25, %s4097_s24 }
0x194c   :  { %v2229_v2 = vpop.xlane.xlu1 %2228 }
0x194d   :  { %v2233_v63 = vmul.f32 0.03125, %v2229_v2  ;;  %v4047_v2 = vld [vmem:[%s5407_s9 + $0x20] sm:$0xff]  }
0x194e   :  { %v2232_v36 = vpop.xlane.xlu0 %2231 }
0x194f   :  { %v5016_v26 = vsub.f32 %v5002_v10, %v2233_v63  ;;  %v2234_v11 = vmul.f32 0.03125, %v2232_v36  ;;  %v4048_v63 = vld [vmem:[%s5407_s9 + $0x28] sm:$0xff]  }
0x1950   :  { %v2355_v4 = vpop.permute.xlu1 %2354 }
0x1951   :  { %v5019_v28 = vsub.f32 %v5005_v0, %v2234_v11  ;;  %v2237_v48 = vmul.f32 %v5016_v26, %v5016_v26  ;;  %v2275_v53 = vmul.f32 %v3218_v44, %v5016_v26  ;;  %v5147_v26 = vld [vmem:[%s5406_s8 + $0x10] sm:$0xff] }
0x1952   :  { %v2353_v38 = vpop.permute.xlu0 %2352 }
0x1953   :  { %3751 = vmatprep.subr.bf16.mxu1 %v2353_v38  ;;  %v2239_v39 = vsel %vm82_vm0, %v2237_v48, 0.0  ;;  %v2238_v47 = vmul.f32 %v5019_v28, %v5019_v28  ;;  %v2276_v54 = vmul.f32 %v3218_v44, %v5019_v28  ;;  %v5155_v48 = vld [vmem:[%s5406_s8] sm:$0xff] }
0x1954   :  { %2240 = vadd.xlane.f32.xlu1 %v2239_v39  ;;  %3752 = vmatpush3.bf16.msra.mxu1 %v2353_v38 }
0x1955   :  { %3753 = vmatprep.subr.bf16.mxu1 %v2355_v4  ;;  %v2242_v50 = vsel %vm82_vm0, %v2238_v47, 0.0  ;;  %v4051_v47 = vld [vmem:[%s5407_s9 + $0x30] sm:$0xff]  }
0x1956   :  { %2243 = vadd.xlane.f32.xlu0 %v2242_v50 }
0x1958   :  { %3754 = vmatpush3.bf16.msra.mxu1 %v2355_v4  ;;  %v5166_v4 = vld [vmem:[%s5406_s8 + $0x18] sm:$0xff] }
0x1959   :  { %3791 = vmatprep.subr.bf16.mxu1 %v4093_v15 }
0x195b   :  { %3756 = vmatmul.mubr.msk.bf16.vlgmr.msra.gmra.mrb[72].mxu1 %vm82_vm0, %v5031_v16 }
0x195c   :  { %3759 = vmatprep.mubr.msk.bf16.mxu1 %vm82_vm0, %v5038_v31 }
0x1963   :  { %3760 = vmatmul.mubr.msk.bf16.gmra.mrb[76].mxu1 %vm82_vm0, %v5050_v27 }
0x1964   :  { %3763 = vmatprep.mubr.msk.bf16.mxu1 %vm82_vm0, %v5059_v46 }
0x1965   :  { %2481 = vrot.lane.b32.xlu1 %v4265_v24, %s4096_s20  ;;  %v5083_v24 = vld [vmem:[%s5405_s7 + $0x30] sm:$0xff]  }
0x196b   :  { %3764 = vmatmul.mubr.msk.bf16.gmra.mrb[80].mxu1 %vm82_vm0, %v5074_v19 }
0x196c   :  { %2479 = vrot.lane.b32.xlu0 %v4267_v25, %s4096_s20  ;;  %3767 = vmatprep.mubr.msk.bf16.mxu1 %vm82_vm0, %v5083_v24 }
0x1973   :  { %3768 = vmatmul.mubr.msk.bf16.gmra.mrb[84].mxu1 %vm82_vm0, %v5090_v9 }
0x1974   :  { %3807 = vmatprep.mubr.msk.bf16.mxu1 %vm4094_vm1, %v4093_v15 }
0x19e1   :  { %v2241_v25 = vpop.xlane.xlu1 %2240 }
0x19e2   :  { %v2245_v62 = vmul.f32 0.032258064, %v2241_v25 }
0x19e3   :  { %v2244_v49 = vpop.xlane.xlu0 %2243 }
0x19e4   :  { %3985 = vrsqrt.f32 %v2245_v62  ;;  %v2246_v29 = vmul.f32 0.032258064, %v2244_v49  ;;  %vm2249_vm6 = vcmp.eq.f32.partialorder %v2245_v62, inf  ;;  %v2252_v41 = vand.u32 2147483648, %v2245_v62 }
0x19e5   :  { %vm2251_vm8 = vcmp.eq.f32.partialorder %v2245_v62, 0.0  ;;  %v2482_v14 = vpop.permute.xlu1 %2481 }
0x19e6   :  { %3987 = vrsqrt.f32 %v2246_v29  ;;  %vm2256_vm9 = vcmp.eq.f32.partialorder %v2246_v29, inf  ;;  %v2259_v43 = vand.u32 2147483648, %v2246_v29  ;;  %vm2258_vm10 = vcmp.eq.f32.partialorder %v2246_v29, 0.0 }
0x19e7   :  { %v2480_v21 = vpop.permute.xlu0 %2479 }
0x19e8   :  { %3771 = vmatprep.subr.bf16.mxu0 %v2480_v21 }
0x19ee   :  { %v3986_v13 = vpop.eup %3985 }
0x19ef   :  { %v2248_v34 = vmul.f32 %v3986_v13, %v2245_v62 }
0x19f0   :  { %v3988_v42 = vpop.eup %3987 }
0x19f1   :  { %v2250_v32 = vsel %vm2249_vm6, %v2245_v62, %v2248_v34  ;;  %v2255_v40 = vmul.f32 %v3988_v42, %v2246_v29  ;;  %v5184_v62 = vld [vmem:[%s5406_s8 + $0x30] sm:$0xff] }
0x19f2   :  { %v2253_v18 = vsel %vm2251_vm8, %v2252_v41, %v2250_v32  ;;  %v5197_v41 = vld [vmem:[%s5406_s8 + $0x38] sm:$0xff] }
0x19f3   :  { %v2261_v23 = vadd.f32 1e-06, %v2253_v18  ;;  %v2257_v33 = vsel %vm2256_vm9, %v2246_v29, %v2255_v40  ;;  %v5203_v18 = vld [vmem:[%s5406_s8 + $0x28] sm:$0xff] }
0x19f4   :  { %v2260_v35 = vsel %vm2258_vm10, %v2259_v43, %v2257_v33 }
0x19f5   :  { %3989 = vrcp.f32 %v2261_v23  ;;  %v2262_v55 = vadd.f32 1e-06, %v2260_v35 }
0x19f7   :  { %3991 = vrcp.f32 %v2262_v55 }
0x19ff   :  { %v3990_v56 = vpop.eup %3989 }
0x1a00   :  { %v2265_v57 = vmul.f32 %v3990_v56, %v2261_v23 }
0x1a01   :  { %v3992_v52 = vpop.eup %3991 }
0x1a02   :  { %v2267_v30 = vsub.f32 2.0, %v2265_v57  ;;  %v2266_v45 = vmul.f32 %v3992_v52, %v2262_v55  ;;  %v5210_v55 = vld [vmem:[%s5406_s8 + $0x50] sm:$0xff] }
0x1a04   :  { %v2269_v51 = vmul.f32 %v3990_v56, %v2267_v30  ;;  %v2268_v60 = vsub.f32 2.0, %v2266_v45  ;;  %v5223_v45 = vld [vmem:[%s5406_s8 + $0x58] sm:$0xff] }
0x1a06   :  { %v2270_v3 = vmul.f32 %v3992_v52, %v2268_v60  ;;  %v2277_v58 = vmul.f32 %v2275_v53, %v2269_v51  ;;  %v5217_v52 = vld [vmem:[%s5406_s8 + $0x40] sm:$0xff]  ;;  %v5229_v60 = vld [vmem:[%s5406_s8 + $0x48] sm:$0xff] }
0x1a08   :  { %v2278_v7 = vmul.f32 %v2276_v54, %v2270_v3  ;;  %v2283_v8 = vadd.f32 %v3219_v6, %v2277_v58 }
0x1a0a   :  { %v2284_v5 = vadd.f32 %v3219_v6, %v2278_v7 }
0x1a0c   :  { %v2285_v20 = vpack.c.bf16 %v2284_v5, %v2283_v8  ;;  %v5236_v8 = vld [vmem:[%s5406_s8 + $0x70] sm:$0xff] }
0x1a0e   :  { %3748 = vmatmul.mubr.msk.bf16.vlgmr.msra.gmra.mrb[64].mxu0 %vm82_vm0, %v2285_v20 }
0x1a0f   :  { %3772 = vmatpush3.bf16.msra.mxu0 %v2480_v21  ;;  %3775 = vmatprep.mubr.msk.bf16.mxu0 %vm82_vm0, %v4997_v59  ;;  %v4044_v59 = vld [vmem:[%s5407_s9 + $0x8] sm:$0xff]   ;;  %v5191_v21 = vld [vmem:[%s5406_s8 + $0x20] sm:$0xff] }
0x1a10   :  { %3773 = vmatprep.subr.bf16.mxu0 %v2482_v14 }
0x1a13   :  { %3774 = vmatpush3.bf16.msra.mxu0 %v2482_v14  ;;  %v5243_v14 = vld [vmem:[%s5406_s8 + $0x60] sm:$0xff] }
0x1a14   :  { %3811 = vmatprep.subr.bf16.mxu0 %v4093_v15 }
0x1a16   :  { %3776 = vmatmul.mubr.msk.bf16.vlgmr.msra.gmra.mrb[68].mxu0 %vm82_vm0, %v5031_v16 }
0x1a17   :  { %3812 = vmatpush3.bf16.msra.mxu0 %v4043_v22  ;;  %3779 = vmatprep.mubr.msk.bf16.mxu0 %vm82_vm0, %v5038_v31  ;;  %v5173_v31 = vld [vmem:[%s5406_s8 + $0x8] sm:$0xff] }
0x1a18   :  { %3813 = vmatprep.subr.bf16.mxu0 %v4093_v15 }
0x1a1b   :  { %3814 = vmatpush3.bf16.msra.mxu0 %v4044_v59 }
0x1a1c   :  { %3815 = vmatprep.subr.bf16.mxu0 %v4093_v15 }
0x1a1e   :  { %3780 = vmatmul.mubr.msk.bf16.gmra.mrb[72].mxu0 %vm82_vm0, %v5050_v27 }
0x1a1f   :  { %3816 = vmatpush3.bf16.msra.mxu0 %v4045_v1  ;;  %3783 = vmatprep.mubr.msk.bf16.mxu0 %vm82_vm0, %v5059_v46  ;;  %v5249_v1 = vld [vmem:[%s5406_s8 + $0x78] sm:$0xff] }
0x1a20   :  { %3817 = vmatprep.subr.bf16.mxu0 %v4093_v15 }
0x1a23   :  { %3818 = vmatpush3.bf16.msra.mxu0 %v4046_v12 }
0x1a24   :  { %3819 = vmatprep.subr.bf16.mxu0 %v4093_v15 }
0x1a26   :  { %3784 = vmatmul.mubr.msk.bf16.gmra.mrb[76].mxu0 %vm82_vm0, %v5074_v19 }
0x1a27   :  { %3820 = vmatpush3.bf16.msra.mxu0 %v4047_v2  ;;  %3787 = vmatprep.mubr.msk.bf16.mxu0 %vm82_vm0, %v5083_v24  ;;  %v4054_v24 = vld [vmem:[%s5407_s9 + $0x38] sm:$0xff]  }
0x1a28   :  { %3821 = vmatprep.subr.bf16.mxu0 %v4093_v15 }
0x1a2b   :  { %3822 = vmatpush3.bf16.msra.mxu0 %v4048_v63  ;;  %v5255_v63 = vld [vmem:[%s5406_s8 + $0x68] sm:$0xff] }
0x1a2c   :  { %3823 = vmatprep.subr.bf16.mxu0 %v4093_v15 }
0x1a2e   :  { %v3757_v36 = vpop.f32.mrb[72].mxu1  ;;  %3788 = vmatmul.mubr.msk.bf16.gmra.mrb[80].mxu0 %vm82_vm0, %v5090_v9 }
0x1a2f   :  { %v2457_v11 = vmul.f32 %v5147_v26, %v3757_v36  ;;  %v2392_v28 = vpop.f32.mrb[73].mxu1  ;;  %3824 = vmatpush3.bf16.msra.mxu0 %v4051_v47  ;;  %3827 = vmatprep.mubr.msk.bf16.mxu0 %vm4094_vm1, %v4093_v15 }
0x1a30   :  { %v2455_v38 = vmul.f32 %v5155_v48, %v2392_v28  ;;  %v3758_v39 = vpop.f32.mrb[74].mxu1  ;;  %3825 = vmatprep.subr.bf16.mxu0 %v4093_v15 }
0x1a31   :  { %v2458_v50 = vmul.f32 %v5166_v4, %v3758_v39  ;;  %v2395_v16 = vpop.f32.mrb[75].mxu1 }
0x1a32   :  { %v2456_v27 = vmul.f32 %v5173_v31, %v2395_v16 }
0x1a33   :  { %v2472_v46 = vpack.c.bf16 %v2458_v50, %v2457_v11  ;;  %3826 = vmatpush3.bf16.msra.mxu0 %v4054_v24 }
0x1a34   :  { %v2471_v19 = vpack.c.bf16 %v2456_v27, %v2455_v38  ;;  %3831 = vmatprep.subr.bf16.mxu0 %v4093_v15  ;;  %v3224_v27 = vld [vmem:[%s5408_s10 + $0x4c] sm:$0x1] }
0x1a35   :  { %v2614_v43 = vsel %vm82_vm0, %v2472_v46, 0  ;;  %v2291_v46 = vunpack.c.l.bf16 %v3224_v27 }
0x1a36   :  { %v2611_v9 = vsel %vm82_vm0, %v2471_v19, 0  ;;  %v3761_v25 = vpop.f32.mrb[76].mxu1 }
0x1a37   :  { %3792 = vmatpush3.bf16.xpose.msra.mxu1 %v2611_v9  ;;  %v2461_v49 = vmul.f32 %v5184_v62, %v3761_v25  ;;  %v2408_v29 = vpop.f32.mrb[77].mxu1  ;;  %v5272_v19 = vrot.slane %v2291_v46, %v4245_v61 }
0x1a38   :  { %3793 = vmatprep.subr.bf16.mxu1 %v4093_v15  ;;  %v2459_v13 = vmul.f32 %v5191_v21, %v2408_v29  ;;  %v3762_v34 = vpop.f32.mrb[78].mxu1 }
0x1a39   :  { %v2462_v42 = vmul.f32 %v5197_v41, %v3762_v34  ;;  %v2411_v32 = vpop.f32.mrb[79].mxu1 }
0x1a3a   :  { %v2460_v40 = vmul.f32 %v5203_v18, %v2411_v32  ;;  %v4067_v32 = vld [vmem:[%s5401_s3] sm:$0xff] }
0x1a3b   :  { %v2474_v23 = vpack.c.bf16 %v2462_v42, %v2461_v49 }
0x1a3c   :  { %v2473_v33 = vpack.c.bf16 %v2460_v40, %v2459_v13 }
0x1a3d   :  { %v2620_v28 = vsel %vm82_vm0, %v2474_v23, 0 }
0x1a3e   :  { %v3765_v35 = vpop.f32.mrb[80].mxu1  ;;  %v2617_v58 = vsel %vm82_vm0, %v2473_v33, 0  ;;  %v4068_v33 = vld [vmem:[%s5401_s3 + $0x8] sm:$0xff] }
0x1a3f   :  { %3794 = vmatpush3.bf16.xpose.msra.mxu1 %v2614_v43  ;;  %v2465_v56 = vmul.f32 %v5210_v55, %v3765_v35  ;;  %v2424_v57 = vpop.f32.mrb[81].mxu1 }
0x1a40   :  { %3795 = vmatprep.subr.bf16.mxu1 %v4093_v15  ;;  %v2463_v44 = vmul.f32 %v5217_v52, %v2424_v57  ;;  %v3766_v30 = vpop.f32.mrb[82].mxu1 }
0x1a41   :  { %v2466_v51 = vmul.f32 %v5223_v45, %v3766_v30  ;;  %v2427_v53 = vpop.f32.mrb[83].mxu1 }
0x1a42   :  { %v2464_v54 = vmul.f32 %v5229_v60, %v2427_v53 }
0x1a43   :  { %v2476_v3 = vpack.c.bf16 %v2466_v51, %v2465_v56 }
0x1a44   :  { %v2475_v6 = vpack.c.bf16 %v2464_v54, %v2463_v44 }
0x1a45   :  { %v2626_v47 = vsel %vm82_vm0, %v2476_v3, 0 }
0x1a46   :  { %v3769_v7 = vpop.f32.mrb[84].mxu1  ;;  %v2623_v39 = vsel %vm82_vm0, %v2475_v6, 0 }
0x1a47   :  { %3796 = vmatpush3.bf16.xpose.msra.mxu1 %v2617_v58  ;;  %v2469_v5 = vmul.f32 %v5236_v8, %v3769_v7  ;;  %v2440_v20 = vpop.f32.mrb[85].mxu1 }
0x1a48   :  { %3797 = vmatprep.subr.bf16.mxu1 %v4093_v15  ;;  %v2467_v22 = vmul.f32 %v5243_v14, %v2440_v20  ;;  %v3770_v59 = vpop.f32.mrb[86].mxu1 }
0x1a49   :  { %v2470_v12 = vmul.f32 %v5249_v1, %v3770_v59  ;;  %v2443_v2 = vpop.f32.mrb[87].mxu1 }
0x1a4a   :  { %v2468_v36 = vmul.f32 %v5255_v63, %v2443_v2 }
0x1a4b   :  { %v2478_v11 = vpack.c.bf16 %v2470_v12, %v2469_v5 }
0x1a4c   :  { %v2477_v38 = vpack.c.bf16 %v2468_v36, %v2467_v22 }
0x1a4d   :  { %v2632_v16 = vsel %vm82_vm0, %v2478_v11, 0 }
0x1a4e   :  { %v2629_v50 = vsel %vm82_vm0, %v2477_v38, 0 }
0x1a4f   :  { %3798 = vmatpush3.bf16.xpose.msra.mxu1 %v2620_v28 }
0x1a50   :  { %3799 = vmatprep.subr.bf16.mxu1 %v4093_v15 }
0x1a57   :  { %3800 = vmatpush3.bf16.xpose.msra.mxu1 %v2623_v39 }
0x1a58   :  { %3801 = vmatprep.subr.bf16.mxu1 %v4093_v15 }
0x1a5f   :  { %3802 = vmatpush3.bf16.xpose.msra.mxu1 %v2626_v47 }
0x1a60   :  { %3803 = vmatprep.subr.bf16.mxu1 %v4093_v15 }
0x1a67   :  { %3804 = vmatpush3.bf16.xpose.msra.mxu1 %v2629_v50 }
0x1a68   :  { %3805 = vmatprep.subr.bf16.mxu1 %v4093_v15 }
0x1a6f   :  { %3806 = vmatpush3.bf16.xpose.msra.mxu1 %v2632_v16 }
0x1a70   :  { %3851 = vmatprep.subr.bf16.mxu1 %v4093_v15 }
0x1ae1   :  { %v2345_v24 = vpop.f32.mrb[64].mxu0 }
0x1ae2   :  { %v3749_v9 = vpop.f32.mrb[65].mxu0  ;;  %v2346_v49 = vadd.f32 %v2345_v24, %v5272_v19 }
0x1ae3   :  { %v2348_v25 = vpop.f32.mrb[66].mxu0 }
0x1ae4   :  { %v2349_v29 = vadd.f32 %v2348_v25, %v5272_v19  ;;  %v3750_v13 = vpop.f32.mrb[67].mxu0 }
0x1ae6   :  { %v2606_v34 = vpack.c.bf16 %v2349_v29, %v2346_v49 }
0x1ae8   :  { %3808 = vmatmul.mubr.msk.bf16.vlgmr.msra.gmra.mrb[88].mxu1 %vm82_vm0, %v2606_v34 }
0x1ae9   :  { %3855 = vmatprep.mubr.msk.bf16.mxu1 %vm4094_vm1, %v4093_v15  ;;  %v3777_v57 = vpop.f32.mrb[68].mxu0 }
0x1aea   :  { %v2584_v44 = vmul.f32 %v5147_v26, %v3777_v57  ;;  %v2519_v30 = vpop.f32.mrb[69].mxu0 }
0x1aeb   :  { %v2582_v51 = vmul.f32 %v5155_v48, %v2519_v30  ;;  %v3778_v53 = vpop.f32.mrb[70].mxu0 }
0x1aec   :  { %v2585_v54 = vmul.f32 %v5166_v4, %v3778_v53  ;;  %v2522_v3 = vpop.f32.mrb[71].mxu0 }
0x1aed   :  { %v2583_v58 = vmul.f32 %v5173_v31, %v2522_v3 }
0x1aee   :  { %v2599_v7 = vpack.c.bf16 %v2585_v54, %v2584_v44 }
0x1aef   :  { %v2598_v22 = vpack.c.bf16 %v2583_v58, %v2582_v51 }
0x1af1   :  { %v3781_v6 = vpop.f32.mrb[72].mxu0 }
0x1af2   :  { %v2588_v5 = vmul.f32 %v5184_v62, %v3781_v6  ;;  %v2535_v20 = vpop.f32.mrb[73].mxu0 }
0x1af3   :  { %v2586_v59 = vmul.f32 %v5191_v21, %v2535_v20  ;;  %v3782_v12 = vpop.f32.mrb[74].mxu0 }
0x1af4   :  { %v2589_v26 = vmul.f32 %v5197_v41, %v3782_v12  ;;  %v2538_v2 = vpop.f32.mrb[75].mxu0 }
0x1af5   :  { %v2587_v48 = vmul.f32 %v5203_v18, %v2538_v2 }
0x1af6   :  { %v2601_v11 = vpack.c.bf16 %v2589_v26, %v2588_v5 }
0x1af7   :  { %v2600_v31 = vpack.c.bf16 %v2587_v48, %v2586_v59 }
0x1af9   :  { %v3785_v36 = vpop.f32.mrb[76].mxu0 }
0x1afa   :  { %v2592_v4 = vmul.f32 %v5210_v55, %v3785_v36  ;;  %v2551_v28 = vpop.f32.mrb[77].mxu0 }
0x1afb   :  { %v2590_v38 = vmul.f32 %v5217_v52, %v2551_v28  ;;  %v3786_v39 = vpop.f32.mrb[78].mxu0 }
0x1afc   :  { %v2593_v62 = vmul.f32 %v5223_v45, %v3786_v39  ;;  %v2554_v47 = vpop.f32.mrb[79].mxu0 }
0x1afd   :  { %v2591_v21 = vmul.f32 %v5229_v60, %v2554_v47 }
0x1afe   :  { %v2603_v50 = vpack.c.bf16 %v2593_v62, %v2592_v4 }
0x1aff   :  { %v2602_v16 = vpack.c.bf16 %v2591_v21, %v2590_v38 }
0x1b01   :  { %v3789_v41 = vpop.f32.mrb[80].mxu0 }
0x1b02   :  { %v2596_v27 = vmul.f32 %v5236_v8, %v3789_v41  ;;  %v2567_v18 = vpop.f32.mrb[81].mxu0 }
0x1b03   :  { %v2594_v46 = vmul.f32 %v5243_v14, %v2567_v18  ;;  %v3790_v24 = vpop.f32.mrb[82].mxu0 }
0x1b04   :  { %v2597_v55 = vmul.f32 %v5249_v1, %v3790_v24  ;;  %v2570_v9 = vpop.f32.mrb[83].mxu0 }
0x1b05   :  { %v2595_v52 = vmul.f32 %v5255_v63, %v2570_v9 }
0x1b06   :  { %v2605_v25 = vpack.c.bf16 %v2597_v55, %v2596_v27  ;;  %v3926_v55 = vld [vmem:[%s5409_s11 + $0x2c] sm:$0xff]  }
0x1b07   :  { %v2604_v49 = vpack.c.bf16 %v2595_v52, %v2594_v46 }
0x1bbb   :  { %v2668_v42 = vpop.f32.mrb[88].mxu1 }
0x1bbc   :  { %v2669_v40 = vadd.f32 %v4067_v32, %v2668_v42  ;;  %v3809_v23 = vpop.f32.mrb[89].mxu1 }
0x1bbd   :  { %v2671_v43 = vpop.f32.mrb[90].mxu1 }
0x1bbe   :  { %v2672_v35 = vadd.f32 %v4068_v33, %v2671_v43  ;;  %2675 = vmax.xlane.f32.xlu1 %v2669_v40  ;;  %v3810_v56 = vpop.f32.mrb[91].mxu1 }
0x1bc0   :  { %2677 = vmax.xlane.f32.xlu0 %v2672_v35 }
0x1bcf   :  { %2782 = vrot.lane.b32.xlu1 %v5068_v17, %s4095_s1 }
0x1bd3   :  { %2787 = vrot.lane.b32.xlu1 %v5272_v19, %s4095_s1 }
0x1bd6   :  { %2780 = vrot.lane.b32.xlu0 %v5045_v37, %s4095_s1 }
0x1c4b   :  { %v2676_v45 = vpop.xlane.xlu1 %2675 }
0x1c4c   :  { %v2679_v29 = vsub.f32 %v2669_v40, %v2676_v45 }
0x1c4d   :  { %v2678_v13 = vpop.xlane.xlu0 %2677 }
0x1c4e   :  { %v2681_v60 = vmul.f32 1.442695, %v2679_v29  ;;  %v2680_v34 = vsub.f32 %v2672_v35, %v2678_v13 }
0x1c4f   :  { %v2783_v5 = vpop.permute.xlu1 %2782 }
0x1c50   :  { %v2683_v42 = vmul.f32 1.442695, %v2680_v34  ;;  %3993 = vpow2.f32 %v2681_v60 }
0x1c51   :  { %v2781_v14 = vpop.permute.xlu0 %2780 }
0x1c52   :  { %3995 = vpow2.f32 %v2683_v42  ;;  %3852 = vmatpush3.bf16.msra.mxu1 %v2781_v14 }
0x1c53   :  { %3853 = vmatprep.subr.bf16.mxu1 %v4093_v15  ;;  %v2788_v2 = vpop.permute.xlu1 %2787 }
0x1c56   :  { %3854 = vmatpush3.bf16.msra.mxu1 %v2783_v5 }
0x1c57   :  { %3867 = vmatprep.subr.bf16.mxu1 %v4093_v15 }
0x1c5a   :  { %v3994_v8 = vpop.eup %3993 }
0x1c5c   :  { %v3996_v32 = vpop.eup %3995 }
0x1c5d   :  { %v2685_v23 = vpack.c.bf16 %v3996_v32, %v3994_v8 }
0x1c5f   :  { %3828 = vmatmul.mubr.bf16.vlgmr.msra.gmra.mrb[84].mxu0 %v2685_v23 }
0x1c60   :  { %3832 = vmatpush3.bf16.msra.mxu0 %v2598_v22  ;;  %3847 = vmatprep.mubr.msk.bf16.mxu0 %vm4094_vm1, %v4093_v15 }
0x1c61   :  { %3833 = vmatprep.subr.bf16.mxu0 %v4093_v15 }
0x1c64   :  { %3834 = vmatpush3.bf16.msra.mxu0 %v2599_v7 }
0x1c65   :  { %3835 = vmatprep.subr.bf16.mxu0 %v4093_v15 }
0x1c68   :  { %3836 = vmatpush3.bf16.msra.mxu0 %v2600_v31 }
0x1c69   :  { %3837 = vmatprep.subr.bf16.mxu0 %v4093_v15 }
0x1c6c   :  { %3838 = vmatpush3.bf16.msra.mxu0 %v2601_v11 }
0x1c6d   :  { %3839 = vmatprep.subr.bf16.mxu0 %v4093_v15 }
0x1c70   :  { %3840 = vmatpush3.bf16.msra.mxu0 %v2602_v16 }
0x1c71   :  { %3841 = vmatprep.subr.bf16.mxu0 %v4093_v15 }
0x1c74   :  { %3842 = vmatpush3.bf16.msra.mxu0 %v2603_v50 }
0x1c75   :  { %3843 = vmatprep.subr.bf16.mxu0 %v4093_v15 }
0x1c78   :  { %3844 = vmatpush3.bf16.msra.mxu0 %v2604_v49 }
0x1c79   :  { %3845 = vmatprep.subr.bf16.mxu0 %v4093_v15 }
0x1c7c   :  { %3846 = vmatpush3.bf16.msra.mxu0 %v2605_v25 }
0x1c7d   :  { %3859 = vmatprep.subr.bf16.mxu0 %v4093_v15 }
0x1d32   :  { %v2720_v1 = vpop.f32.mrb[84].mxu0 }
0x1d33   :  { %v2721_v63 = vadd.f32 1e-30, %v2720_v1  ;;  %v3829_v40 = vpop.f32.mrb[85].mxu0 }
0x1d34   :  { %v2723_v43 = vpop.f32.mrb[86].mxu0 }
0x1d35   :  { %3997 = vrcp.f32 %v2721_v63  ;;  %v2724_v33 = vadd.f32 1e-30, %v2723_v43  ;;  %v3830_v35 = vpop.f32.mrb[87].mxu0 }
0x1d37   :  { %3999 = vrcp.f32 %v2724_v33 }
0x1d3f   :  { %v3998_v56 = vpop.eup %3997 }
0x1d40   :  { %v2729_v57 = vmul.f32 %v3998_v56, %v2721_v63 }
0x1d41   :  { %v4000_v44 = vpop.eup %3999 }
0x1d42   :  { %v2731_v30 = vsub.f32 2.0, %v2729_v57  ;;  %v2730_v51 = vmul.f32 %v4000_v44, %v2724_v33 }
0x1d44   :  { %v2733_v53 = vmul.f32 %v3998_v56, %v2731_v30  ;;  %v2732_v54 = vsub.f32 2.0, %v2730_v51  ;;  %v3248_v56 = vld [vmem:[%s5411_s13 + $0xa] ss:$0 sm:$0xff] }
0x1d46   :  { %v2734_v3 = vmul.f32 %v4000_v44, %v2732_v54  ;;  %v2735_v58 = vmul.f32 %v3994_v8, %v2733_v53 }
0x1d48   :  { %v2736_v6 = vmul.f32 %v3996_v32, %v2734_v3 }
0x1d4a   :  { %v2737_v7 = vpack.c.bf16 %v2736_v6, %v2735_v58  ;;  %v3249_v58 = vld [vmem:[%s5411_s13 + $0xd] ss:$0 sm:$0xff] }
0x1d4c   :  { %3848 = vmatmul.mubr.bf16.vlgmr.msra.gmra.mrb[88].mxu0 %v2737_v7 }
0x1d4d   :  { %3863 = vmatprep.mubr.msk.bf16.mxu0 %vm4094_vm1, %v4093_v15 }
0x1e1f   :  { %v2772_v20 = vpop.f32.mrb[88].mxu0 }
0x1e20   :  { %v3849_v22 = vpop.f32.mrb[89].mxu0 }
0x1e21   :  { %v2775_v59 = vpop.f32.mrb[90].mxu0  ;;  %v3927_v22 = vld [vmem:[%s5409_s11 + $0x34] sm:$0xff]  }
0x1e22   :  { %v2779_v12 = vpack.c.bf16 %v2775_v59, %v2772_v20  ;;  %v3850_v26 = vpop.f32.mrb[91].mxu0  ;;  %v3928_v59 = vld [vmem:[%s5409_s11 + $0x3c] sm:$0xff]  }
0x1e24   :  { %3856 = vmatmul.mubr.msk.bf16.vlgmr.msra.gmra.mrb[92].mxu1 %vm82_vm0, %v2779_v12 }
0x1e25   :  { %3875 = vmatprep.mubr.msk.bf16.mxu1 %vm4094_vm1, %v4093_v15 }
0x1ef7   :  { %v2827_v48 = vpop.f32.mrb[92].mxu1 }
0x1ef8   :  { %v2828_v36 = vadd.f32 %v2827_v48, %v2788_v2  ;;  %v3857_v11 = vpop.f32.mrb[93].mxu1 }
0x1ef9   :  { %v2830_v4 = vpop.f32.mrb[94].mxu1 }
0x1efa   :  { %v5325_v28 = vadd.f32 %v2828_v36, %v5002_v10  ;;  %v2831_v31 = vadd.f32 %v2830_v4, %v2788_v2  ;;  %v3858_v38 = vpop.f32.mrb[95].mxu1 }
0x1efc   :  { %v5328_v39 = vadd.f32 %v2831_v31, %v5005_v0  ;;  %v2838_v62 = vsel %vm82_vm0, %v5325_v28, 0.0 }
0x1efd   :  { %2839 = vadd.xlane.f32.xlu1 %v2838_v62 }
0x1efe   :  { %v2841_v47 = vsel %vm82_vm0, %v5328_v39, 0.0 }
0x1eff   :  { %2842 = vadd.xlane.f32.xlu0 %v2841_v47 }
0x1f0e   :  { %2897 = vrot.lane.b32.xlu1 %v5045_v37, %s4097_s24 }
0x1f12   :  { %2903 = vrot.lane.b32.xlu1 %v5272_v19, %s4097_s24  ;;  %v3925_v19 = vld [vmem:[%s5409_s11 + $0x24] sm:$0xff]  }
0x1f13   :  { %3868 = vmatpush3.bf16.msra.mxu1 %v3925_v19 }
0x1f14   :  { %3869 = vmatprep.subr.bf16.mxu1 %v4093_v15 }
0x1f17   :  { %3870 = vmatpush3.bf16.msra.mxu1 %v3926_v55 }
0x1f18   :  { %3871 = vmatprep.subr.bf16.mxu1 %v4093_v15 }
0x1f1b   :  { %3872 = vmatpush3.bf16.msra.mxu1 %v3927_v22 }
0x1f1c   :  { %3873 = vmatprep.subr.bf16.mxu1 %v4093_v15 }
0x1f1f   :  { %3874 = vmatpush3.bf16.msra.mxu1 %v3928_v59 }
0x1f8a   :  { %v2840_v10 = vpop.xlane.xlu1 %2839 }
0x1f8b   :  { %v2844_v21 = vmul.f32 0.03125, %v2840_v10 }
0x1f8c   :  { %v2843_v50 = vpop.xlane.xlu0 %2842 }
0x1f8d   :  { %v2846_v0 = vsub.f32 %v5325_v28, %v2844_v21  ;;  %v2845_v16 = vmul.f32 0.03125, %v2843_v50 }
0x1f8e   :  { %v2898_v37 = vpop.permute.xlu1 %2897 }
0x1f8f   :  { %v2847_v41 = vsub.f32 %v5328_v39, %v2845_v16  ;;  %v2848_v27 = vmul.f32 %v2846_v0, %v2846_v0  ;;  %3860 = vmatpush3.bf16.msra.mxu0 %v2898_v37  ;;  %v2886_v30 = vmul.f32 %v3248_v56, %v2846_v0 }
0x1f90   :  { %3861 = vmatprep.subr.bf16.mxu0 %v4093_v15  ;;  %v3259_v15 = vld [vmem:[%s5409_s11 + $0x44] sm:$0x1] }
0x1f91   :  { %v2850_v18 = vsel %vm82_vm0, %v2848_v27, 0.0  ;;  %v2849_v46 = vmul.f32 %v2847_v41, %v2847_v41  ;;  %v2887_v53 = vmul.f32 %v3248_v56, %v2847_v41  ;;  %v2963_v47 = vunpack.c.l.bf16 %v3259_v15 }
0x1f92   :  { %2851 = vadd.xlane.f32.xlu0 %v2850_v18  ;;  %v2904_v12 = vpop.permute.xlu1 %2903 }
0x1f93   :  { %v2853_v24 = vsel %vm82_vm0, %v2849_v46, 0.0  ;;  %v2967_v10 = vrot.slane %v2963_v47, %v4245_v61 }
0x1f96   :  { %2854 = vadd.xlane.f32.xlu0 %v2853_v24 }
0x1fac   :  { %2899 = vrot.lane.b32.xlu0 %v5068_v17, %s4097_s24 }
0x201f   :  { %v2852_v9 = vpop.xlane.xlu0 %2851 }
0x2020   :  { %v2856_v17 = vmul.f32 0.032258064, %v2852_v9 }
0x2022   :  { %4001 = vrsqrt.f32 %v2856_v17  ;;  %vm2860_vm1 = vcmp.eq.f32.partialorder %v2856_v17, inf  ;;  %v2863_v13 = vand.u32 2147483648, %v2856_v17  ;;  %vm2862_vm11 = vcmp.eq.f32.partialorder %v2856_v17, 0.0 }
0x2023   :  { %v2855_v52 = vpop.xlane.xlu0 %2854 }
0x2024   :  { %v2857_v25 = vmul.f32 0.032258064, %v2855_v52 }
0x2026   :  { %4003 = vrsqrt.f32 %v2857_v25  ;;  %vm2867_vm12 = vcmp.eq.f32.partialorder %v2857_v25, inf  ;;  %v2870_v23 = vand.u32 2147483648, %v2857_v25  ;;  %vm2869_vm13 = vcmp.eq.f32.partialorder %v2857_v25, 0.0 }
0x2027   :  { %v2900_v49 = vpop.permute.xlu0 %2899 }
0x2028   :  { %3862 = vmatpush3.bf16.msra.mxu0 %v2900_v49 }
0x202c   :  { %v4002_v45 = vpop.eup %4001 }
0x202d   :  { %v2859_v29 = vmul.f32 %v4002_v45, %v2856_v17 }
0x202f   :  { %v2861_v60 = vsel %vm2860_vm1, %v2856_v17, %v2859_v29 }
0x2030   :  { %v4004_v34 = vpop.eup %4003  ;;  %v2864_v42 = vsel %vm2862_vm11, %v2863_v13, %v2861_v60 }
0x2031   :  { %v2872_v8 = vadd.f32 1e-06, %v2864_v42  ;;  %v2866_v32 = vmul.f32 %v4004_v34, %v2857_v25 }
0x2033   :  { %4005 = vrcp.f32 %v2872_v8  ;;  %v2868_v14 = vsel %vm2867_vm12, %v2857_v25, %v2866_v32 }
0x2034   :  { %v2871_v1 = vsel %vm2869_vm13, %v2870_v23, %v2868_v14 }
0x2035   :  { %v2873_v63 = vadd.f32 1e-06, %v2871_v1 }
0x2037   :  { %4007 = vrcp.f32 %v2873_v63 }
0x203d   :  { %v4006_v40 = vpop.eup %4005 }
0x203e   :  { %v2876_v43 = vmul.f32 %v4006_v40, %v2872_v8 }
0x2040   :  { %v2878_v33 = vsub.f32 2.0, %v2876_v43 }
0x2041   :  { %v4008_v35 = vpop.eup %4007 }
0x2042   :  { %v2877_v57 = vmul.f32 %v4008_v35, %v2873_v63  ;;  %v2880_v44 = vmul.f32 %v4006_v40, %v2878_v33 }
0x2044   :  { %v2879_v51 = vsub.f32 2.0, %v2877_v57  ;;  %v2888_v3 = vmul.f32 %v2886_v30, %v2880_v44  ;;  %v3265_v44 = vld [vmem:[%s5412_s14] ss:$0 sm:$0xff] }
0x2046   :  { %v2881_v54 = vmul.f32 %v4008_v35, %v2879_v51  ;;  %v2894_v7 = vadd.f32 %v3249_v58, %v2888_v3 }
0x2048   :  { %v2889_v6 = vmul.f32 %v2887_v53, %v2881_v54 }
0x204a   :  { %v2895_v5 = vadd.f32 %v3249_v58, %v2889_v6  ;;  %v3266_v58 = vld [vmem:[%s5412_s14 + $0x1] ss:$0 sm:$0xff] }
0x204c   :  { %v2896_v20 = vpack.c.bf16 %v2895_v5, %v2894_v7 }
0x204e   :  { %3864 = vmatmul.mubr.msk.bf16.vlgmr.msra.gmra.mrb[92].mxu0 %vm82_vm0, %v2896_v20 }
0x2121   :  { %v2943_v26 = vpop.f32.mrb[92].mxu0 }
0x2122   :  { %v2944_v2 = vadd.f32 %v2943_v26, %v2904_v12  ;;  %v3865_v48 = vpop.f32.mrb[93].mxu0 }
0x2123   :  { %v2946_v36 = vpop.f32.mrb[94].mxu0 }
0x2124   :  { %v2947_v11 = vadd.f32 %v2946_v36, %v2904_v12  ;;  %v3866_v4 = vpop.f32.mrb[95].mxu0  ;;  %v2950_v31 = vmax.f32 %v2944_v2, 0.0 }
0x2126   :  { %v2951_v38 = vmax.f32 %v2947_v11, 0.0 }
0x2128   :  { %v2952_v62 = vpack.c.bf16 %v2951_v38, %v2950_v31 }
0x212a   :  { %3876 = vmatmul.mubr.msk.bf16.vlgmr.msra.gmra.mrb[96].mxu1 %vm535_vm7, %v2952_v62 }
0x21fd   :  { %v3029_v21 = vpop.f32.mrb[96].mxu1 }
0x21fe   :  { %v3030_v50 = vadd.f32 %v3029_v21, %v2967_v10  ;;  %v3877_v0 = vpop.f32.mrb[97].mxu1 }
0x21ff   :  { %v3032_v16 = vpop.f32.mrb[98].mxu1 }
0x2200   :  { %v3033_v41 = vadd.f32 %v3032_v16, %v2967_v10  ;;  %v3878_v27 = vpop.f32.mrb[99].mxu1  ;;  %v3036_v18 = vadd.f32 %v3030_v50, %v5325_v28 }
0x2202   :  { %v3040_v46 = vsel %vm82_vm0, %v3036_v18, 0.0  ;;  %v3037_v24 = vadd.f32 %v3033_v41, %v5328_v39 }
0x2203   :  { %3041 = vadd.xlane.f32.xlu1 %v3040_v46 }
0x2204   :  { %v3043_v37 = vsel %vm82_vm0, %v3037_v24, 0.0 }
0x2205   :  { %3044 = vadd.xlane.f32.xlu0 %v3043_v37 }
0x2290   :  { %v3042_v19 = vpop.xlane.xlu1 %3041 }
0x2291   :  { %v3046_v55 = vmul.f32 0.03125, %v3042_v19 }
0x2292   :  { %v3045_v9 = vpop.xlane.xlu0 %3044 }
0x2293   :  { %v3048_v61 = vsub.f32 %v3036_v18, %v3046_v55  ;;  %v3047_v17 = vmul.f32 0.03125, %v3045_v9 }
0x2295   :  { %v3049_v52 = vsub.f32 %v3037_v24, %v3047_v17  ;;  %v3050_v25 = vmul.f32 %v3048_v61, %v3048_v61  ;;  %v3088_v54 = vmul.f32 %v3265_v44, %v3048_v61 }
0x2297   :  { %v3052_v49 = vsel %vm82_vm0, %v3050_v25, 0.0  ;;  %v3051_v45 = vmul.f32 %v3049_v52, %v3049_v52  ;;  %v3089_v5 = vmul.f32 %v3265_v44, %v3049_v52 }
0x2298   :  { %3053 = vadd.xlane.f32.xlu0 %v3052_v49 }
0x2299   :  { %v3055_v28 = vsel %vm82_vm0, %v3051_v45, 0.0 }
0x229a   :  { %3056 = vadd.xlane.f32.xlu1 %v3055_v28 }
0x2325   :  { %v3054_v29 = vpop.xlane.xlu0 %3053 }
0x2326   :  { %v3058_v39 = vmul.f32 0.032258064, %v3054_v29 }
0x2327   :  { %v3057_v13 = vpop.xlane.xlu1 %3056 }
0x2328   :  { %4009 = vrsqrt.f32 %v3058_v39  ;;  %v3059_v60 = vmul.f32 0.032258064, %v3057_v13  ;;  %vm3062_vm7 = vcmp.eq.f32.partialorder %v3058_v39, inf  ;;  %v3065_v8 = vand.u32 2147483648, %v3058_v39 }
0x2329   :  { %vm3064_vm14 = vcmp.eq.f32.partialorder %v3058_v39, 0.0 }
0x232a   :  { %4011 = vrsqrt.f32 %v3059_v60  ;;  %vm3069_vm15 = vcmp.eq.f32.partialorder %v3059_v60, inf  ;;  %v3072_v63 = vand.u32 2147483648, %v3059_v60  ;;  %vm3071_vm2 = vcmp.eq.f32.partialorder %v3059_v60, 0.0 }
0x2332   :  { %v4010_v34 = vpop.eup %4009 }
0x2333   :  { %v3061_v42 = vmul.f32 %v4010_v34, %v3058_v39 }
0x2334   :  { %v4012_v32 = vpop.eup %4011 }
0x2335   :  { %v3063_v23 = vsel %vm3062_vm7, %v3058_v39, %v3061_v42  ;;  %v3068_v14 = vmul.f32 %v4012_v32, %v3059_v60 }
0x2336   :  { %v3066_v1 = vsel %vm3064_vm14, %v3065_v8, %v3063_v23 }
0x2337   :  { %v3074_v40 = vadd.f32 1e-06, %v3066_v1  ;;  %v3070_v43 = vsel %vm3069_vm15, %v3059_v60, %v3068_v14 }
0x2338   :  { %v3073_v33 = vsel %vm3071_vm2, %v3072_v63, %v3070_v43 }
0x2339   :  { %4013 = vrcp.f32 %v3074_v40  ;;  %v3075_v35 = vadd.f32 1e-06, %v3073_v33 }
0x233b   :  { %4015 = vrcp.f32 %v3075_v35 }
0x2343   :  { %v4014_v56 = vpop.eup %4013 }
0x2344   :  { %v3078_v57 = vmul.f32 %v4014_v56, %v3074_v40 }
0x2345   :  { %v4016_v30 = vpop.eup %4015 }
0x2346   :  { %v3080_v51 = vsub.f32 2.0, %v3078_v57  ;;  %v3079_v53 = vmul.f32 %v4016_v30, %v3075_v35 }
0x2348   :  { %v3082_v3 = vmul.f32 %v4014_v56, %v3080_v51  ;;  %v3081_v6 = vsub.f32 2.0, %v3079_v53 }
0x234a   :  { %v3090_v7 = vmul.f32 %v3088_v54, %v3082_v3  ;;  %v3083_v20 = vmul.f32 %v4016_v30, %v3081_v6 }
0x234c   :  { %v3096_v22 = vadd.f32 %v3266_v58, %v3090_v7  ;;  %v3091_v59 = vmul.f32 %v3089_v5, %v3083_v20 }
0x234e   :  { %3098 = vst.msk [vmem:[#allocation2] sm:$0xff] %vm82_vm0, %v3096_v22  ;;  %v3097_v12 = vadd.f32 %v3266_v58, %v3091_v59 }
0x2350   :  { %3099 = vst.msk [vmem:[#allocation2 + $0x8] sm:$0xff] %vm82_vm0, %v3097_v12 }
0x2351   :  { %4080 = shalt.err (!%p4077_p4)
}
0x2352   :  { %s4081_s5 = scalar_lea.hbm %s5413_s15, 256 }
0x2353   :  { %p4082_p5 = scmp.ne.s32.totalorder %s5413_s15, %s4081_s5  ;;  %p4085_p6 = scmp.lt.u32.totalorder %s4081_s5, %s5413_s15 }
0x2355   :  { %p4087_p7 = pnand %p4085_p6, %p4082_p5 }
0x2357   :  { %4090 = shalt.err (!%p4087_p7)
}
0x2358   :  { %s4099_s9 = smov 128   ;;  %s4100_s25 = smov 8  }
0x2359   :  { %3111 = dma.vmem_to_hbm [thread:$0]  %s3106_s19, 256, %s5413_s15, [#allocation3], %s4099_s9, %s4099_s9, %s4100_s25  }
0x235a   :  { %4091 = dma.done.wait [#allocation3], 256  }
0x235b   :  { %4092 = vsyncadd [#allocation3], 4294967040 }
0x235c   :  { %3115 = vsyncpa [#allocation3], 1 }

</bundles_post_ra>
